<compile_context>
chip_gen: v6e
topology: v6e:2x2x1
jax: 0.10.0
libtpu: 0.0.40
codegen_flags: <defaults>
</compile_context>

<pallas_src>
import functools

import jax
import jax.numpy as jnp
from jax.experimental import pallas as pl
from jax.experimental.pallas import tpu as pltpu


_LANE_TILE = 512  # max tile along the M (= B*OH*OW) lane axis


def _round_up(x, m):
    return (x + m - 1) // m * m


def _elu(x):
    # exp on the clamped value avoids inf in the discarded branch of where();
    # the identity branch is selected exactly for x > 0.
    return jnp.where(x > 0, x, jnp.exp(jnp.minimum(x, 0.0)) - 1.0)


# ----------------------------------------------------------------------------
# Pallas kernels (hot path)
# ----------------------------------------------------------------------------
def _gemm_bias_kernel(w_ref, p_ref, b_ref, o_ref, *, apply_elu):
    # (Cout, K) @ (K, TM) + (Cout, 1)  [+ ELU]  -> lane-dense (Cout, TM)
    acc = jnp.dot(w_ref[...], p_ref[...], preferred_element_type=jnp.float32)
    acc = acc + b_ref[...]
    if apply_elu:
        acc = _elu(acc)
    o_ref[...] = acc


def _residual_tail_kernel(w2_ref, p2_ref, b2_ref, ws_ref, xs_ref, bs_ref, o_ref):
    # fused: strided conv2 GEMM + 1x1 strided skip GEMM + biases + sum + layer ELU
    acc = jnp.dot(w2_ref[...], p2_ref[...], preferred_element_type=jnp.float32)
    acc = acc + jnp.dot(ws_ref[...], xs_ref[...], preferred_element_type=jnp.float32)
    acc = acc + b2_ref[...] + bs_ref[...]
    o_ref[...] = _elu(acc)


# ----------------------------------------------------------------------------
# pallas_call wrappers (M-tiled, parallel grid axis, bf16 operands, f32 out)
# ----------------------------------------------------------------------------
def _lane_tiling(M):
    tm = min(_LANE_TILE, _round_up(max(M, 1), 128))
    mp = _round_up(M, tm)
    return tm, mp


def _pad_lanes(a, mp):
    m = a.shape[-1]
    return a if m == mp else jnp.pad(a, ((0, 0), (0, mp - m)))


def gemm_bias(wT, b, patchesT, apply_elu):
    """wT: (Cout, K) bf16, b: (Cout, 1) f32, patchesT: (K, M) bf16 -> (Cout, M) f32."""
    Cout, K = wT.shape
    M = patchesT.shape[1]
    tm, mp = _lane_tiling(M)
    patchesT = _pad_lanes(patchesT, mp)
    out = pl.pallas_call(
        functools.partial(_gemm_bias_kernel, apply_elu=apply_elu),
        out_shape=jax.ShapeDtypeStruct((Cout, mp), jnp.float32),
        grid=(mp // tm,),
        in_specs=[
            pl.BlockSpec((Cout, K), lambda i: (0, 0)),
            pl.BlockSpec((K, tm), lambda i: (0, i)),
            pl.BlockSpec((Cout, 1), lambda i: (0, 0)),
        ],
        out_specs=pl.BlockSpec((Cout, tm), lambda i: (0, i)),
        compiler_params=pltpu.CompilerParams(
            dimension_semantics=("parallel",)),
    )(wT, patchesT, b)
    return out[:, :M]


def residual_tail(w2T, b2, patches2T, wsT, bs, xsubT):
    """Fused conv2 + skip + sum + ELU.  All operands lane-dense over M."""
    Cout, K2 = w2T.shape
    Ks = wsT.shape[1]
    M = patches2T.shape[1]
    tm, mp = _lane_tiling(M)
    patches2T = _pad_lanes(patches2T, mp)
    xsubT = _pad_lanes(xsubT, mp)
    out = pl.pallas_call(
        _residual_tail_kernel,
        out_shape=jax.ShapeDtypeStruct((Cout, mp), jnp.float32),
        grid=(mp // tm,),
        in_specs=[
            pl.BlockSpec((Cout, K2), lambda i: (0, 0)),
            pl.BlockSpec((K2, tm), lambda i: (0, i)),
            pl.BlockSpec((Cout, 1), lambda i: (0, 0)),
            pl.BlockSpec((Cout, Ks), lambda i: (0, 0)),
            pl.BlockSpec((Ks, tm), lambda i: (0, i)),
            pl.BlockSpec((Cout, 1), lambda i: (0, 0)),
        ],
        out_specs=pl.BlockSpec((Cout, tm), lambda i: (0, i)),
        compiler_params=pltpu.CompilerParams(
            dimension_semantics=("parallel",)),
    )(w2T, patches2T, b2, wsT, xsubT, bs)
    return out[:, :M]


# ----------------------------------------------------------------------------
# Conv2d = channel-first im2col (bf16 glue) + Pallas GEMM
# ----------------------------------------------------------------------------
def _im2col_cfirst(x, kh, kw, stride, padding, k_pad):
    """x: (Cin, B, H, W) f32 -> patches^T (k_pad, B*OH*OW) bf16, plus (B, OH, OW)."""
    (pt, pb), (pL, pR) = padding
    if pt or pb or pL or pR:
        x = jnp.pad(x, ((0, 0), (0, 0), (pt, pb), (pL, pR)))
    Cin, B, H, W = x.shape
    sh, sw = stride
    OH = (H - kh) // sh + 1
    OW = (W - kw) // sw + 1
    xb = x.astype(jnp.bfloat16)
    rows = []
    for i in range(kh):
        for j in range(kw):
            rows.append(
                xb[:, :, i:i + (OH - 1) * sh + 1:sh, j:j + (OW - 1) * sw + 1:sw]
                .reshape(Cin, B * OH * OW))
    patchesT = jnp.concatenate(rows, axis=0)  # (kh*kw*Cin, M), tap-major/cin-minor
    K = kh * kw * Cin
    if k_pad > K:
        patchesT = jnp.pad(patchesT, ((0, k_pad - K), (0, 0)))
    return patchesT, (B, OH, OW)


def conv2d_cfirst(x, wT, b, kh, kw, stride=(1, 1), padding=((0, 0), (0, 0)),
                  apply_elu=False):
    """x: (Cin, B, H, W); wT: (Cout, Kpad) bf16; b: (Cout, 1) -> (Cout, B, OH, OW)."""
    patchesT, (B, OH, OW) = _im2col_cfirst(x, kh, kw, stride, padding, wT.shape[1])
    out = gemm_bias(wT, b, patchesT, apply_elu)
    return out.reshape(wT.shape[0], B, OH, OW)


# ----------------------------------------------------------------------------
# ResidualUnit2d + trailing ELU  (layers 1..6 are Sequential(ResidualUnit2d, ELU))
# ----------------------------------------------------------------------------
def residual_unit_elu(x, p, s_t, s_f):
    """x: (Cin, B, H, W) -> (m*N, B, OH, OW)."""
    # main branch: F.pad(x, [s_t+1, 0, s_f+1, 0]) -> W left by s_t+1, H top by s_f+1
    xp = jnp.pad(x, ((0, 0), (0, 0), (s_f + 1, 0), (s_t + 1, 0)))
    h = conv2d_cfirst(xp, p["w1"], p["b1"], 3, 3, stride=(1, 1),
                      padding=((1, 1), (1, 1)), apply_elu=True)   # 3x3 'same' + ELU
    kh2, kw2 = s_f + 2, s_t + 2
    patches2T, (B, OH, OW) = _im2col_cfirst(
        h, kh2, kw2, (s_f, s_t), ((0, 0), (0, 0)), p["w2"].shape[1])
    # skip: 1x1 strided conv == strided subsample of the un-padded input
    Cin = x.shape[0]
    xsub = x[:, :, 0:(OH - 1) * s_f + 1:s_f, 0:(OW - 1) * s_t + 1:s_t]
    xsubT = xsub.astype(jnp.bfloat16).reshape(Cin, B * OH * OW)
    Ks = p["ws"].shape[1]
    if Ks > Cin:
        xsubT = jnp.pad(xsubT, ((0, Ks - Cin), (0, 0)))
    out = residual_tail(p["w2"], p["b2"], patches2T, p["ws"], p["bs"], xsubT)
    return out.reshape(p["w2"].shape[0], B, OH, OW)


# ----------------------------------------------------------------------------
# Parameter construction (deterministic, PyTorch-default-like uniform init),
# pre-packed into the (Cout, Kpad) bf16 GEMM layout once at init time.
# ----------------------------------------------------------------------------
def _init_conv_gemm(key, kh, kw, cin, cout):
    k1, k2 = jax.random.split(key)
    bound = 1.0 / (kh * kw * cin) ** 0.5
    w = jax.random.uniform(k1, (kh, kw, cin, cout), jnp.float32, -bound, bound)
    b = jax.random.uniform(k2, (cout,), jnp.float32, -bound, bound)
    K = kh * kw * cin
    Kp = _round_up(K, 16)  # align contraction dim for bf16 sublane packing
    wT = jnp.pad(w.reshape(K, cout).T, ((0, 0), (0, Kp - K))).astype(jnp.bfloat16)
    return wT, b.reshape(cout, 1)


def _unit_cfgs(C):
    # (in_channels, N, m, s_t, s_f) for the six ResidualUnit2d layers
    return [
        (32, C, 2, 1, 2),
        (2 * C, 2 * C, 2, 2, 2),
        (4 * C, 4 * C, 1, 1, 2),
        (4 * C, 4 * C, 2, 2, 2),
        (8 * C, 8 * C, 1, 1, 2),
        (8 * C, 8 * C, 2, 2, 2),
    ]


def init_stft_discriminator_params(key, C, F_bins):
    keys = jax.random.split(key, 2 + 3 * 6)
    params = {}
    # layer 0: Conv2d(2, 32, (7, 7))
    params["conv0_w"], params["conv0_b"] = _init_conv_gemm(keys[0], 7, 7, 2, 32)
    params["units"] = []
    ki = 1
    for (cin, N, m, s_t, s_f) in _unit_cfgs(C):
        w1, b1 = _init_conv_gemm(keys[ki], 3, 3, cin, N)
        w2, b2 = _init_conv_gemm(keys[ki + 1], s_f + 2, s_t + 2, N, m * N)
        ws, bs = _init_conv_gemm(keys[ki + 2], 1, 1, cin, m * N)
        params["units"].append(
            {"w1": w1, "b1": b1, "w2": w2, "b2": b2, "ws": ws, "bs": bs})
        ki += 3
    # final layer: Conv2d(16*C, 1, (F_bins // 2**6, 1))
    params["convf_w"], params["convf_b"] = _init_conv_gemm(
        keys[ki], F_bins // 2 ** 6, 1, 16 * C, 1)
    return params


# ----------------------------------------------------------------------------
# STFTDiscriminator.forward
# ----------------------------------------------------------------------------
@functools.partial(jax.jit, static_argnums=(2, 3))
def stft_discriminator_forward(params, x_nchw, C, F_bins):
    """x_nchw: (B, 2, F_bins, T). Returns list of 8 feature maps in NCHW."""
    feature_map = []
    x = jnp.transpose(x_nchw, (1, 0, 2, 3))  # NCHW -> CNHW (channel-first)

    # layer 0: Conv2d(2, 32, (7,7)) valid + ELU
    x = conv2d_cfirst(x, params["conv0_w"], params["conv0_b"], 7, 7,
                      apply_elu=True)
    feature_map.append(jnp.transpose(x, (1, 0, 2, 3)))

    # layers 1..6: ResidualUnit2d + ELU
    for p, (_, _, _, s_t, s_f) in zip(params["units"], _unit_cfgs(C)):
        x = residual_unit_elu(x, p, s_t, s_f)
        feature_map.append(jnp.transpose(x, (1, 0, 2, 3)))

    # layer 7: Conv2d(16*C, 1, (F_bins//64, 1)) valid, no activation
    x = conv2d_cfirst(x, params["convf_w"], params["convf_b"],
                      F_bins // 2 ** 6, 1, apply_elu=False)
    feature_map.append(jnp.transpose(x, (1, 0, 2, 3)))
    return feature_map


# ----------------------------------------------------------------------------
if __name__ == "__main__":
    B, C, F_bins, T = 2, 4, 128, 16  # small, consistent shapes

    key = jax.random.PRNGKey(0)
    kx, kp = jax.random.split(key)
    x = jax.random.normal(kx, (B, 2, F_bins, T), jnp.float32)  # PyTorch NCHW input
    params = init_stft_discriminator_params(kp, C, F_bins)

    feats = stft_discriminator_forward(params, x, C, F_bins)
    feats = jax.block_until_ready(feats)

    # sanity-check shapes against the PyTorch reference semantics
    expected = [
        (B, 32, 122, 10),
        (B, 2 * C, 61, 10),
        (B, 4 * C, 31, 5),
        (B, 4 * C, 16, 5),
        (B, 8 * C, 8, 3),
        (B, 8 * C, 4, 3),
        (B, 16 * C, 2, 2),
        (B, 1, 1, 2),
    ]
    for f, e in zip(feats, expected):
        assert tuple(f.shape) == e, (f.shape, e)
        assert bool(jnp.all(jnp.isfinite(f)))

    print("KERNEL_OK")
</pallas_src>

<mosaic_0001>
module attributes {stable_mosaic.version = 11 : i64} {
  func.func @_gemm_bias_kernel(%arg0: i32, %arg1: memref<32x112xbf16, #tpu.memory_space<vmem>>, %arg2: memref<112x512xbf16, #tpu.memory_space<vmem>>, %arg3: memref<32x1xf32, #tpu.memory_space<vmem>>, %arg4: memref<32x512xf32, #tpu.memory_space<vmem>>) attributes {dimension_semantics = [#tpu.dimension_semantics<parallel>], iteration_bounds = array<i64: 5>, scalar_prefetch = 0 : i64, scratch_operands = 0 : i64, tpu.core_type = #tpu.core_type<tc>, window_params = [{pipeline_mode = #tpu.pipeline_mode<synchronous>, transform_indices = @transform_0, window_bounds = array<i64: 32, 112>}, {transform_indices = @transform_1, window_bounds = array<i64: 112, 512>}, {pipeline_mode = #tpu.pipeline_mode<synchronous>, transform_indices = @transform_2, window_bounds = array<i64: 32, 1>}, {transform_indices = @transform_3, window_bounds = array<i64: 32, 512>}]} {
    %c0 = arith.constant 0 : index
    %c0_0 = arith.constant 0 : index
    %0 = vector.load %arg1[%c0, %c0_0] : memref<32x112xbf16, #tpu.memory_space<vmem>>, vector<32x112xbf16>
    %c0_1 = arith.constant 0 : index
    %c0_2 = arith.constant 0 : index
    %1 = vector.load %arg2[%c0_1, %c0_2] : memref<112x512xbf16, #tpu.memory_space<vmem>>, vector<112x512xbf16>
    %cst = arith.constant dense<0.000000e+00> : vector<32x512xf32>
    %2 = tpu.matmul %0, %1, %cst {dimension_numbers = #tpu.dot_dimension_numbers<[1], [0], [0], [1], [0, 0, 1, 1], [], []>} : vector<32x112xbf16>, vector<112x512xbf16>, vector<32x512xf32> -> vector<32x512xf32>
    %c0_3 = arith.constant 0 : index
    %c0_4 = arith.constant 0 : index
    %3 = vector.load %arg3[%c0_3, %c0_4] : memref<32x1xf32, #tpu.memory_space<vmem>>, vector<32x1xf32>
    %4 = vector.broadcast %3 : vector<32x1xf32> to vector<32x512xf32>
    %5 = arith.addf %2, %4 : vector<32x512xf32>
    %cst_5 = arith.constant 0.000000e+00 : f32
    %6 = vector.broadcast %cst_5 : f32 to vector<32x512xf32>
    %7 = arith.cmpf ogt, %5, %6 : vector<32x512xf32>
    %cst_6 = arith.constant 0.000000e+00 : f32
    %8 = vector.broadcast %cst_6 : f32 to vector<32x512xf32>
    %9 = arith.minimumf %5, %8 : vector<32x512xf32>
    %10 = math.exp %9 : vector<32x512xf32>
    %cst_7 = arith.constant 1.000000e+00 : f32
    %11 = vector.broadcast %cst_7 : f32 to vector<32x512xf32>
    %12 = arith.subf %10, %11 : vector<32x512xf32>
    %13 = arith.select %7, %5, %12 : vector<32x512xi1>, vector<32x512xf32>
    %c0_8 = arith.constant 0 : index
    %c0_9 = arith.constant 0 : index
    %14 = vector.load %arg4[%c0_8, %c0_9] : memref<32x512xf32, #tpu.memory_space<vmem>>, vector<32x512xf32>
    tpu.vector_store %arg4[%c0_8, %c0_9], %13 {strides = array<i32>} : memref<32x512xf32, #tpu.memory_space<vmem>>, vector<32x512xf32>,
    return
  }
  func.func @transform_0(%arg0: i32) -> (i32, i32) {
    %c0_i32 = arith.constant 0 : i32
    %c0_i32_0 = arith.constant 0 : i32
    %c0_i32_1 = arith.constant 0 : i32
    return %c0_i32, %c0_i32_0 : i32, i32
  }
  func.func @transform_1(%arg0: i32) -> (i32, i32) {
    %c0_i32 = arith.constant 0 : i32
    %c0_i32_0 = arith.constant 0 : i32
    return %c0_i32, %arg0 : i32, i32
  }
  func.func @transform_2(%arg0: i32) -> (i32, i32) {
    %c0_i32 = arith.constant 0 : i32
    %c0_i32_0 = arith.constant 0 : i32
    %c0_i32_1 = arith.constant 0 : i32
    return %c0_i32, %c0_i32_0 : i32, i32
  }
  func.func @transform_3(%arg0: i32) -> (i32, i32) {
    %c0_i32 = arith.constant 0 : i32
    %c0_i32_0 = arith.constant 0 : i32
    return %c0_i32, %arg0 : i32, i32
  }
}

module attributes {stable_mosaic.version = 11 : i64} {
  func.func @_gemm_bias_kernel(%arg0: i32, %arg1: memref<4x288xbf16, #tpu.memory_space<vmem>>, %arg2: memref<288x512xbf16, #tpu.memory_space<vmem>>, %arg3: memref<4x1xf32, #tpu.memory_space<vmem>>, %arg4: memref<4x512xf32, #tpu.memory_space<vmem>>) attributes {dimension_semantics = [#tpu.dimension_semantics<parallel>], iteration_bounds = array<i64: 6>, scalar_prefetch = 0 : i64, scratch_operands = 0 : i64, tpu.core_type = #tpu.core_type<tc>, window_params = [{pipeline_mode = #tpu.pipeline_mode<synchronous>, transform_indices = @transform_0, window_bounds = array<i64: 4, 288>}, {transform_indices = @transform_1, window_bounds = array<i64: 288, 512>}, {pipeline_mode = #tpu.pipeline_mode<synchronous>, transform_indices = @transform_2, window_bounds = array<i64: 4, 1>}, {transform_indices = @transform_3, window_bounds = array<i64: 4, 512>}]} {
    %c0 = arith.constant 0 : index
    %c0_0 = arith.constant 0 : index
    %0 = vector.load %arg1[%c0, %c0_0] : memref<4x288xbf16, #tpu.memory_space<vmem>>, vector<4x288xbf16>
    %c0_1 = arith.constant 0 : index
    %c0_2 = arith.constant 0 : index
    %1 = vector.load %arg2[%c0_1, %c0_2] : memref<288x512xbf16, #tpu.memory_space<vmem>>, vector<288x512xbf16>
    %cst = arith.constant dense<0.000000e+00> : vector<4x512xf32>
    %2 = tpu.matmul %0, %1, %cst {dimension_numbers = #tpu.dot_dimension_numbers<[1], [0], [0], [1], [0, 0, 1, 1], [], []>} : vector<4x288xbf16>, vector<288x512xbf16>, vector<4x512xf32> -> vector<4x512xf32>
    %c0_3 = arith.constant 0 : index
    %c0_4 = arith.constant 0 : index
    %3 = vector.load %arg3[%c0_3, %c0_4] : memref<4x1xf32, #tpu.memory_space<vmem>>, vector<4x1xf32>
    %4 = vector.broadcast %3 : vector<4x1xf32> to vector<4x512xf32>
    %5 = arith.addf %2, %4 : vector<4x512xf32>
    %cst_5 = arith.constant 0.000000e+00 : f32
    %6 = vector.broadcast %cst_5 : f32 to vector<4x512xf32>
    %7 = arith.cmpf ogt, %5, %6 : vector<4x512xf32>
    %cst_6 = arith.constant 0.000000e+00 : f32
    %8 = vector.broadcast %cst_6 : f32 to vector<4x512xf32>
    %9 = arith.minimumf %5, %8 : vector<4x512xf32>
    %10 = math.exp %9 : vector<4x512xf32>
    %cst_7 = arith.constant 1.000000e+00 : f32
    %11 = vector.broadcast %cst_7 : f32 to vector<4x512xf32>
    %12 = arith.subf %10, %11 : vector<4x512xf32>
    %13 = arith.select %7, %5, %12 : vector<4x512xi1>, vector<4x512xf32>
    %c0_8 = arith.constant 0 : index
    %c0_9 = arith.constant 0 : index
    %14 = vector.load %arg4[%c0_8, %c0_9] : memref<4x512xf32, #tpu.memory_space<vmem>>, vector<4x512xf32>
    tpu.vector_store %arg4[%c0_8, %c0_9], %13 {strides = array<i32>} : memref<4x512xf32, #tpu.memory_space<vmem>>, vector<4x512xf32>,
    return
  }
  func.func @transform_0(%arg0: i32) -> (i32, i32) {
    %c0_i32 = arith.constant 0 : i32
    %c0_i32_0 = arith.constant 0 : i32
    %c0_i32_1 = arith.constant 0 : i32
    return %c0_i32, %c0_i32_0 : i32, i32
  }
  func.func @transform_1(%arg0: i32) -> (i32, i32) {
    %c0_i32 = arith.constant 0 : i32
    %c0_i32_0 = arith.constant 0 : i32
    return %c0_i32, %arg0 : i32, i32
  }
  func.func @transform_2(%arg0: i32) -> (i32, i32) {
    %c0_i32 = arith.constant 0 : i32
    %c0_i32_0 = arith.constant 0 : i32
    %c0_i32_1 = arith.constant 0 : i32
    return %c0_i32, %c0_i32_0 : i32, i32
  }
  func.func @transform_3(%arg0: i32) -> (i32, i32) {
    %c0_i32 = arith.constant 0 : i32
    %c0_i32_0 = arith.constant 0 : i32
    return %c0_i32, %arg0 : i32, i32
  }
}

module attributes {stable_mosaic.version = 11 : i64} {
  func.func @_residual_tail_kernel(%arg0: i32, %arg1: memref<8x48xbf16, #tpu.memory_space<vmem>>, %arg2: memref<48x512xbf16, #tpu.memory_space<vmem>>, %arg3: memref<8x1xf32, #tpu.memory_space<vmem>>, %arg4: memref<8x32xbf16, #tpu.memory_space<vmem>>, %arg5: memref<32x512xbf16, #tpu.memory_space<vmem>>, %arg6: memref<8x1xf32, #tpu.memory_space<vmem>>, %arg7: memref<8x512xf32, #tpu.memory_space<vmem>>) attributes {dimension_semantics = [#tpu.dimension_semantics<parallel>], iteration_bounds = array<i64: 3>, scalar_prefetch = 0 : i64, scratch_operands = 0 : i64, tpu.core_type = #tpu.core_type<tc>, window_params = [{pipeline_mode = #tpu.pipeline_mode<synchronous>, transform_indices = @transform_0, window_bounds = array<i64: 8, 48>}, {transform_indices = @transform_1, window_bounds = array<i64: 48, 512>}, {pipeline_mode = #tpu.pipeline_mode<synchronous>, transform_indices = @transform_2, window_bounds = array<i64: 8, 1>}, {pipeline_mode = #tpu.pipeline_mode<synchronous>, transform_indices = @transform_3, window_bounds = array<i64: 8, 32>}, {transform_indices = @transform_4, window_bounds = array<i64: 32, 512>}, {pipeline_mode = #tpu.pipeline_mode<synchronous>, transform_indices = @transform_5, window_bounds = array<i64: 8, 1>}, {transform_indices = @transform_6, window_bounds = array<i64: 8, 512>}]} {
    %c0 = arith.constant 0 : index
    %c0_0 = arith.constant 0 : index
    %0 = vector.load %arg1[%c0, %c0_0] : memref<8x48xbf16, #tpu.memory_space<vmem>>, vector<8x48xbf16>
    %c0_1 = arith.constant 0 : index
    %c0_2 = arith.constant 0 : index
    %1 = vector.load %arg2[%c0_1, %c0_2] : memref<48x512xbf16, #tpu.memory_space<vmem>>, vector<48x512xbf16>
    %cst = arith.constant dense<0.000000e+00> : vector<8x512xf32>
    %2 = tpu.matmul %0, %1, %cst {dimension_numbers = #tpu.dot_dimension_numbers<[1], [0], [0], [1], [0, 0, 1, 1], [], []>} : vector<8x48xbf16>, vector<48x512xbf16>, vector<8x512xf32> -> vector<8x512xf32>
    %c0_3 = arith.constant 0 : index
    %c0_4 = arith.constant 0 : index
    %3 = vector.load %arg4[%c0_3, %c0_4] : memref<8x32xbf16, #tpu.memory_space<vmem>>, vector<8x32xbf16>
    %c0_5 = arith.constant 0 : index
    %c0_6 = arith.constant 0 : index
    %4 = vector.load %arg5[%c0_5, %c0_6] : memref<32x512xbf16, #tpu.memory_space<vmem>>, vector<32x512xbf16>
    %cst_7 = arith.constant dense<0.000000e+00> : vector<8x512xf32>
    %5 = tpu.matmul %3, %4, %cst_7 {dimension_numbers = #tpu.dot_dimension_numbers<[1], [0], [0], [1], [0, 0, 1, 1], [], []>} : vector<8x32xbf16>, vector<32x512xbf16>, vector<8x512xf32> -> vector<8x512xf32>
    %6 = arith.addf %2, %5 : vector<8x512xf32>
    %c0_8 = arith.constant 0 : index
    %c0_9 = arith.constant 0 : index
    %7 = vector.load %arg3[%c0_8, %c0_9] : memref<8x1xf32, #tpu.memory_space<vmem>>, vector<8x1xf32>
    %8 = vector.broadcast %7 : vector<8x1xf32> to vector<8x512xf32>
    %9 = arith.addf %6, %8 : vector<8x512xf32>
    %c0_10 = arith.constant 0 : index
    %c0_11 = arith.constant 0 : index
    %10 = vector.load %arg6[%c0_10, %c0_11] : memref<8x1xf32, #tpu.memory_space<vmem>>, vector<8x1xf32>
    %11 = vector.broadcast %10 : vector<8x1xf32> to vector<8x512xf32>
    %12 = arith.addf %9, %11 : vector<8x512xf32>
    %cst_12 = arith.constant 0.000000e+00 : f32
    %13 = vector.broadcast %cst_12 : f32 to vector<8x512xf32>
    %14 = arith.cmpf ogt, %12, %13 : vector<8x512xf32>
    %cst_13 = arith.constant 0.000000e+00 : f32
    %15 = vector.broadcast %cst_13 : f32 to vector<8x512xf32>
    %16 = arith.minimumf %12, %15 : vector<8x512xf32>
    %17 = math.exp %16 : vector<8x512xf32>
    %cst_14 = arith.constant 1.000000e+00 : f32
    %18 = vector.broadcast %cst_14 : f32 to vector<8x512xf32>
    %19 = arith.subf %17, %18 : vector<8x512xf32>
    %20 = arith.select %14, %12, %19 : vector<8x512xi1>, vector<8x512xf32>
    %c0_15 = arith.constant 0 : index
    %c0_16 = arith.constant 0 : index
    %21 = vector.load %arg7[%c0_15, %c0_16] : memref<8x512xf32, #tpu.memory_space<vmem>>, vector<8x512xf32>
    tpu.vector_store %arg7[%c0_15, %c0_16], %20 {strides = array<i32>} : memref<8x512xf32, #tpu.memory_space<vmem>>, vector<8x512xf32>,
    return
  }
  func.func @transform_0(%arg0: i32) -> (i32, i32) {
    %c0_i32 = arith.constant 0 : i32
    %c0_i32_0 = arith.constant 0 : i32
    %c0_i32_1 = arith.constant 0 : i32
    return %c0_i32, %c0_i32_0 : i32, i32
  }
  func.func @transform_1(%arg0: i32) -> (i32, i32) {
    %c0_i32 = arith.constant 0 : i32
    %c0_i32_0 = arith.constant 0 : i32
    return %c0_i32, %arg0 : i32, i32
  }
  func.func @transform_2(%arg0: i32) -> (i32, i32) {
    %c0_i32 = arith.constant 0 : i32
    %c0_i32_0 = arith.constant 0 : i32
    %c0_i32_1 = arith.constant 0 : i32
    return %c0_i32, %c0_i32_0 : i32, i32
  }
  func.func @transform_3(%arg0: i32) -> (i32, i32) {
    %c0_i32 = arith.constant 0 : i32
    %c0_i32_0 = arith.constant 0 : i32
    %c0_i32_1 = arith.constant 0 : i32
    return %c0_i32, %c0_i32_0 : i32, i32
  }
  func.func @transform_4(%arg0: i32) -> (i32, i32) {
    %c0_i32 = arith.constant 0 : i32
    %c0_i32_0 = arith.constant 0 : i32
    return %c0_i32, %arg0 : i32, i32
  }
  func.func @transform_5(%arg0: i32) -> (i32, i32) {
    %c0_i32 = arith.constant 0 : i32
    %c0_i32_0 = arith.constant 0 : i32
    %c0_i32_1 = arith.constant 0 : i32
    return %c0_i32, %c0_i32_0 : i32, i32
  }
  func.func @transform_6(%arg0: i32) -> (i32, i32) {
    %c0_i32 = arith.constant 0 : i32
    %c0_i32_0 = arith.constant 0 : i32
    return %c0_i32, %arg0 : i32, i32
  }
}

module attributes {stable_mosaic.version = 11 : i64} {
  func.func @_gemm_bias_kernel(%arg0: i32, %arg1: memref<8x80xbf16, #tpu.memory_space<vmem>>, %arg2: memref<80x512xbf16, #tpu.memory_space<vmem>>, %arg3: memref<8x1xf32, #tpu.memory_space<vmem>>, %arg4: memref<8x512xf32, #tpu.memory_space<vmem>>) attributes {dimension_semantics = [#tpu.dimension_semantics<parallel>], iteration_bounds = array<i64: 4>, scalar_prefetch = 0 : i64, scratch_operands = 0 : i64, tpu.core_type = #tpu.core_type<tc>, window_params = [{pipeline_mode = #tpu.pipeline_mode<synchronous>, transform_indices = @transform_0, window_bounds = array<i64: 8, 80>}, {transform_indices = @transform_1, window_bounds = array<i64: 80, 512>}, {pipeline_mode = #tpu.pipeline_mode<synchronous>, transform_indices = @transform_2, window_bounds = array<i64: 8, 1>}, {transform_indices = @transform_3, window_bounds = array<i64: 8, 512>}]} {
    %c0 = arith.constant 0 : index
    %c0_0 = arith.constant 0 : index
    %0 = vector.load %arg1[%c0, %c0_0] : memref<8x80xbf16, #tpu.memory_space<vmem>>, vector<8x80xbf16>
    %c0_1 = arith.constant 0 : index
    %c0_2 = arith.constant 0 : index
    %1 = vector.load %arg2[%c0_1, %c0_2] : memref<80x512xbf16, #tpu.memory_space<vmem>>, vector<80x512xbf16>
    %cst = arith.constant dense<0.000000e+00> : vector<8x512xf32>
    %2 = tpu.matmul %0, %1, %cst {dimension_numbers = #tpu.dot_dimension_numbers<[1], [0], [0], [1], [0, 0, 1, 1], [], []>} : vector<8x80xbf16>, vector<80x512xbf16>, vector<8x512xf32> -> vector<8x512xf32>
    %c0_3 = arith.constant 0 : index
    %c0_4 = arith.constant 0 : index
    %3 = vector.load %arg3[%c0_3, %c0_4] : memref<8x1xf32, #tpu.memory_space<vmem>>, vector<8x1xf32>
    %4 = vector.broadcast %3 : vector<8x1xf32> to vector<8x512xf32>
    %5 = arith.addf %2, %4 : vector<8x512xf32>
    %cst_5 = arith.constant 0.000000e+00 : f32
    %6 = vector.broadcast %cst_5 : f32 to vector<8x512xf32>
    %7 = arith.cmpf ogt, %5, %6 : vector<8x512xf32>
    %cst_6 = arith.constant 0.000000e+00 : f32
    %8 = vector.broadcast %cst_6 : f32 to vector<8x512xf32>
    %9 = arith.minimumf %5, %8 : vector<8x512xf32>
    %10 = math.exp %9 : vector<8x512xf32>
    %cst_7 = arith.constant 1.000000e+00 : f32
    %11 = vector.broadcast %cst_7 : f32 to vector<8x512xf32>
    %12 = arith.subf %10, %11 : vector<8x512xf32>
    %13 = arith.select %7, %5, %12 : vector<8x512xi1>, vector<8x512xf32>
    %c0_8 = arith.constant 0 : index
    %c0_9 = arith.constant 0 : index
    %14 = vector.load %arg4[%c0_8, %c0_9] : memref<8x512xf32, #tpu.memory_space<vmem>>, vector<8x512xf32>
    tpu.vector_store %arg4[%c0_8, %c0_9], %13 {strides = array<i32>} : memref<8x512xf32, #tpu.memory_space<vmem>>, vector<8x512xf32>,
    return
  }
  func.func @transform_0(%arg0: i32) -> (i32, i32) {
    %c0_i32 = arith.constant 0 : i32
    %c0_i32_0 = arith.constant 0 : i32
    %c0_i32_1 = arith.constant 0 : i32
    return %c0_i32, %c0_i32_0 : i32, i32
  }
  func.func @transform_1(%arg0: i32) -> (i32, i32) {
    %c0_i32 = arith.constant 0 : i32
    %c0_i32_0 = arith.constant 0 : i32
    return %c0_i32, %arg0 : i32, i32
  }
  func.func @transform_2(%arg0: i32) -> (i32, i32) {
    %c0_i32 = arith.constant 0 : i32
    %c0_i32_0 = arith.constant 0 : i32
    %c0_i32_1 = arith.constant 0 : i32
    return %c0_i32, %c0_i32_0 : i32, i32
  }
  func.func @transform_3(%arg0: i32) -> (i32, i32) {
    %c0_i32 = arith.constant 0 : i32
    %c0_i32_0 = arith.constant 0 : i32
    return %c0_i32, %arg0 : i32, i32
  }
}

module attributes {stable_mosaic.version = 11 : i64} {
  func.func @_residual_tail_kernel(%arg0: i32, %arg1: memref<16x128xbf16, #tpu.memory_space<vmem>>, %arg2: memref<128x384xbf16, #tpu.memory_space<vmem>>, %arg3: memref<16x1xf32, #tpu.memory_space<vmem>>, %arg4: memref<16x16xbf16, #tpu.memory_space<vmem>>, %arg5: memref<16x384xbf16, #tpu.memory_space<vmem>>, %arg6: memref<16x1xf32, #tpu.memory_space<vmem>>, %arg7: memref<16x384xf32, #tpu.memory_space<vmem>>) attributes {dimension_semantics = [#tpu.dimension_semantics<parallel>], iteration_bounds = array<i64: 1>, scalar_prefetch = 0 : i64, scratch_operands = 0 : i64, tpu.core_type = #tpu.core_type<tc>, window_params = [{pipeline_mode = #tpu.pipeline_mode<synchronous>, transform_indices = @transform_0, window_bounds = array<i64: 16, 128>}, {transform_indices = @transform_1, window_bounds = array<i64: 128, 384>}, {pipeline_mode = #tpu.pipeline_mode<synchronous>, transform_indices = @transform_2, window_bounds = array<i64: 16, 1>}, {pipeline_mode = #tpu.pipeline_mode<synchronous>, transform_indices = @transform_3, window_bounds = array<i64: 16, 16>}, {transform_indices = @transform_4, window_bounds = array<i64: 16, 384>}, {pipeline_mode = #tpu.pipeline_mode<synchronous>, transform_indices = @transform_5, window_bounds = array<i64: 16, 1>}, {transform_indices = @transform_6, window_bounds = array<i64: 16, 384>}]} {
    %c0 = arith.constant 0 : index
    %c0_0 = arith.constant 0 : index
    %0 = vector.load %arg1[%c0, %c0_0] : memref<16x128xbf16, #tpu.memory_space<vmem>>, vector<16x128xbf16>
    %c0_1 = arith.constant 0 : index
    %c0_2 = arith.constant 0 : index
    %1 = vector.load %arg2[%c0_1, %c0_2] : memref<128x384xbf16, #tpu.memory_space<vmem>>, vector<128x384xbf16>
    %cst = arith.constant dense<0.000000e+00> : vector<16x384xf32>
    %2 = tpu.matmul %0, %1, %cst {dimension_numbers = #tpu.dot_dimension_numbers<[1], [0], [0], [1], [0, 0, 1, 1], [], []>} : vector<16x128xbf16>, vector<128x384xbf16>, vector<16x384xf32> -> vector<16x384xf32>
    %c0_3 = arith.constant 0 : index
    %c0_4 = arith.constant 0 : index
    %3 = vector.load %arg4[%c0_3, %c0_4] : memref<16x16xbf16, #tpu.memory_space<vmem>>, vector<16x16xbf16>
    %c0_5 = arith.constant 0 : index
    %c0_6 = arith.constant 0 : index
    %4 = vector.load %arg5[%c0_5, %c0_6] : memref<16x384xbf16, #tpu.memory_space<vmem>>, vector<16x384xbf16>
    %cst_7 = arith.constant dense<0.000000e+00> : vector<16x384xf32>
    %5 = tpu.matmul %3, %4, %cst_7 {dimension_numbers = #tpu.dot_dimension_numbers<[1], [0], [0], [1], [0, 0, 1, 1], [], []>} : vector<16x16xbf16>, vector<16x384xbf16>, vector<16x384xf32> -> vector<16x384xf32>
    %6 = arith.addf %2, %5 : vector<16x384xf32>
    %c0_8 = arith.constant 0 : index
    %c0_9 = arith.constant 0 : index
    %7 = vector.load %arg3[%c0_8, %c0_9] : memref<16x1xf32, #tpu.memory_space<vmem>>, vector<16x1xf32>
    %8 = vector.broadcast %7 : vector<16x1xf32> to vector<16x384xf32>
    %9 = arith.addf %6, %8 : vector<16x384xf32>
    %c0_10 = arith.constant 0 : index
    %c0_11 = arith.constant 0 : index
    %10 = vector.load %arg6[%c0_10, %c0_11] : memref<16x1xf32, #tpu.memory_space<vmem>>, vector<16x1xf32>
    %11 = vector.broadcast %10 : vector<16x1xf32> to vector<16x384xf32>
    %12 = arith.addf %9, %11 : vector<16x384xf32>
    %cst_12 = arith.constant 0.000000e+00 : f32
    %13 = vector.broadcast %cst_12 : f32 to vector<16x384xf32>
    %14 = arith.cmpf ogt, %12, %13 : vector<16x384xf32>
    %cst_13 = arith.constant 0.000000e+00 : f32
    %15 = vector.broadcast %cst_13 : f32 to vector<16x384xf32>
    %16 = arith.minimumf %12, %15 : vector<16x384xf32>
    %17 = math.exp %16 : vector<16x384xf32>
    %cst_14 = arith.constant 1.000000e+00 : f32
    %18 = vector.broadcast %cst_14 : f32 to vector<16x384xf32>
    %19 = arith.subf %17, %18 : vector<16x384xf32>
    %20 = arith.select %14, %12, %19 : vector<16x384xi1>, vector<16x384xf32>
    %c0_15 = arith.constant 0 : index
    %c0_16 = arith.constant 0 : index
    %21 = vector.load %arg7[%c0_15, %c0_16] : memref<16x384xf32, #tpu.memory_space<vmem>>, vector<16x384xf32>
    tpu.vector_store %arg7[%c0_15, %c0_16], %20 {strides = array<i32>} : memref<16x384xf32, #tpu.memory_space<vmem>>, vector<16x384xf32>,
    return
  }
  func.func @transform_0(%arg0: i32) -> (i32, i32) {
    %c0_i32 = arith.constant 0 : i32
    %c0_i32_0 = arith.constant 0 : i32
    %c0_i32_1 = arith.constant 0 : i32
    return %c0_i32, %c0_i32_0 : i32, i32
  }
  func.func @transform_1(%arg0: i32) -> (i32, i32) {
    %c0_i32 = arith.constant 0 : i32
    %c0_i32_0 = arith.constant 0 : i32
    return %c0_i32, %arg0 : i32, i32
  }
  func.func @transform_2(%arg0: i32) -> (i32, i32) {
    %c0_i32 = arith.constant 0 : i32
    %c0_i32_0 = arith.constant 0 : i32
    %c0_i32_1 = arith.constant 0 : i32
    return %c0_i32, %c0_i32_0 : i32, i32
  }
  func.func @transform_3(%arg0: i32) -> (i32, i32) {
    %c0_i32 = arith.constant 0 : i32
    %c0_i32_0 = arith.constant 0 : i32
    %c0_i32_1 = arith.constant 0 : i32
    return %c0_i32, %c0_i32_0 : i32, i32
  }
  func.func @transform_4(%arg0: i32) -> (i32, i32) {
    %c0_i32 = arith.constant 0 : i32
    %c0_i32_0 = arith.constant 0 : i32
    return %c0_i32, %arg0 : i32, i32
  }
  func.func @transform_5(%arg0: i32) -> (i32, i32) {
    %c0_i32 = arith.constant 0 : i32
    %c0_i32_0 = arith.constant 0 : i32
    %c0_i32_1 = arith.constant 0 : i32
    return %c0_i32, %c0_i32_0 : i32, i32
  }
  func.func @transform_6(%arg0: i32) -> (i32, i32) {
    %c0_i32 = arith.constant 0 : i32
    %c0_i32_0 = arith.constant 0 : i32
    return %c0_i32, %arg0 : i32, i32
  }
}

module attributes {stable_mosaic.version = 11 : i64} {
  func.func @_gemm_bias_kernel(%arg0: i32, %arg1: memref<16x144xbf16, #tpu.memory_space<vmem>>, %arg2: memref<144x512xbf16, #tpu.memory_space<vmem>>, %arg3: memref<16x1xf32, #tpu.memory_space<vmem>>, %arg4: memref<16x512xf32, #tpu.memory_space<vmem>>) attributes {dimension_semantics = [#tpu.dimension_semantics<parallel>], iteration_bounds = array<i64: 1>, scalar_prefetch = 0 : i64, scratch_operands = 0 : i64, tpu.core_type = #tpu.core_type<tc>, window_params = [{pipeline_mode = #tpu.pipeline_mode<synchronous>, transform_indices = @transform_0, window_bounds = array<i64: 16, 144>}, {transform_indices = @transform_1, window_bounds = array<i64: 144, 512>}, {pipeline_mode = #tpu.pipeline_mode<synchronous>, transform_indices = @transform_2, window_bounds = array<i64: 16, 1>}, {transform_indices = @transform_3, window_bounds = array<i64: 16, 512>}]} {
    %c0 = arith.constant 0 : index
    %c0_0 = arith.constant 0 : index
    %0 = vector.load %arg1[%c0, %c0_0] : memref<16x144xbf16, #tpu.memory_space<vmem>>, vector<16x144xbf16>
    %c0_1 = arith.constant 0 : index
    %c0_2 = arith.constant 0 : index
    %1 = vector.load %arg2[%c0_1, %c0_2] : memref<144x512xbf16, #tpu.memory_space<vmem>>, vector<144x512xbf16>
    %cst = arith.constant dense<0.000000e+00> : vector<16x512xf32>
    %2 = tpu.matmul %0, %1, %cst {dimension_numbers = #tpu.dot_dimension_numbers<[1], [0], [0], [1], [0, 0, 1, 1], [], []>} : vector<16x144xbf16>, vector<144x512xbf16>, vector<16x512xf32> -> vector<16x512xf32>
    %c0_3 = arith.constant 0 : index
    %c0_4 = arith.constant 0 : index
    %3 = vector.load %arg3[%c0_3, %c0_4] : memref<16x1xf32, #tpu.memory_space<vmem>>, vector<16x1xf32>
    %4 = vector.broadcast %3 : vector<16x1xf32> to vector<16x512xf32>
    %5 = arith.addf %2, %4 : vector<16x512xf32>
    %cst_5 = arith.constant 0.000000e+00 : f32
    %6 = vector.broadcast %cst_5 : f32 to vector<16x512xf32>
    %7 = arith.cmpf ogt, %5, %6 : vector<16x512xf32>
    %cst_6 = arith.constant 0.000000e+00 : f32
    %8 = vector.broadcast %cst_6 : f32 to vector<16x512xf32>
    %9 = arith.minimumf %5, %8 : vector<16x512xf32>
    %10 = math.exp %9 : vector<16x512xf32>
    %cst_7 = arith.constant 1.000000e+00 : f32
    %11 = vector.broadcast %cst_7 : f32 to vector<16x512xf32>
    %12 = arith.subf %10, %11 : vector<16x512xf32>
    %13 = arith.select %7, %5, %12 : vector<16x512xi1>, vector<16x512xf32>
    %c0_8 = arith.constant 0 : index
    %c0_9 = arith.constant 0 : index
    %14 = vector.load %arg4[%c0_8, %c0_9] : memref<16x512xf32, #tpu.memory_space<vmem>>, vector<16x512xf32>
    tpu.vector_store %arg4[%c0_8, %c0_9], %13 {strides = array<i32>} : memref<16x512xf32, #tpu.memory_space<vmem>>, vector<16x512xf32>,
    return
  }
  func.func @transform_0(%arg0: i32) -> (i32, i32) {
    %c0_i32 = arith.constant 0 : i32
    %c0_i32_0 = arith.constant 0 : i32
    %c0_i32_1 = arith.constant 0 : i32
    return %c0_i32, %c0_i32_0 : i32, i32
  }
  func.func @transform_1(%arg0: i32) -> (i32, i32) {
    %c0_i32 = arith.constant 0 : i32
    %c0_i32_0 = arith.constant 0 : i32
    return %c0_i32, %arg0 : i32, i32
  }
  func.func @transform_2(%arg0: i32) -> (i32, i32) {
    %c0_i32 = arith.constant 0 : i32
    %c0_i32_0 = arith.constant 0 : i32
    %c0_i32_1 = arith.constant 0 : i32
    return %c0_i32, %c0_i32_0 : i32, i32
  }
  func.func @transform_3(%arg0: i32) -> (i32, i32) {
    %c0_i32 = arith.constant 0 : i32
    %c0_i32_0 = arith.constant 0 : i32
    return %c0_i32, %arg0 : i32, i32
  }
}

module attributes {stable_mosaic.version = 11 : i64} {
  func.func @_residual_tail_kernel(%arg0: i32, %arg1: memref<16x192xbf16, #tpu.memory_space<vmem>>, %arg2: memref<192x256xbf16, #tpu.memory_space<vmem>>, %arg3: memref<16x1xf32, #tpu.memory_space<vmem>>, %arg4: memref<16x16xbf16, #tpu.memory_space<vmem>>, %arg5: memref<16x256xbf16, #tpu.memory_space<vmem>>, %arg6: memref<16x1xf32, #tpu.memory_space<vmem>>, %arg7: memref<16x256xf32, #tpu.memory_space<vmem>>) attributes {dimension_semantics = [#tpu.dimension_semantics<parallel>], iteration_bounds = array<i64: 1>, scalar_prefetch = 0 : i64, scratch_operands = 0 : i64, tpu.core_type = #tpu.core_type<tc>, window_params = [{pipeline_mode = #tpu.pipeline_mode<synchronous>, transform_indices = @transform_0, window_bounds = array<i64: 16, 192>}, {transform_indices = @transform_1, window_bounds = array<i64: 192, 256>}, {pipeline_mode = #tpu.pipeline_mode<synchronous>, transform_indices = @transform_2, window_bounds = array<i64: 16, 1>}, {pipeline_mode = #tpu.pipeline_mode<synchronous>, transform_indices = @transform_3, window_bounds = array<i64: 16, 16>}, {transform_indices = @transform_4, window_bounds = array<i64: 16, 256>}, {pipeline_mode = #tpu.pipeline_mode<synchronous>, transform_indices = @transform_5, window_bounds = array<i64: 16, 1>}, {transform_indices = @transform_6, window_bounds = array<i64: 16, 256>}]} {
    %c0 = arith.constant 0 : index
    %c0_0 = arith.constant 0 : index
    %0 = vector.load %arg1[%c0, %c0_0] : memref<16x192xbf16, #tpu.memory_space<vmem>>, vector<16x192xbf16>
    %c0_1 = arith.constant 0 : index
    %c0_2 = arith.constant 0 : index
    %1 = vector.load %arg2[%c0_1, %c0_2] : memref<192x256xbf16, #tpu.memory_space<vmem>>, vector<192x256xbf16>
    %cst = arith.constant dense<0.000000e+00> : vector<16x256xf32>
    %2 = tpu.matmul %0, %1, %cst {dimension_numbers = #tpu.dot_dimension_numbers<[1], [0], [0], [1], [0, 0, 1, 1], [], []>} : vector<16x192xbf16>, vector<192x256xbf16>, vector<16x256xf32> -> vector<16x256xf32>
    %c0_3 = arith.constant 0 : index
    %c0_4 = arith.constant 0 : index
    %3 = vector.load %arg4[%c0_3, %c0_4] : memref<16x16xbf16, #tpu.memory_space<vmem>>, vector<16x16xbf16>
    %c0_5 = arith.constant 0 : index
    %c0_6 = arith.constant 0 : index
    %4 = vector.load %arg5[%c0_5, %c0_6] : memref<16x256xbf16, #tpu.memory_space<vmem>>, vector<16x256xbf16>
    %cst_7 = arith.constant dense<0.000000e+00> : vector<16x256xf32>
    %5 = tpu.matmul %3, %4, %cst_7 {dimension_numbers = #tpu.dot_dimension_numbers<[1], [0], [0], [1], [0, 0, 1, 1], [], []>} : vector<16x16xbf16>, vector<16x256xbf16>, vector<16x256xf32> -> vector<16x256xf32>
    %6 = arith.addf %2, %5 : vector<16x256xf32>
    %c0_8 = arith.constant 0 : index
    %c0_9 = arith.constant 0 : index
    %7 = vector.load %arg3[%c0_8, %c0_9] : memref<16x1xf32, #tpu.memory_space<vmem>>, vector<16x1xf32>
    %8 = vector.broadcast %7 : vector<16x1xf32> to vector<16x256xf32>
    %9 = arith.addf %6, %8 : vector<16x256xf32>
    %c0_10 = arith.constant 0 : index
    %c0_11 = arith.constant 0 : index
    %10 = vector.load %arg6[%c0_10, %c0_11] : memref<16x1xf32, #tpu.memory_space<vmem>>, vector<16x1xf32>
    %11 = vector.broadcast %10 : vector<16x1xf32> to vector<16x256xf32>
    %12 = arith.addf %9, %11 : vector<16x256xf32>
    %cst_12 = arith.constant 0.000000e+00 : f32
    %13 = vector.broadcast %cst_12 : f32 to vector<16x256xf32>
    %14 = arith.cmpf ogt, %12, %13 : vector<16x256xf32>
    %cst_13 = arith.constant 0.000000e+00 : f32
    %15 = vector.broadcast %cst_13 : f32 to vector<16x256xf32>
    %16 = arith.minimumf %12, %15 : vector<16x256xf32>
    %17 = math.exp %16 : vector<16x256xf32>
    %cst_14 = arith.constant 1.000000e+00 : f32
    %18 = vector.broadcast %cst_14 : f32 to vector<16x256xf32>
    %19 = arith.subf %17, %18 : vector<16x256xf32>
    %20 = arith.select %14, %12, %19 : vector<16x256xi1>, vector<16x256xf32>
    %c0_15 = arith.constant 0 : index
    %c0_16 = arith.constant 0 : index
    %21 = vector.load %arg7[%c0_15, %c0_16] : memref<16x256xf32, #tpu.memory_space<vmem>>, vector<16x256xf32>
    tpu.vector_store %arg7[%c0_15, %c0_16], %20 {strides = array<i32>} : memref<16x256xf32, #tpu.memory_space<vmem>>, vector<16x256xf32>,
    return
  }
  func.func @transform_0(%arg0: i32) -> (i32, i32) {
    %c0_i32 = arith.constant 0 : i32
    %c0_i32_0 = arith.constant 0 : i32
    %c0_i32_1 = arith.constant 0 : i32
    return %c0_i32, %c0_i32_0 : i32, i32
  }
  func.func @transform_1(%arg0: i32) -> (i32, i32) {
    %c0_i32 = arith.constant 0 : i32
    %c0_i32_0 = arith.constant 0 : i32
    return %c0_i32, %arg0 : i32, i32
  }
  func.func @transform_2(%arg0: i32) -> (i32, i32) {
    %c0_i32 = arith.constant 0 : i32
    %c0_i32_0 = arith.constant 0 : i32
    %c0_i32_1 = arith.constant 0 : i32
    return %c0_i32, %c0_i32_0 : i32, i32
  }
  func.func @transform_3(%arg0: i32) -> (i32, i32) {
    %c0_i32 = arith.constant 0 : i32
    %c0_i32_0 = arith.constant 0 : i32
    %c0_i32_1 = arith.constant 0 : i32
    return %c0_i32, %c0_i32_0 : i32, i32
  }
  func.func @transform_4(%arg0: i32) -> (i32, i32) {
    %c0_i32 = arith.constant 0 : i32
    %c0_i32_0 = arith.constant 0 : i32
    return %c0_i32, %arg0 : i32, i32
  }
  func.func @transform_5(%arg0: i32) -> (i32, i32) {
    %c0_i32 = arith.constant 0 : i32
    %c0_i32_0 = arith.constant 0 : i32
    %c0_i32_1 = arith.constant 0 : i32
    return %c0_i32, %c0_i32_0 : i32, i32
  }
  func.func @transform_6(%arg0: i32) -> (i32, i32) {
    %c0_i32 = arith.constant 0 : i32
    %c0_i32_0 = arith.constant 0 : i32
    return %c0_i32, %arg0 : i32, i32
  }
}

module attributes {stable_mosaic.version = 11 : i64} {
  func.func @_gemm_bias_kernel(%arg0: i32, %arg1: memref<16x144xbf16, #tpu.memory_space<vmem>>, %arg2: memref<144x384xbf16, #tpu.memory_space<vmem>>, %arg3: memref<16x1xf32, #tpu.memory_space<vmem>>, %arg4: memref<16x384xf32, #tpu.memory_space<vmem>>) attributes {dimension_semantics = [#tpu.dimension_semantics<parallel>], iteration_bounds = array<i64: 1>, scalar_prefetch = 0 : i64, scratch_operands = 0 : i64, tpu.core_type = #tpu.core_type<tc>, window_params = [{pipeline_mode = #tpu.pipeline_mode<synchronous>, transform_indices = @transform_0, window_bounds = array<i64: 16, 144>}, {transform_indices = @transform_1, window_bounds = array<i64: 144, 384>}, {pipeline_mode = #tpu.pipeline_mode<synchronous>, transform_indices = @transform_2, window_bounds = array<i64: 16, 1>}, {transform_indices = @transform_3, window_bounds = array<i64: 16, 384>}]} {
    %c0 = arith.constant 0 : index
    %c0_0 = arith.constant 0 : index
    %0 = vector.load %arg1[%c0, %c0_0] : memref<16x144xbf16, #tpu.memory_space<vmem>>, vector<16x144xbf16>
    %c0_1 = arith.constant 0 : index
    %c0_2 = arith.constant 0 : index
    %1 = vector.load %arg2[%c0_1, %c0_2] : memref<144x384xbf16, #tpu.memory_space<vmem>>, vector<144x384xbf16>
    %cst = arith.constant dense<0.000000e+00> : vector<16x384xf32>
    %2 = tpu.matmul %0, %1, %cst {dimension_numbers = #tpu.dot_dimension_numbers<[1], [0], [0], [1], [0, 0, 1, 1], [], []>} : vector<16x144xbf16>, vector<144x384xbf16>, vector<16x384xf32> -> vector<16x384xf32>
    %c0_3 = arith.constant 0 : index
    %c0_4 = arith.constant 0 : index
    %3 = vector.load %arg3[%c0_3, %c0_4] : memref<16x1xf32, #tpu.memory_space<vmem>>, vector<16x1xf32>
    %4 = vector.broadcast %3 : vector<16x1xf32> to vector<16x384xf32>
    %5 = arith.addf %2, %4 : vector<16x384xf32>
    %cst_5 = arith.constant 0.000000e+00 : f32
    %6 = vector.broadcast %cst_5 : f32 to vector<16x384xf32>
    %7 = arith.cmpf ogt, %5, %6 : vector<16x384xf32>
    %cst_6 = arith.constant 0.000000e+00 : f32
    %8 = vector.broadcast %cst_6 : f32 to vector<16x384xf32>
    %9 = arith.minimumf %5, %8 : vector<16x384xf32>
    %10 = math.exp %9 : vector<16x384xf32>
    %cst_7 = arith.constant 1.000000e+00 : f32
    %11 = vector.broadcast %cst_7 : f32 to vector<16x384xf32>
    %12 = arith.subf %10, %11 : vector<16x384xf32>
    %13 = arith.select %7, %5, %12 : vector<16x384xi1>, vector<16x384xf32>
    %c0_8 = arith.constant 0 : index
    %c0_9 = arith.constant 0 : index
    %14 = vector.load %arg4[%c0_8, %c0_9] : memref<16x384xf32, #tpu.memory_space<vmem>>, vector<16x384xf32>
    tpu.vector_store %arg4[%c0_8, %c0_9], %13 {strides = array<i32>} : memref<16x384xf32, #tpu.memory_space<vmem>>, vector<16x384xf32>,
    return
  }
  func.func @transform_0(%arg0: i32) -> (i32, i32) {
    %c0_i32 = arith.constant 0 : i32
    %c0_i32_0 = arith.constant 0 : i32
    %c0_i32_1 = arith.constant 0 : i32
    return %c0_i32, %c0_i32_0 : i32, i32
  }
  func.func @transform_1(%arg0: i32) -> (i32, i32) {
    %c0_i32 = arith.constant 0 : i32
    %c0_i32_0 = arith.constant 0 : i32
    return %c0_i32, %arg0 : i32, i32
  }
  func.func @transform_2(%arg0: i32) -> (i32, i32) {
    %c0_i32 = arith.constant 0 : i32
    %c0_i32_0 = arith.constant 0 : i32
    %c0_i32_1 = arith.constant 0 : i32
    return %c0_i32, %c0_i32_0 : i32, i32
  }
  func.func @transform_3(%arg0: i32) -> (i32, i32) {
    %c0_i32 = arith.constant 0 : i32
    %c0_i32_0 = arith.constant 0 : i32
    return %c0_i32, %arg0 : i32, i32
  }
}

module attributes {stable_mosaic.version = 11 : i64} {
  func.func @_residual_tail_kernel(%arg0: i32, %arg1: memref<32x256xbf16, #tpu.memory_space<vmem>>, %arg2: memref<256x128xbf16, #tpu.memory_space<vmem>>, %arg3: memref<32x1xf32, #tpu.memory_space<vmem>>, %arg4: memref<32x16xbf16, #tpu.memory_space<vmem>>, %arg5: memref<16x128xbf16, #tpu.memory_space<vmem>>, %arg6: memref<32x1xf32, #tpu.memory_space<vmem>>, %arg7: memref<32x128xf32, #tpu.memory_space<vmem>>) attributes {dimension_semantics = [#tpu.dimension_semantics<parallel>], iteration_bounds = array<i64: 1>, scalar_prefetch = 0 : i64, scratch_operands = 0 : i64, tpu.core_type = #tpu.core_type<tc>, window_params = [{pipeline_mode = #tpu.pipeline_mode<synchronous>, transform_indices = @transform_0, window_bounds = array<i64: 32, 256>}, {transform_indices = @transform_1, window_bounds = array<i64: 256, 128>}, {pipeline_mode = #tpu.pipeline_mode<synchronous>, transform_indices = @transform_2, window_bounds = array<i64: 32, 1>}, {pipeline_mode = #tpu.pipeline_mode<synchronous>, transform_indices = @transform_3, window_bounds = array<i64: 32, 16>}, {transform_indices = @transform_4, window_bounds = array<i64: 16, 128>}, {pipeline_mode = #tpu.pipeline_mode<synchronous>, transform_indices = @transform_5, window_bounds = array<i64: 32, 1>}, {transform_indices = @transform_6, window_bounds = array<i64: 32, 128>}]} {
    %c0 = arith.constant 0 : index
    %c0_0 = arith.constant 0 : index
    %0 = vector.load %arg1[%c0, %c0_0] : memref<32x256xbf16, #tpu.memory_space<vmem>>, vector<32x256xbf16>
    %c0_1 = arith.constant 0 : index
    %c0_2 = arith.constant 0 : index
    %1 = vector.load %arg2[%c0_1, %c0_2] : memref<256x128xbf16, #tpu.memory_space<vmem>>, vector<256x128xbf16>
    %cst = arith.constant dense<0.000000e+00> : vector<32x128xf32>
    %2 = tpu.matmul %0, %1, %cst {dimension_numbers = #tpu.dot_dimension_numbers<[1], [0], [0], [1], [0, 0, 1, 1], [], []>} : vector<32x256xbf16>, vector<256x128xbf16>, vector<32x128xf32> -> vector<32x128xf32>
    %c0_3 = arith.constant 0 : index
    %c0_4 = arith.constant 0 : index
    %3 = vector.load %arg4[%c0_3, %c0_4] : memref<32x16xbf16, #tpu.memory_space<vmem>>, vector<32x16xbf16>
    %c0_5 = arith.constant 0 : index
    %c0_6 = arith.constant 0 : index
    %4 = vector.load %arg5[%c0_5, %c0_6] : memref<16x128xbf16, #tpu.memory_space<vmem>>, vector<16x128xbf16>
    %cst_7 = arith.constant dense<0.000000e+00> : vector<32x128xf32>
    %5 = tpu.matmul %3, %4, %cst_7 {dimension_numbers = #tpu.dot_dimension_numbers<[1], [0], [0], [1], [0, 0, 1, 1], [], []>} : vector<32x16xbf16>, vector<16x128xbf16>, vector<32x128xf32> -> vector<32x128xf32>
    %6 = arith.addf %2, %5 : vector<32x128xf32>
    %c0_8 = arith.constant 0 : index
    %c0_9 = arith.constant 0 : index
    %7 = vector.load %arg3[%c0_8, %c0_9] : memref<32x1xf32, #tpu.memory_space<vmem>>, vector<32x1xf32>
    %8 = vector.broadcast %7 : vector<32x1xf32> to vector<32x128xf32>
    %9 = arith.addf %6, %8 : vector<32x128xf32>
    %c0_10 = arith.constant 0 : index
    %c0_11 = arith.constant 0 : index
    %10 = vector.load %arg6[%c0_10, %c0_11] : memref<32x1xf32, #tpu.memory_space<vmem>>, vector<32x1xf32>
    %11 = vector.broadcast %10 : vector<32x1xf32> to vector<32x128xf32>
    %12 = arith.addf %9, %11 : vector<32x128xf32>
    %cst_12 = arith.constant 0.000000e+00 : f32
    %13 = vector.broadcast %cst_12 : f32 to vector<32x128xf32>
    %14 = arith.cmpf ogt, %12, %13 : vector<32x128xf32>
    %cst_13 = arith.constant 0.000000e+00 : f32
    %15 = vector.broadcast %cst_13 : f32 to vector<32x128xf32>
    %16 = arith.minimumf %12, %15 : vector<32x128xf32>
    %17 = math.exp %16 : vector<32x128xf32>
    %cst_14 = arith.constant 1.000000e+00 : f32
    %18 = vector.broadcast %cst_14 : f32 to vector<32x128xf32>
    %19 = arith.subf %17, %18 : vector<32x128xf32>
    %20 = arith.select %14, %12, %19 : vector<32x128xi1>, vector<32x128xf32>
    %c0_15 = arith.constant 0 : index
    %c0_16 = arith.constant 0 : index
    %21 = vector.load %arg7[%c0_15, %c0_16] : memref<32x128xf32, #tpu.memory_space<vmem>>, vector<32x128xf32>
    tpu.vector_store %arg7[%c0_15, %c0_16], %20 {strides = array<i32>} : memref<32x128xf32, #tpu.memory_space<vmem>>, vector<32x128xf32>,
    return
  }
  func.func @transform_0(%arg0: i32) -> (i32, i32) {
    %c0_i32 = arith.constant 0 : i32
    %c0_i32_0 = arith.constant 0 : i32
    %c0_i32_1 = arith.constant 0 : i32
    return %c0_i32, %c0_i32_0 : i32, i32
  }
  func.func @transform_1(%arg0: i32) -> (i32, i32) {
    %c0_i32 = arith.constant 0 : i32
    %c0_i32_0 = arith.constant 0 : i32
    return %c0_i32, %arg0 : i32, i32
  }
  func.func @transform_2(%arg0: i32) -> (i32, i32) {
    %c0_i32 = arith.constant 0 : i32
    %c0_i32_0 = arith.constant 0 : i32
    %c0_i32_1 = arith.constant 0 : i32
    return %c0_i32, %c0_i32_0 : i32, i32
  }
  func.func @transform_3(%arg0: i32) -> (i32, i32) {
    %c0_i32 = arith.constant 0 : i32
    %c0_i32_0 = arith.constant 0 : i32
    %c0_i32_1 = arith.constant 0 : i32
    return %c0_i32, %c0_i32_0 : i32, i32
  }
  func.func @transform_4(%arg0: i32) -> (i32, i32) {
    %c0_i32 = arith.constant 0 : i32
    %c0_i32_0 = arith.constant 0 : i32
    return %c0_i32, %arg0 : i32, i32
  }
  func.func @transform_5(%arg0: i32) -> (i32, i32) {
    %c0_i32 = arith.constant 0 : i32
    %c0_i32_0 = arith.constant 0 : i32
    %c0_i32_1 = arith.constant 0 : i32
    return %c0_i32, %c0_i32_0 : i32, i32
  }
  func.func @transform_6(%arg0: i32) -> (i32, i32) {
    %c0_i32 = arith.constant 0 : i32
    %c0_i32_0 = arith.constant 0 : i32
    return %c0_i32, %arg0 : i32, i32
  }
}

module attributes {stable_mosaic.version = 11 : i64} {
  func.func @_gemm_bias_kernel(%arg0: i32, %arg1: memref<32x288xbf16, #tpu.memory_space<vmem>>, %arg2: memref<288x128xbf16, #tpu.memory_space<vmem>>, %arg3: memref<32x1xf32, #tpu.memory_space<vmem>>, %arg4: memref<32x128xf32, #tpu.memory_space<vmem>>) attributes {dimension_semantics = [#tpu.dimension_semantics<parallel>], iteration_bounds = array<i64: 1>, scalar_prefetch = 0 : i64, scratch_operands = 0 : i64, tpu.core_type = #tpu.core_type<tc>, window_params = [{pipeline_mode = #tpu.pipeline_mode<synchronous>, transform_indices = @transform_0, window_bounds = array<i64: 32, 288>}, {transform_indices = @transform_1, window_bounds = array<i64: 288, 128>}, {pipeline_mode = #tpu.pipeline_mode<synchronous>, transform_indices = @transform_2, window_bounds = array<i64: 32, 1>}, {transform_indices = @transform_3, window_bounds = array<i64: 32, 128>}]} {
    %c0 = arith.constant 0 : index
    %c0_0 = arith.constant 0 : index
    %0 = vector.load %arg1[%c0, %c0_0] : memref<32x288xbf16, #tpu.memory_space<vmem>>, vector<32x288xbf16>
    %c0_1 = arith.constant 0 : index
    %c0_2 = arith.constant 0 : index
    %1 = vector.load %arg2[%c0_1, %c0_2] : memref<288x128xbf16, #tpu.memory_space<vmem>>, vector<288x128xbf16>
    %cst = arith.constant dense<0.000000e+00> : vector<32x128xf32>
    %2 = tpu.matmul %0, %1, %cst {dimension_numbers = #tpu.dot_dimension_numbers<[1], [0], [0], [1], [0, 0, 1, 1], [], []>} : vector<32x288xbf16>, vector<288x128xbf16>, vector<32x128xf32> -> vector<32x128xf32>
    %c0_3 = arith.constant 0 : index
    %c0_4 = arith.constant 0 : index
    %3 = vector.load %arg3[%c0_3, %c0_4] : memref<32x1xf32, #tpu.memory_space<vmem>>, vector<32x1xf32>
    %4 = vector.broadcast %3 : vector<32x1xf32> to vector<32x128xf32>
    %5 = arith.addf %2, %4 : vector<32x128xf32>
    %cst_5 = arith.constant 0.000000e+00 : f32
    %6 = vector.broadcast %cst_5 : f32 to vector<32x128xf32>
    %7 = arith.cmpf ogt, %5, %6 : vector<32x128xf32>
    %cst_6 = arith.constant 0.000000e+00 : f32
    %8 = vector.broadcast %cst_6 : f32 to vector<32x128xf32>
    %9 = arith.minimumf %5, %8 : vector<32x128xf32>
    %10 = math.exp %9 : vector<32x128xf32>
    %cst_7 = arith.constant 1.000000e+00 : f32
    %11 = vector.broadcast %cst_7 : f32 to vector<32x128xf32>
    %12 = arith.subf %10, %11 : vector<32x128xf32>
    %13 = arith.select %7, %5, %12 : vector<32x128xi1>, vector<32x128xf32>
    %c0_8 = arith.constant 0 : index
    %c0_9 = arith.constant 0 : index
    %14 = vector.load %arg4[%c0_8, %c0_9] : memref<32x128xf32, #tpu.memory_space<vmem>>, vector<32x128xf32>
    tpu.vector_store %arg4[%c0_8, %c0_9], %13 {strides = array<i32>} : memref<32x128xf32, #tpu.memory_space<vmem>>, vector<32x128xf32>,
    return
  }
  func.func @transform_0(%arg0: i32) -> (i32, i32) {
    %c0_i32 = arith.constant 0 : i32
    %c0_i32_0 = arith.constant 0 : i32
    %c0_i32_1 = arith.constant 0 : i32
    return %c0_i32, %c0_i32_0 : i32, i32
  }
  func.func @transform_1(%arg0: i32) -> (i32, i32) {
    %c0_i32 = arith.constant 0 : i32
    %c0_i32_0 = arith.constant 0 : i32
    return %c0_i32, %arg0 : i32, i32
  }
  func.func @transform_2(%arg0: i32) -> (i32, i32) {
    %c0_i32 = arith.constant 0 : i32
    %c0_i32_0 = arith.constant 0 : i32
    %c0_i32_1 = arith.constant 0 : i32
    return %c0_i32, %c0_i32_0 : i32, i32
  }
  func.func @transform_3(%arg0: i32) -> (i32, i32) {
    %c0_i32 = arith.constant 0 : i32
    %c0_i32_0 = arith.constant 0 : i32
    return %c0_i32, %arg0 : i32, i32
  }
}

module attributes {stable_mosaic.version = 11 : i64} {
  func.func @_residual_tail_kernel(%arg0: i32, %arg1: memref<32x384xbf16, #tpu.memory_space<vmem>>, %arg2: memref<384x128xbf16, #tpu.memory_space<vmem>>, %arg3: memref<32x1xf32, #tpu.memory_space<vmem>>, %arg4: memref<32x32xbf16, #tpu.memory_space<vmem>>, %arg5: memref<32x128xbf16, #tpu.memory_space<vmem>>, %arg6: memref<32x1xf32, #tpu.memory_space<vmem>>, %arg7: memref<32x128xf32, #tpu.memory_space<vmem>>) attributes {dimension_semantics = [#tpu.dimension_semantics<parallel>], iteration_bounds = array<i64: 1>, scalar_prefetch = 0 : i64, scratch_operands = 0 : i64, tpu.core_type = #tpu.core_type<tc>, window_params = [{pipeline_mode = #tpu.pipeline_mode<synchronous>, transform_indices = @transform_0, window_bounds = array<i64: 32, 384>}, {transform_indices = @transform_1, window_bounds = array<i64: 384, 128>}, {pipeline_mode = #tpu.pipeline_mode<synchronous>, transform_indices = @transform_2, window_bounds = array<i64: 32, 1>}, {pipeline_mode = #tpu.pipeline_mode<synchronous>, transform_indices = @transform_3, window_bounds = array<i64: 32, 32>}, {transform_indices = @transform_4, window_bounds = array<i64: 32, 128>}, {pipeline_mode = #tpu.pipeline_mode<synchronous>, transform_indices = @transform_5, window_bounds = array<i64: 32, 1>}, {transform_indices = @transform_6, window_bounds = array<i64: 32, 128>}]} {
    %c0 = arith.constant 0 : index
    %c0_0 = arith.constant 0 : index
    %0 = vector.load %arg1[%c0, %c0_0] : memref<32x384xbf16, #tpu.memory_space<vmem>>, vector<32x384xbf16>
    %c0_1 = arith.constant 0 : index
    %c0_2 = arith.constant 0 : index
    %1 = vector.load %arg2[%c0_1, %c0_2] : memref<384x128xbf16, #tpu.memory_space<vmem>>, vector<384x128xbf16>
    %cst = arith.constant dense<0.000000e+00> : vector<32x128xf32>
    %2 = tpu.matmul %0, %1, %cst {dimension_numbers = #tpu.dot_dimension_numbers<[1], [0], [0], [1], [0, 0, 1, 1], [], []>} : vector<32x384xbf16>, vector<384x128xbf16>, vector<32x128xf32> -> vector<32x128xf32>
    %c0_3 = arith.constant 0 : index
    %c0_4 = arith.constant 0 : index
    %3 = vector.load %arg4[%c0_3, %c0_4] : memref<32x32xbf16, #tpu.memory_space<vmem>>, vector<32x32xbf16>
    %c0_5 = arith.constant 0 : index
    %c0_6 = arith.constant 0 : index
    %4 = vector.load %arg5[%c0_5, %c0_6] : memref<32x128xbf16, #tpu.memory_space<vmem>>, vector<32x128xbf16>
    %cst_7 = arith.constant dense<0.000000e+00> : vector<32x128xf32>
    %5 = tpu.matmul %3, %4, %cst_7 {dimension_numbers = #tpu.dot_dimension_numbers<[1], [0], [0], [1], [0, 0, 1, 1], [], []>} : vector<32x32xbf16>, vector<32x128xbf16>, vector<32x128xf32> -> vector<32x128xf32>
    %6 = arith.addf %2, %5 : vector<32x128xf32>
    %c0_8 = arith.constant 0 : index
    %c0_9 = arith.constant 0 : index
    %7 = vector.load %arg3[%c0_8, %c0_9] : memref<32x1xf32, #tpu.memory_space<vmem>>, vector<32x1xf32>
    %8 = vector.broadcast %7 : vector<32x1xf32> to vector<32x128xf32>
    %9 = arith.addf %6, %8 : vector<32x128xf32>
    %c0_10 = arith.constant 0 : index
    %c0_11 = arith.constant 0 : index
    %10 = vector.load %arg6[%c0_10, %c0_11] : memref<32x1xf32, #tpu.memory_space<vmem>>, vector<32x1xf32>
    %11 = vector.broadcast %10 : vector<32x1xf32> to vector<32x128xf32>
    %12 = arith.addf %9, %11 : vector<32x128xf32>
    %cst_12 = arith.constant 0.000000e+00 : f32
    %13 = vector.broadcast %cst_12 : f32 to vector<32x128xf32>
    %14 = arith.cmpf ogt, %12, %13 : vector<32x128xf32>
    %cst_13 = arith.constant 0.000000e+00 : f32
    %15 = vector.broadcast %cst_13 : f32 to vector<32x128xf32>
    %16 = arith.minimumf %12, %15 : vector<32x128xf32>
    %17 = math.exp %16 : vector<32x128xf32>
    %cst_14 = arith.constant 1.000000e+00 : f32
    %18 = vector.broadcast %cst_14 : f32 to vector<32x128xf32>
    %19 = arith.subf %17, %18 : vector<32x128xf32>
    %20 = arith.select %14, %12, %19 : vector<32x128xi1>, vector<32x128xf32>
    %c0_15 = arith.constant 0 : index
    %c0_16 = arith.constant 0 : index
    %21 = vector.load %arg7[%c0_15, %c0_16] : memref<32x128xf32, #tpu.memory_space<vmem>>, vector<32x128xf32>
    tpu.vector_store %arg7[%c0_15, %c0_16], %20 {strides = array<i32>} : memref<32x128xf32, #tpu.memory_space<vmem>>, vector<32x128xf32>,
    return
  }
  func.func @transform_0(%arg0: i32) -> (i32, i32) {
    %c0_i32 = arith.constant 0 : i32
    %c0_i32_0 = arith.constant 0 : i32
    %c0_i32_1 = arith.constant 0 : i32
    return %c0_i32, %c0_i32_0 : i32, i32
  }
  func.func @transform_1(%arg0: i32) -> (i32, i32) {
    %c0_i32 = arith.constant 0 : i32
    %c0_i32_0 = arith.constant 0 : i32
    return %c0_i32, %arg0 : i32, i32
  }
  func.func @transform_2(%arg0: i32) -> (i32, i32) {
    %c0_i32 = arith.constant 0 : i32
    %c0_i32_0 = arith.constant 0 : i32
    %c0_i32_1 = arith.constant 0 : i32
    return %c0_i32, %c0_i32_0 : i32, i32
  }
  func.func @transform_3(%arg0: i32) -> (i32, i32) {
    %c0_i32 = arith.constant 0 : i32
    %c0_i32_0 = arith.constant 0 : i32
    %c0_i32_1 = arith.constant 0 : i32
    return %c0_i32, %c0_i32_0 : i32, i32
  }
  func.func @transform_4(%arg0: i32) -> (i32, i32) {
    %c0_i32 = arith.constant 0 : i32
    %c0_i32_0 = arith.constant 0 : i32
    return %c0_i32, %arg0 : i32, i32
  }
  func.func @transform_5(%arg0: i32) -> (i32, i32) {
    %c0_i32 = arith.constant 0 : i32
    %c0_i32_0 = arith.constant 0 : i32
    %c0_i32_1 = arith.constant 0 : i32
    return %c0_i32, %c0_i32_0 : i32, i32
  }
  func.func @transform_6(%arg0: i32) -> (i32, i32) {
    %c0_i32 = arith.constant 0 : i32
    %c0_i32_0 = arith.constant 0 : i32
    return %c0_i32, %arg0 : i32, i32
  }
}

module attributes {stable_mosaic.version = 11 : i64} {
  func.func @_residual_tail_kernel(%arg0: i32, %arg1: memref<64x512xbf16, #tpu.memory_space<vmem>>, %arg2: memref<512x128xbf16, #tpu.memory_space<vmem>>, %arg3: memref<64x1xf32, #tpu.memory_space<vmem>>, %arg4: memref<64x32xbf16, #tpu.memory_space<vmem>>, %arg5: memref<32x128xbf16, #tpu.memory_space<vmem>>, %arg6: memref<64x1xf32, #tpu.memory_space<vmem>>, %arg7: memref<64x128xf32, #tpu.memory_space<vmem>>) attributes {dimension_semantics = [#tpu.dimension_semantics<parallel>], iteration_bounds = array<i64: 1>, scalar_prefetch = 0 : i64, scratch_operands = 0 : i64, tpu.core_type = #tpu.core_type<tc>, window_params = [{pipeline_mode = #tpu.pipeline_mode<synchronous>, transform_indices = @transform_0, window_bounds = array<i64: 64, 512>}, {transform_indices = @transform_1, window_bounds = array<i64: 512, 128>}, {pipeline_mode = #tpu.pipeline_mode<synchronous>, transform_indices = @transform_2, window_bounds = array<i64: 64, 1>}, {pipeline_mode = #tpu.pipeline_mode<synchronous>, transform_indices = @transform_3, window_bounds = array<i64: 64, 32>}, {transform_indices = @transform_4, window_bounds = array<i64: 32, 128>}, {pipeline_mode = #tpu.pipeline_mode<synchronous>, transform_indices = @transform_5, window_bounds = array<i64: 64, 1>}, {transform_indices = @transform_6, window_bounds = array<i64: 64, 128>}]} {
    %c0 = arith.constant 0 : index
    %c0_0 = arith.constant 0 : index
    %0 = vector.load %arg1[%c0, %c0_0] : memref<64x512xbf16, #tpu.memory_space<vmem>>, vector<64x512xbf16>
    %c0_1 = arith.constant 0 : index
    %c0_2 = arith.constant 0 : index
    %1 = vector.load %arg2[%c0_1, %c0_2] : memref<512x128xbf16, #tpu.memory_space<vmem>>, vector<512x128xbf16>
    %cst = arith.constant dense<0.000000e+00> : vector<64x128xf32>
    %2 = tpu.matmul %0, %1, %cst {dimension_numbers = #tpu.dot_dimension_numbers<[1], [0], [0], [1], [0, 0, 1, 1], [], []>} : vector<64x512xbf16>, vector<512x128xbf16>, vector<64x128xf32> -> vector<64x128xf32>
    %c0_3 = arith.constant 0 : index
    %c0_4 = arith.constant 0 : index
    %3 = vector.load %arg4[%c0_3, %c0_4] : memref<64x32xbf16, #tpu.memory_space<vmem>>, vector<64x32xbf16>
    %c0_5 = arith.constant 0 : index
    %c0_6 = arith.constant 0 : index
    %4 = vector.load %arg5[%c0_5, %c0_6] : memref<32x128xbf16, #tpu.memory_space<vmem>>, vector<32x128xbf16>
    %cst_7 = arith.constant dense<0.000000e+00> : vector<64x128xf32>
    %5 = tpu.matmul %3, %4, %cst_7 {dimension_numbers = #tpu.dot_dimension_numbers<[1], [0], [0], [1], [0, 0, 1, 1], [], []>} : vector<64x32xbf16>, vector<32x128xbf16>, vector<64x128xf32> -> vector<64x128xf32>
    %6 = arith.addf %2, %5 : vector<64x128xf32>
    %c0_8 = arith.constant 0 : index
    %c0_9 = arith.constant 0 : index
    %7 = vector.load %arg3[%c0_8, %c0_9] : memref<64x1xf32, #tpu.memory_space<vmem>>, vector<64x1xf32>
    %8 = vector.broadcast %7 : vector<64x1xf32> to vector<64x128xf32>
    %9 = arith.addf %6, %8 : vector<64x128xf32>
    %c0_10 = arith.constant 0 : index
    %c0_11 = arith.constant 0 : index
    %10 = vector.load %arg6[%c0_10, %c0_11] : memref<64x1xf32, #tpu.memory_space<vmem>>, vector<64x1xf32>
    %11 = vector.broadcast %10 : vector<64x1xf32> to vector<64x128xf32>
    %12 = arith.addf %9, %11 : vector<64x128xf32>
    %cst_12 = arith.constant 0.000000e+00 : f32
    %13 = vector.broadcast %cst_12 : f32 to vector<64x128xf32>
    %14 = arith.cmpf ogt, %12, %13 : vector<64x128xf32>
    %cst_13 = arith.constant 0.000000e+00 : f32
    %15 = vector.broadcast %cst_13 : f32 to vector<64x128xf32>
    %16 = arith.minimumf %12, %15 : vector<64x128xf32>
    %17 = math.exp %16 : vector<64x128xf32>
    %cst_14 = arith.constant 1.000000e+00 : f32
    %18 = vector.broadcast %cst_14 : f32 to vector<64x128xf32>
    %19 = arith.subf %17, %18 : vector<64x128xf32>
    %20 = arith.select %14, %12, %19 : vector<64x128xi1>, vector<64x128xf32>
    %c0_15 = arith.constant 0 : index
    %c0_16 = arith.constant 0 : index
    %21 = vector.load %arg7[%c0_15, %c0_16] : memref<64x128xf32, #tpu.memory_space<vmem>>, vector<64x128xf32>
    tpu.vector_store %arg7[%c0_15, %c0_16], %20 {strides = array<i32>} : memref<64x128xf32, #tpu.memory_space<vmem>>, vector<64x128xf32>,
    return
  }
  func.func @transform_0(%arg0: i32) -> (i32, i32) {
    %c0_i32 = arith.constant 0 : i32
    %c0_i32_0 = arith.constant 0 : i32
    %c0_i32_1 = arith.constant 0 : i32
    return %c0_i32, %c0_i32_0 : i32, i32
  }
  func.func @transform_1(%arg0: i32) -> (i32, i32) {
    %c0_i32 = arith.constant 0 : i32
    %c0_i32_0 = arith.constant 0 : i32
    return %c0_i32, %arg0 : i32, i32
  }
  func.func @transform_2(%arg0: i32) -> (i32, i32) {
    %c0_i32 = arith.constant 0 : i32
    %c0_i32_0 = arith.constant 0 : i32
    %c0_i32_1 = arith.constant 0 : i32
    return %c0_i32, %c0_i32_0 : i32, i32
  }
  func.func @transform_3(%arg0: i32) -> (i32, i32) {
    %c0_i32 = arith.constant 0 : i32
    %c0_i32_0 = arith.constant 0 : i32
    %c0_i32_1 = arith.constant 0 : i32
    return %c0_i32, %c0_i32_0 : i32, i32
  }
  func.func @transform_4(%arg0: i32) -> (i32, i32) {
    %c0_i32 = arith.constant 0 : i32
    %c0_i32_0 = arith.constant 0 : i32
    return %c0_i32, %arg0 : i32, i32
  }
  func.func @transform_5(%arg0: i32) -> (i32, i32) {
    %c0_i32 = arith.constant 0 : i32
    %c0_i32_0 = arith.constant 0 : i32
    %c0_i32_1 = arith.constant 0 : i32
    return %c0_i32, %c0_i32_0 : i32, i32
  }
  func.func @transform_6(%arg0: i32) -> (i32, i32) {
    %c0_i32 = arith.constant 0 : i32
    %c0_i32_0 = arith.constant 0 : i32
    return %c0_i32, %arg0 : i32, i32
  }
}

module attributes {stable_mosaic.version = 11 : i64} {
  func.func @_gemm_bias_kernel(%arg0: i32, %arg1: memref<1x128xbf16, #tpu.memory_space<vmem>>, %arg2: memref<128x128xbf16, #tpu.memory_space<vmem>>, %arg3: memref<1x1xf32, #tpu.memory_space<vmem>>, %arg4: memref<1x128xf32, #tpu.memory_space<vmem>>) attributes {dimension_semantics = [#tpu.dimension_semantics<parallel>], iteration_bounds = array<i64: 1>, scalar_prefetch = 0 : i64, scratch_operands = 0 : i64, tpu.core_type = #tpu.core_type<tc>, window_params = [{pipeline_mode = #tpu.pipeline_mode<synchronous>, transform_indices = @transform_0, window_bounds = array<i64: 1, 128>}, {transform_indices = @transform_1, window_bounds = array<i64: 128, 128>}, {pipeline_mode = #tpu.pipeline_mode<synchronous>, transform_indices = @transform_2, window_bounds = array<i64: 1, 1>}, {transform_indices = @transform_3, window_bounds = array<i64: 1, 128>}]} {
    %c0 = arith.constant 0 : index
    %c0_0 = arith.constant 0 : index
    %0 = vector.load %arg1[%c0, %c0_0] : memref<1x128xbf16, #tpu.memory_space<vmem>>, vector<1x128xbf16>
    %c0_1 = arith.constant 0 : index
    %c0_2 = arith.constant 0 : index
    %1 = vector.load %arg2[%c0_1, %c0_2] : memref<128x128xbf16, #tpu.memory_space<vmem>>, vector<128x128xbf16>
    %cst = arith.constant dense<0.000000e+00> : vector<1x128xf32>
    %2 = tpu.matmul %0, %1, %cst {dimension_numbers = #tpu.dot_dimension_numbers<[1], [0], [0], [1], [0, 0, 1, 1], [], []>} : vector<1x128xbf16>, vector<128x128xbf16>, vector<1x128xf32> -> vector<1x128xf32>
    %c0_3 = arith.constant 0 : index
    %c0_4 = arith.constant 0 : index
    %3 = vector.load %arg3[%c0_3, %c0_4] : memref<1x1xf32, #tpu.memory_space<vmem>>, vector<1x1xf32>
    %4 = vector.broadcast %3 : vector<1x1xf32> to vector<1x128xf32>
    %5 = arith.addf %2, %4 : vector<1x128xf32>
    %c0_5 = arith.constant 0 : index
    %c0_6 = arith.constant 0 : index
    %6 = vector.load %arg4[%c0_5, %c0_6] : memref<1x128xf32, #tpu.memory_space<vmem>>, vector<1x128xf32>
    tpu.vector_store %arg4[%c0_5, %c0_6], %5 {strides = array<i32>} : memref<1x128xf32, #tpu.memory_space<vmem>>, vector<1x128xf32>,
    return
  }
  func.func @transform_0(%arg0: i32) -> (i32, i32) {
    %c0_i32 = arith.constant 0 : i32
    %c0_i32_0 = arith.constant 0 : i32
    %c0_i32_1 = arith.constant 0 : i32
    return %c0_i32, %c0_i32_0 : i32, i32
  }
  func.func @transform_1(%arg0: i32) -> (i32, i32) {
    %c0_i32 = arith.constant 0 : i32
    %c0_i32_0 = arith.constant 0 : i32
    return %c0_i32, %arg0 : i32, i32
  }
  func.func @transform_2(%arg0: i32) -> (i32, i32) {
    %c0_i32 = arith.constant 0 : i32
    %c0_i32_0 = arith.constant 0 : i32
    %c0_i32_1 = arith.constant 0 : i32
    return %c0_i32, %c0_i32_0 : i32, i32
  }
  func.func @transform_3(%arg0: i32) -> (i32, i32) {
    %c0_i32 = arith.constant 0 : i32
    %c0_i32_0 = arith.constant 0 : i32
    return %c0_i32, %arg0 : i32, i32
  }
}

</mosaic_0001>

<bundles_post_ra>
// kernel: stft_discriminator_forward.14
= control target key start
LH: loop header
LB: loop body
LE: loop exit
PB: predicated region body
PF: predicated region fallthrough
CT: control target
= control target key end

     0   :  { %s1001_s12 = smov 0   ;;  %s1003_s13 = smov 0   ;;  %s1293_s0 = inlined_call_operand.vmem [shape: bf16[32,112], index: 0, kind: input, shape index: {}]   ;;  %s1294_s1 = inlined_call_operand.vmem [shape: bf16[112,2560], index: 1, kind: input, shape index: {}]   ;;  %s1295_s2 = inlined_call_operand.vmem [shape: f32[32,1], index: 2, kind: input, shape index: {}]   ;;  %s1296_s3 = inlined_call_operand.vmem [shape: f32[32,2560], index: 3, kind: output, shape index: {}]  }
   0x1   :  { %s1005_s14 = smov 0  }
   0x2 LB: > { %s786_s15 = sadd.s32 4294967295, %s978_s14   ;;  %s1018_s16 = sadd.s32 1, %s978_s14   ;;  %s978_s14 = sphi %s1005_s14, %s1300_s14   ;;  %s974_s13 = sphi %s1003_s13, %s1299_s13   ;;  %s970_s12 = sphi %s1001_s12, %s1298_s12  }
   0x3   : > { %s38_s17 = ssub.s32 %s978_s14, %s1018_s16  ;;  %s41_s18 = sadd.s32 1, %s974_s13 }
   0x4   : > { %p39_p0 = scmp.eq.s32.totalorder %s38_s17, 0  ;;  %p48_p1 = scmp.ne.s32.totalorder %s974_s13, %s970_s12 }
   0x5   : > { %p49_p2 = scmp.eq.s32.totalorder %s978_s14, 0  ;;  %p99_p3 = scmp.eq.s32.totalorder %s786_s15, 4 }
   0x6   : > { %s1029_s19 = scalar_select %p39_p0, %s974_s13, %s41_s18  }
   0x7   : > { %p50_p4 = por %p49_p2, %p48_p1  ;;  %p1031_p5 = por %p99_p3, %p48_p1 }
   0x8   : > { %p789_p6 = scmp.ge.s32.totalorder %s978_s14, 5 }
   0xa   : > { %127 = sbr.rel (%p789_p6) target bundleno = 34 (0x22), region = 24 }
   0xf   : > { %130 = sbr.rel (!%p50_p4) target bundleno = 34 (0x22), region = 28  ;;  %s132_s21 = sand.u32 (%p50_p4), 1, %s974_s13  }
  0x10   : > { %s849_s22 = sshll.u32 (%p50_p4), %s978_s14, 4  ;;  %s851_s23 = smul.u32 (%p50_p4), 224, %s132_s21 }
  0x11   : > { %s1041_s26 = scalar_lea.vmem (%p50_p4), %s1294_s1, %s849_s22 }
  0x12   : > { %v150_v0 = vld [vmem:[%s1041_s26] sm:$0xff] (%p50_p4)  ;;  %v152_v1 = vld [vmem:[%s1041_s26 + $0x8] sm:$0xff] (%p50_p4)  ;;  %v154_v2 = vld [vmem:[%s1041_s26 + $0x50] sm:$0xff] (%p50_p4)  ;;  %s1049_s27 = scalar_lea.vmem (%p50_p4), [#allocation2], %s851_s23 }
  0x13   : > { %v156_v3 = vld [vmem:[%s1041_s26 + $0x58] sm:$0xff] (%p50_p4)  ;;  %v158_v4 = vld [vmem:[%s1041_s26 + $0xa0] sm:$0xff] (%p50_p4)  ;;  %v160_v5 = vld [vmem:[%s1041_s26 + $0xa8] sm:$0xff] (%p50_p4)  ;;  %151 = vst [vmem:[%s1049_s27] sm:$0xff] (%p50_p4), %v150_v0 }
  0x14   : > { %153 = vst [vmem:[%s1049_s27 + $0x8] sm:$0xff] %v152_v1  ;;  %155 = vst [vmem:[%s1049_s27 + $0x10] sm:$0xff] %v154_v2  ;;  %v162_v6 = vld [vmem:[%s1041_s26 + $0xf0] sm:$0xff]  ;;  %v164_v7 = vld [vmem:[%s1041_s26 + $0xf8] sm:$0xff] }
  0x15   : > { %157 = vst [vmem:[%s1049_s27 + $0x18] sm:$0xff] %v156_v3  ;;  %159 = vst [vmem:[%s1049_s27 + $0x20] sm:$0xff] %v158_v4  ;;  %v166_v8 = vld [vmem:[%s1041_s26 + $0x140] sm:$0xff]  ;;  %v168_v9 = vld [vmem:[%s1041_s26 + $0x148] sm:$0xff] }
  0x16   : > { %161 = vst [vmem:[%s1049_s27 + $0x28] sm:$0xff] %v160_v5  ;;  %163 = vst [vmem:[%s1049_s27 + $0x30] sm:$0xff] %v162_v6  ;;  %v170_v10 = vld [vmem:[%s1041_s26 + $0x190] sm:$0xff]  ;;  %v172_v11 = vld [vmem:[%s1041_s26 + $0x198] sm:$0xff] }
  0x17   : > { %165 = vst [vmem:[%s1049_s27 + $0x38] sm:$0xff] %v164_v7  ;;  %167 = vst [vmem:[%s1049_s27 + $0x40] sm:$0xff] %v166_v8  ;;  %v174_v12 = vld [vmem:[%s1041_s26 + $0x1e0] sm:$0xff]  ;;  %v176_v13 = vld [vmem:[%s1041_s26 + $0x1e8] sm:$0xff] }
  0x18   : > { %169 = vst [vmem:[%s1049_s27 + $0x48] sm:$0xff] %v168_v9  ;;  %171 = vst [vmem:[%s1049_s27 + $0x50] sm:$0xff] %v170_v10  ;;  %v178_v14 = vld [vmem:[%s1041_s26 + $0x230] sm:$0xff]  ;;  %v180_v15 = vld [vmem:[%s1041_s26 + $0x238] sm:$0xff] }
  0x19   : > { %173 = vst [vmem:[%s1049_s27 + $0x58] sm:$0xff] %v172_v11  ;;  %175 = vst [vmem:[%s1049_s27 + $0x60] sm:$0xff] %v174_v12  ;;  %v182_v16 = vld [vmem:[%s1041_s26 + $0x280] sm:$0xff]  ;;  %v184_v17 = vld [vmem:[%s1041_s26 + $0x288] sm:$0xff] }
  0x1a   : > { %177 = vst [vmem:[%s1049_s27 + $0x68] sm:$0xff] %v176_v13  ;;  %179 = vst [vmem:[%s1049_s27 + $0x70] sm:$0xff] %v178_v14  ;;  %v186_v18 = vld [vmem:[%s1041_s26 + $0x2d0] sm:$0xff]  ;;  %v188_v19 = vld [vmem:[%s1041_s26 + $0x2d8] sm:$0xff] }
  0x1b   : > { %181 = vst [vmem:[%s1049_s27 + $0x78] sm:$0xff] %v180_v15  ;;  %183 = vst [vmem:[%s1049_s27 + $0x80] sm:$0xff] %v182_v16  ;;  %v190_v20 = vld [vmem:[%s1041_s26 + $0x320] sm:$0xff]  ;;  %v192_v21 = vld [vmem:[%s1041_s26 + $0x328] sm:$0xff] }
  0x1c   : > { %185 = vst [vmem:[%s1049_s27 + $0x88] sm:$0xff] %v184_v17  ;;  %187 = vst [vmem:[%s1049_s27 + $0x90] sm:$0xff] %v186_v18  ;;  %v194_v22 = vld [vmem:[%s1041_s26 + $0x370] sm:$0xff]  ;;  %v196_v23 = vld [vmem:[%s1041_s26 + $0x378] sm:$0xff] }
  0x1d   : > { %189 = vst [vmem:[%s1049_s27 + $0x98] sm:$0xff] %v188_v19  ;;  %191 = vst [vmem:[%s1049_s27 + $0xa0] sm:$0xff] %v190_v20  ;;  %v198_v24 = vld [vmem:[%s1041_s26 + $0x3c0] sm:$0xff]  ;;  %v200_v25 = vld [vmem:[%s1041_s26 + $0x3c8] sm:$0xff] }
  0x1e   : > { %193 = vst [vmem:[%s1049_s27 + $0xa8] sm:$0xff] %v192_v21  ;;  %195 = vst [vmem:[%s1049_s27 + $0xb0] sm:$0xff] %v194_v22  ;;  %v202_v26 = vld [vmem:[%s1041_s26 + $0x410] sm:$0xff]  ;;  %v204_v27 = vld [vmem:[%s1041_s26 + $0x418] sm:$0xff] }
  0x1f   : > { %197 = vst [vmem:[%s1049_s27 + $0xb8] sm:$0xff] %v196_v23  ;;  %199 = vst [vmem:[%s1049_s27 + $0xc0] sm:$0xff] %v198_v24 }
  0x20   : > { %201 = vst [vmem:[%s1049_s27 + $0xc8] sm:$0xff] %v200_v25  ;;  %203 = vst [vmem:[%s1049_s27 + $0xd0] sm:$0xff] %v202_v26 }
  0x21   : > { %205 = vst [vmem:[%s1049_s27 + $0xd8] sm:$0xff] %v204_v27 }
  0x22 PF: > { %p792_p7 = scmp.ge.s32.totalorder %s978_s14, 1  ;;  %p210_p8 = scmp.lt.s32.totalorder %s978_s14, 6 }
  0x24   : > { %p211_p9 = pnand %p792_p7, %p210_p8 }
  0x25   : > { %s217_s28 = sand.u32 (!%p211_p9), 1, %s970_s12  }
  0x26   : > { %214 = sbr.rel (%p211_p9) target bundleno = 316 (0x13c), region = 51  ;;  %s793_s23 = sshll.u32 (!%p211_p9), %s217_s28, 7 }
  0x27   : > { %s852_s29 = smul.u32 (!%p211_p9), 224, %s217_s28  ;;  %s1213_s12 = scalar_lea.vmem (!%p211_p9), [#allocation3], %s793_s23 }
  0x29   : > { %s1119_s9 = scalar_lea.vmem (!%p211_p9), [#allocation2], %s852_s29 }
  0x2b   : > { %v980_v28 = vmov 0   ;;  %v274_v29 = vld [vmem:[%s1295_s2] sm:$0xff]  ;;  %v275_v30 = vld [vmem:[%s1295_s2 + $0x8] sm:$0xff]  ;;  %v276_v31 = vld [vmem:[%s1295_s2 + $0x10] sm:$0xff]  ;;  %vm448_vm0 = vcmask 916480   ;;  %s850_s24 = sshll.u32 (%p1031_p5), %s786_s15, 5 }
  0x2c   : > { %487 = vmatprep.mubr.bf16.mxu0 %v980_v28  ;;  %540 = vmatprep.mubr.bf16.mxu1 %v980_v28  ;;  %v880_v32 = vld [vmem:[%s1119_s9 + $0xc4] ss:$16 sps:$4 sm:$0xff]   ;;  %v277_v33 = vld [vmem:[%s1295_s2 + $0x18] sm:$0xff]  ;;  %v884_v35 = vld [vmem:[%s1119_s9 + $0xc0] ss:$16 sps:$4 sm:$0xff]   ;;  %s682_s20 = scalar_lea.vmem (%p1031_p5), %s1296_s3, %s850_s24 }
  0x2d   : > { %878 = vset.pattern.permute.xlu0 %v980_v28  ;;  %879 = vset.pattern.permute.xlu1 %v980_v28  ;;  %v882_v34 = vld [vmem:[%s1119_s9 + $0xcc] ss:$16 sps:$4 sm:$0xff]   ;;  %v885_v36 = vld [vmem:[%s1119_s9 + $0xc8] ss:$16 sps:$4 sm:$0xff]   ;;  %v886_v37 = vld [vmem:[%s1119_s9 + $0xa4] ss:$16 sps:$4 sm:$0xff]  }
  0x2e   : > { %280 = vperm.xlu0 %878, %v274_v29   ;;  %290 = vperm.xlu1 %879, %v276_v31   ;;  %v888_v38 = vld [vmem:[%s1119_s9 + $0xac] ss:$16 sps:$4 sm:$0xff]   ;;  %v890_v39 = vld [vmem:[%s1119_s9 + $0xa0] ss:$16 sps:$4 sm:$0xff]   ;;  %v891_v40 = vld [vmem:[%s1119_s9 + $0xa8] ss:$16 sps:$4 sm:$0xff]  }
  0x2f   : > { %457 = vmatprep.subr.bf16.mxu0 %v880_v32  ;;  %510 = vmatprep.subr.bf16.mxu1 %v882_v34  ;;  %v892_v41 = vld [vmem:[%s1119_s9 + $0x84] ss:$16 sps:$4 sm:$0xff]   ;;  %v894_v42 = vld [vmem:[%s1119_s9 + $0x8c] ss:$16 sps:$4 sm:$0xff]   ;;  %v896_v43 = vld [vmem:[%s1119_s9 + $0x80] ss:$16 sps:$4 sm:$0xff]  }
  0x30   : > { %458 = vmatpush1.bf16.msra.mxu0 %v884_v35  ;;  %511 = vmatpush1.bf16.msra.mxu1 %v885_v36  ;;  %v897_v44 = vld [vmem:[%s1119_s9 + $0x88] ss:$16 sps:$4 sm:$0xff]   ;;  %v898_v45 = vld [vmem:[%s1119_s9 + $0x64] ss:$16 sps:$4 sm:$0xff]   ;;  %v900_v46 = vld [vmem:[%s1119_s9 + $0x6c] ss:$16 sps:$4 sm:$0xff]  }
  0x31   : > { %459 = vmatprep.subr.bf16.mxu0 %v886_v37  ;;  %512 = vmatprep.subr.bf16.mxu1 %v888_v38  ;;  %v902_v47 = vld [vmem:[%s1119_s9 + $0x60] ss:$16 sps:$4 sm:$0xff]   ;;  %v903_v48 = vld [vmem:[%s1119_s9 + $0x68] ss:$16 sps:$4 sm:$0xff]   ;;  %v904_v49 = vld [vmem:[%s1119_s9 + $0x44] ss:$16 sps:$4 sm:$0xff]  }
  0x32   : > { %285 = vperm.xlu0 %878, %v275_v30   ;;  %295 = vperm.xlu1 %879, %v277_v33   ;;  %v906_v50 = vld [vmem:[%s1119_s9 + $0x4c] ss:$16 sps:$4 sm:$0xff]   ;;  %v908_v51 = vld [vmem:[%s1119_s9 + $0x40] ss:$16 sps:$4 sm:$0xff]   ;;  %v909_v52 = vld [vmem:[%s1119_s9 + $0x48] ss:$16 sps:$4 sm:$0xff]  }
  0x33   : > { %v910_v53 = vld [vmem:[%s1119_s9 + $0x24] ss:$16 sps:$4 sm:$0xff]   ;;  %v912_v54 = vld [vmem:[%s1119_s9 + $0x2c] ss:$16 sps:$4 sm:$0xff]   ;;  %v914_v55 = vld [vmem:[%s1119_s9 + $0x20] ss:$16 sps:$4 sm:$0xff]  }
  0x34   : > { %460 = vmatpush1.bf16.msra.mxu0 %v890_v39  ;;  %513 = vmatpush1.bf16.msra.mxu1 %v891_v40  ;;  %v915_v56 = vld [vmem:[%s1119_s9 + $0x28] ss:$16 sps:$4 sm:$0xff]   ;;  %v916_v57 = vld [vmem:[%s1119_s9 + $0x4] ss:$16 sps:$4 sm:$0xff]   ;;  %v918_v58 = vld [vmem:[%s1119_s9 + $0xc] ss:$16 sps:$4 sm:$0xff]  }
  0x35   : > { %461 = vmatprep.subr.bf16.mxu0 %v892_v41  ;;  %514 = vmatprep.subr.bf16.mxu1 %v894_v42  ;;  %v920_v59 = vld [vmem:[%s1119_s9] ss:$16 sps:$4 sm:$0xff]   ;;  %v921_v60 = vld [vmem:[%s1119_s9 + $0x8] ss:$16 sps:$4 sm:$0xff]  }
  0x36   : > { %v922_v61 = vld [vmem:[%s1293_s0] sm:$0xff]   ;;  %v923_v62 = vld [vmem:[%s1293_s0 + $0x8] sm:$0xff]  }
  0x38   : > { %462 = vmatpush1.bf16.msra.mxu0 %v896_v43  ;;  %515 = vmatpush1.bf16.msra.mxu1 %v897_v44 }
  0x39   : > { %463 = vmatprep.subr.bf16.mxu0 %v898_v45  ;;  %516 = vmatprep.subr.bf16.mxu1 %v900_v46 }
  0x3c   : > { %464 = vmatpush1.bf16.msra.mxu0 %v902_v47  ;;  %517 = vmatpush1.bf16.msra.mxu1 %v903_v48 }
  0x3d   : > { %465 = vmatprep.subr.bf16.mxu0 %v904_v49  ;;  %518 = vmatprep.subr.bf16.mxu1 %v906_v50 }
  0x40   : > { %466 = vmatpush1.bf16.msra.mxu0 %v908_v51  ;;  %519 = vmatpush1.bf16.msra.mxu1 %v909_v52 }
  0x41   : > { %467 = vmatprep.subr.bf16.mxu0 %v910_v53  ;;  %520 = vmatprep.subr.bf16.mxu1 %v912_v54 }
  0x44   : > { %468 = vmatpush1.bf16.msra.mxu0 %v914_v55  ;;  %521 = vmatpush1.bf16.msra.mxu1 %v915_v56 }
  0x45   : > { %469 = vmatprep.subr.bf16.mxu0 %v916_v57  ;;  %522 = vmatprep.subr.bf16.mxu1 %v918_v58 }
  0x48   : > { %470 = vmatpush1.bf16.msra.mxu0 %v920_v59  ;;  %523 = vmatpush1.bf16.msra.mxu1 %v921_v60 }
  0x4b   : > { %824 = vmatmul.mubr.msk.bf16.vlgmr.msra.gmra.mxu0 %vm448_vm0, %v922_v61  ;;  %826 = vmatmul.mubr.msk.bf16.vlgmr.msra.gmra.mxu1 %vm448_vm0, %v922_v61 }
  0x4c   : > { %497 = vmatprep.mubr.bf16.mxu0 %v980_v28  ;;  %550 = vmatprep.mubr.bf16.mxu1 %v980_v28 }
  0x53   : > { %825 = vmatmul.mubr.msk.bf16.gmra.mxu0 %vm448_vm0, %v923_v62  ;;  %827 = vmatmul.mubr.msk.bf16.gmra.mxu1 %vm448_vm0, %v923_v62 }
  0xa9   : > { %v281_v63 = vpop.permute.xlu0 %280  ;;  %v291_v22 = vpop.permute.xlu1 %290 }
  0xad   : > { %v286_v4 = vpop.permute.xlu0 %285  ;;  %v296_v45 = vpop.permute.xlu1 %295 }
 0x10b   : > { %v489_v0 = vpop.f32.mrf.mxu0  ;;  %v542_v1 = vpop.f32.mrf.mxu1 }
 0x10c   : > { %v1160_v2 = vadd.f32 %v489_v0, %v281_v63  ;;  %v1162_v3 = vadd.f32 %v542_v1, %v281_v63 }
 0x10d   : > { %v491_v5 = vpop.f32.mrf.mxu0  ;;  %v544_v6 = vpop.f32.mrf.mxu1 }
 0x10e   : > { %v577_v7 = vmin.f32 %v1160_v2, 0.0  ;;  %v579_v8 = vmin.f32 %v1162_v3, 0.0  ;;  %v1166_v9 = vadd.f32 %v491_v5, %v281_v63  ;;  %v1168_v10 = vadd.f32 %v544_v6, %v281_v63 }
 0x10f   : > { %v493_v11 = vpop.f32.mrf.mxu0  ;;  %v546_v12 = vpop.f32.mrf.mxu1  ;;  %vm561_vm1 = vcmp.gt.f32.partialorder %v1160_v2, 0.0  ;;  %vm563_vm2 = vcmp.gt.f32.partialorder %v1162_v3, 0.0 }
 0x110   : > { %v593_v13 = vmul.f32 1.442695, %v577_v7  ;;  %v597_v14 = vmul.f32 1.442695, %v579_v8  ;;  %v1170_v15 = vadd.f32 %v493_v11, %v286_v4  ;;  %v1172_v16 = vadd.f32 %v546_v12, %v286_v4 }
 0x111   : > { %v578_v17 = vmin.f32 %v1166_v9, 0.0  ;;  %v580_v18 = vmin.f32 %v1168_v10, 0.0  ;;  %v495_v19 = vpop.f32.mrf.mxu0  ;;  %v548_v20 = vpop.f32.mrf.mxu1  ;;  %vm562_vm3 = vcmp.gt.f32.partialorder %v1166_v9, 0.0  ;;  %vm564_vm4 = vcmp.gt.f32.partialorder %v1168_v10, 0.0 }
 0x112   : > { %924 = vpow2.f32 %v593_v13  ;;  %v581_v21 = vmin.f32 %v1170_v15, 0.0  ;;  %v583_v25 = vmin.f32 %v1172_v16, 0.0  ;;  %v1178_v29 = vadd.f32 %v495_v19, %v286_v4 }
 0x113   : > { %926 = vpow2.f32 %v597_v14  ;;  %v595_v23 = vmul.f32 1.442695, %v578_v17  ;;  %v599_v24 = vmul.f32 1.442695, %v580_v18  ;;  %v499_v26 = vpop.f32.mrf.mxu0  ;;  %v552_v27 = vpop.f32.mrf.mxu1  ;;  %v1180_v30 = vadd.f32 %v548_v20, %v286_v4 }
 0x114   : > { %v601_v28 = vmul.f32 1.442695, %v581_v21  ;;  %v1182_v31 = vadd.f32 %v499_v26, %v291_v22  ;;  %v605_v32 = vmul.f32 1.442695, %v583_v25  ;;  %v1184_v33 = vadd.f32 %v552_v27, %v291_v22 }
 0x115   : > { %928 = vpow2.f32 %v595_v23  ;;  %v501_v34 = vpop.f32.mrf.mxu0  ;;  %v554_v35 = vpop.f32.mrf.mxu1  ;;  %v582_v36 = vmin.f32 %v1178_v29, 0.0  ;;  %v584_v37 = vmin.f32 %v1180_v30, 0.0  ;;  %vm565_vm5 = vcmp.gt.f32.partialorder %v1170_v15, 0.0 }
 0x116   : > { %930 = vpow2.f32 %v599_v24  ;;  %v585_v38 = vmin.f32 %v1182_v31, 0.0  ;;  %v587_v42 = vmin.f32 %v1184_v33, 0.0  ;;  %v1190_v46 = vadd.f32 %v501_v34, %v291_v22 }
 0x117   : > { %932 = vpow2.f32 %v601_v28  ;;  %v503_v39 = vpop.f32.mrf.mxu0  ;;  %v556_v40 = vpop.f32.mrf.mxu1  ;;  %v603_v41 = vmul.f32 1.442695, %v582_v36  ;;  %v607_v43 = vmul.f32 1.442695, %v584_v37  ;;  %v1192_v47 = vadd.f32 %v554_v35, %v291_v22 }
 0x118   : > { %934 = vpow2.f32 %v605_v32  ;;  %v609_v44 = vmul.f32 1.442695, %v585_v38  ;;  %v613_v48 = vmul.f32 1.442695, %v587_v42  ;;  %v1194_v49 = vadd.f32 %v503_v39, %v296_v45 }
 0x119   : > { %936 = vpow2.f32 %v603_v41  ;;  %v1196_v50 = vadd.f32 %v556_v40, %v296_v45  ;;  %v586_v51 = vmin.f32 %v1190_v46, 0.0  ;;  %v505_v52 = vpop.f32.mrf.mxu0  ;;  %v558_v53 = vpop.f32.mrf.mxu1  ;;  %v588_v54 = vmin.f32 %v1192_v47, 0.0 }
 0x11a   : > { %938 = vpow2.f32 %v607_v43  ;;  %v589_v55 = vmin.f32 %v1194_v49, 0.0  ;;  %v1204_v60 = vadd.f32 %v505_v52, %v296_v45  ;;  %v1206_v61 = vadd.f32 %v558_v53, %v296_v45 }
 0x11b   : > { %940 = vpow2.f32 %v609_v44  ;;  %v611_v56 = vmul.f32 1.442695, %v586_v51  ;;  %v591_v57 = vmin.f32 %v1196_v50, 0.0  ;;  %v615_v58 = vmul.f32 1.442695, %v588_v54 }
 0x11c   : > { %942 = vpow2.f32 %v613_v48  ;;  %v617_v59 = vmul.f32 1.442695, %v589_v55  ;;  %v590_v4 = vmin.f32 %v1204_v60, 0.0  ;;  %v592_v6 = vmin.f32 %v1206_v61, 0.0 }
 0x11d   : > { %944 = vpow2.f32 %v611_v56  ;;  %v621_v63 = vmul.f32 1.442695, %v591_v57  ;;  %vm567_vm6 = vcmp.gt.f32.partialorder %v1172_v16, 0.0  ;;  %vm566_vm7 = vcmp.gt.f32.partialorder %v1178_v29, 0.0 }
 0x11e   : > { %946 = vpow2.f32 %v615_v58  ;;  %v619_v11 = vmul.f32 1.442695, %v590_v4  ;;  %v623_v17 = vmul.f32 1.442695, %v592_v6  ;;  %vm568_vm8 = vcmp.gt.f32.partialorder %v1180_v30, 0.0 }
 0x11f   : > { %v925_v62 = vpop.eup %924  ;;  %948 = vpow2.f32 %v617_v59  ;;  %vm569_vm9 = vcmp.gt.f32.partialorder %v1182_v31, 0.0  ;;  %vm571_vm10 = vcmp.gt.f32.partialorder %v1184_v33, 0.0  ;;  %vm570_vm11 = vcmp.gt.f32.partialorder %v1190_v46, 0.0 }
 0x120   : > { %v927_v0 = vpop.eup %926  ;;  %v828_v1 = vadd.f32 -1.0, %v925_v62  ;;  %950 = vpow2.f32 %v621_v63  ;;  %vm572_vm12 = vcmp.gt.f32.partialorder %v1192_v47, 0.0  ;;  %vm573_vm13 = vcmp.gt.f32.partialorder %v1194_v49, 0.0 }
 0x121   : > { %v830_v5 = vadd.f32 -1.0, %v927_v0  ;;  %952 = vpow2.f32 %v619_v11  ;;  %vm575_vm14 = vcmp.gt.f32.partialorder %v1196_v50, 0.0  ;;  %vm574_vm15 = vcmp.gt.f32.partialorder %v1204_v60, 0.0 }
 0x122   : > { %v929_v7 = vpop.eup %928  ;;  %v641_v8 = vsel %vm561_vm1, %v1160_v2, %v828_v1  ;;  %954 = vpow2.f32 %v623_v17  ;;  %vm576_vm0 = vcmp.gt.f32.partialorder %v1206_v61, 0.0 }
 0x123   : > { %v931_v12 = vpop.eup %930  ;;  %657 = vst [vmem:[%s1213_s12] sm:$0xff] %v641_v8  ;;  %v643_v13 = vsel %vm563_vm2, %v1162_v3, %v830_v5  ;;  %v829_v14 = vadd.f32 -1.0, %v929_v7 }
 0x124   : > { %v933_v18 = vpop.eup %932  ;;  %659 = vst [vmem:[%s1213_s12 + $0x10] sm:$0xff] %v643_v13  ;;  %v831_v2 = vadd.f32 -1.0, %v931_v12 }
 0x125   : > { %v935_v19 = vpop.eup %934  ;;  %v642_v20 = vsel %vm562_vm3, %v1166_v9, %v829_v14  ;;  %v832_v21 = vadd.f32 -1.0, %v933_v18 }
 0x126   : > { %658 = vst [vmem:[%s1213_s12 + $0x8] sm:$0xff] %v642_v20  ;;  %v644_v3 = vsel %vm564_vm4, %v1168_v10, %v831_v2  ;;  %v834_v22 = vadd.f32 -1.0, %v935_v19  ;;  %v937_v23 = vpop.eup %936 }
 0x127   : > { %660 = vst [vmem:[%s1213_s12 + $0x18] sm:$0xff] %v644_v3  ;;  %v645_v24 = vsel %vm565_vm5, %v1170_v15, %v832_v21  ;;  %v939_v25 = vpop.eup %938  ;;  %v833_v26 = vadd.f32 -1.0, %v937_v23 }
 0x128   : > { %661 = vst [vmem:[%s1213_s12 + $0x20] sm:$0xff] %v645_v24  ;;  %v647_v9 = vsel %vm567_vm6, %v1172_v16, %v834_v22  ;;  %v941_v27 = vpop.eup %940  ;;  %v835_v10 = vadd.f32 -1.0, %v939_v25 }
 0x129   : > { %663 = vst [vmem:[%s1213_s12 + $0x30] sm:$0xff] %v647_v9  ;;  %v943_v28 = vpop.eup %942  ;;  %v646_v32 = vsel %vm566_vm7, %v1178_v29, %v833_v26  ;;  %v836_v15 = vadd.f32 -1.0, %v941_v27 }
 0x12a   : > { %662 = vst [vmem:[%s1213_s12 + $0x28] sm:$0xff] %v646_v32  ;;  %v648_v34 = vsel %vm568_vm8, %v1180_v30, %v835_v10  ;;  %v838_v16 = vadd.f32 -1.0, %v943_v28  ;;  %v945_v35 = vpop.eup %944 }
 0x12b   : > { %664 = vst [vmem:[%s1213_s12 + $0x38] sm:$0xff] %v648_v34  ;;  %v649_v36 = vsel %vm569_vm9, %v1182_v31, %v836_v15  ;;  %v947_v37 = vpop.eup %946  ;;  %v837_v38 = vadd.f32 -1.0, %v945_v35  ;;  %v699_v53 = vld [vmem:[%s1213_s12 + $0x10] sm:$0xff] (%p1031_p5) }
 0x12c   : > { %665 = vst [vmem:[%s1213_s12 + $0x40] sm:$0xff] %v649_v36  ;;  %v651_v29 = vsel %vm571_vm10, %v1184_v33, %v838_v16  ;;  %v949_v39 = vpop.eup %948  ;;  %v839_v30 = vadd.f32 -1.0, %v947_v37  ;;  %700 = vst [vmem:[%s682_s20 + $0x10] sm:$0xff] (%p1031_p5), %v699_v53 }
 0x12d   : > { %667 = vst [vmem:[%s1213_s12 + $0x50] sm:$0xff] %v651_v29  ;;  %v951_v40 = vpop.eup %950  ;;  %v650_v41 = vsel %vm570_vm11, %v1190_v46, %v837_v38  ;;  %v840_v31 = vadd.f32 -1.0, %v949_v39 }
 0x12e   : > { %666 = vst [vmem:[%s1213_s12 + $0x48] sm:$0xff] %v650_v41  ;;  %v652_v42 = vsel %vm572_vm12, %v1192_v47, %v839_v30  ;;  %v842_v33 = vadd.f32 -1.0, %v951_v40  ;;  %v953_v43 = vpop.eup %952  ;;  %v701_v54 = vld [vmem:[%s1213_s12 + $0x18] sm:$0xff] (%p1031_p5) }
 0x12f   : > { %668 = vst [vmem:[%s1213_s12 + $0x58] sm:$0xff] %v652_v42  ;;  %v653_v44 = vsel %vm573_vm13, %v1194_v49, %v840_v31  ;;  %v955_v45 = vpop.eup %954  ;;  %v841_v48 = vadd.f32 -1.0, %v953_v43  ;;  %679 = sbr.rel (!%p1031_p5) target bundleno = 316 (0x13c), region = 59  ;;  %v695_v49 = vld [vmem:[%s1213_s12] sm:$0xff] (%p1031_p5)  ;;  %702 = vst [vmem:[%s682_s20 + $0x18] sm:$0xff] (%p1031_p5), %v701_v54 }
 0x130   : > { %669 = vst [vmem:[%s1213_s12 + $0x60] sm:$0xff] %v653_v44  ;;  %v655_v46 = vsel %vm575_vm14, %v1196_v50, %v842_v33  ;;  %v843_v47 = vadd.f32 -1.0, %v955_v45  ;;  %v697_v50 = vld [vmem:[%s1213_s12 + $0x8] sm:$0xff] (%p1031_p5)  ;;  %v703_v55 = vld [vmem:[%s1213_s12 + $0x20] sm:$0xff] (%p1031_p5)  ;;  %696 = vst [vmem:[%s682_s20] sm:$0xff] (%p1031_p5), %v695_v49 }
 0x131   : > { %671 = vst [vmem:[%s1213_s12 + $0x70] sm:$0xff] %v655_v46  ;;  %v654_v51 = vsel %vm574_vm15, %v1204_v60, %v841_v48  ;;  %v705_v56 = vld [vmem:[%s1213_s12 + $0x28] sm:$0xff] (%p1031_p5)  ;;  %698 = vst [vmem:[%s682_s20 + $0x8] sm:$0xff] (%p1031_p5), %v697_v50  ;;  %v707_v57 = vld [vmem:[%s1213_s12 + $0x30] sm:$0xff] (%p1031_p5) }
 0x132   : > { %670 = vst [vmem:[%s1213_s12 + $0x68] sm:$0xff] %v654_v51  ;;  %v656_v52 = vsel %vm576_vm0, %v1206_v61, %v843_v47  ;;  %704 = vst [vmem:[%s682_s20 + $0xa0] sm:$0xff] (%p1031_p5), %v703_v55  ;;  %v709_v58 = vld [vmem:[%s1213_s12 + $0x38] sm:$0xff] (%p1031_p5) }
 0x133   : > { %672 = vst [vmem:[%s1213_s12 + $0x78] sm:$0xff] %v656_v52  ;;  %706 = vst [vmem:[%s682_s20 + $0xa8] sm:$0xff] (%p1031_p5), %v705_v56  ;;  %v711_v59 = vld [vmem:[%s1213_s12 + $0x40] sm:$0xff] (%p1031_p5) }
 0x134   : > { %708 = vst [vmem:[%s682_s20 + $0xb0] sm:$0xff] %v707_v57  ;;  %710 = vst [vmem:[%s682_s20 + $0xb8] sm:$0xff] %v709_v58  ;;  %v715_v61 = vld [vmem:[%s1213_s12 + $0x50] sm:$0xff] }
 0x135   : > { %712 = vst [vmem:[%s682_s20 + $0x140] sm:$0xff] %v711_v59  ;;  %v713_v60 = vld [vmem:[%s1213_s12 + $0x48] sm:$0xff]  ;;  %716 = vst [vmem:[%s682_s20 + $0x150] sm:$0xff] %v715_v61 }
 0x136   : > { %v717_v62 = vld [vmem:[%s1213_s12 + $0x58] sm:$0xff]  ;;  %714 = vst [vmem:[%s682_s20 + $0x148] sm:$0xff] %v713_v60 }
 0x137   : > { %718 = vst [vmem:[%s682_s20 + $0x158] sm:$0xff] %v717_v62  ;;  %v719_v63 = vld [vmem:[%s1213_s12 + $0x60] sm:$0xff] }
 0x138   : > { %v723_v1 = vld [vmem:[%s1213_s12 + $0x70] sm:$0xff]  ;;  %720 = vst [vmem:[%s682_s20 + $0x1e0] sm:$0xff] %v719_v63 }
 0x139   : > { %v721_v0 = vld [vmem:[%s1213_s12 + $0x68] sm:$0xff]  ;;  %724 = vst [vmem:[%s682_s20 + $0x1f0] sm:$0xff] %v723_v1 }
 0x13a   : > { %722 = vst [vmem:[%s682_s20 + $0x1e8] sm:$0xff] %v721_v0  ;;  %v725_v4 = vld [vmem:[%s1213_s12 + $0x78] sm:$0xff] }
 0x13b   : > { %726 = vst [vmem:[%s682_s20 + $0x1f8] sm:$0xff] %v725_v4 }
 0x13c PF: > { %p10_p10 = scmp.ge.s32.totalorder %s1018_s16, 7   ;;  %s1298_s12 = smov %s974_s13 }
 0x13d   : > { %s1299_s13 = smov %s1029_s19  ;;  %s1300_s14 = smov %s1018_s16 }
 0x13e   :  { %12 = sbr.rel (!%p10_p10) target bundleno = 2 (0x2), region = 113 }

// kernel: stft_discriminator_forward.15
= control target key start
LH: loop header
LB: loop body
LE: loop exit
PB: predicated region body
PF: predicated region fallthrough
CT: control target
= control target key end

     0   :  { %s1340_s12 = smov 0   ;;  %s1342_s13 = smov 0   ;;  %s1635_s0 = inlined_call_operand.vmem [shape: bf16[4,288], index: 0, kind: input, shape index: {}]   ;;  %s1636_s1 = inlined_call_operand.vmem [shape: bf16[288,3072], index: 1, kind: input, shape index: {}]   ;;  %s1637_s2 = inlined_call_operand.vmem [shape: f32[4,1], index: 2, kind: input, shape index: {}]   ;;  %s1638_s3 = inlined_call_operand.vmem [shape: f32[4,3072], index: 3, kind: output, shape index: {}]  }
   0x1   :  { %s1344_s14 = smov 0  }
   0x2 LB: > { %s1058_s15 = sadd.s32 4294967295, %s1316_s14   ;;  %s1357_s16 = sadd.s32 1, %s1316_s14   ;;  %s1316_s14 = sphi %s1344_s14, %s1641_s14   ;;  %s1312_s13 = sphi %s1342_s13, %s1640_s13   ;;  %s1308_s12 = sphi %s1340_s12, %s1639_s12  }
   0x3   : > { %s38_s17 = ssub.s32 %s1316_s14, %s1357_s16  ;;  %s41_s18 = sadd.s32 1, %s1312_s13 }
   0x4   : > { %p39_p0 = scmp.eq.s32.totalorder %s38_s17, 0  ;;  %p48_p1 = scmp.ne.s32.totalorder %s1312_s13, %s1308_s12 }
   0x5   : > { %p49_p2 = scmp.eq.s32.totalorder %s1316_s14, 0  ;;  %p1061_p4 = scmp.ge.s32.totalorder %s1316_s14, 6 }
   0x6   : > { %s1366_s19 = scalar_select %p39_p0, %s1312_s13, %s41_s18  }
   0x7   : > { %p50_p3 = por %p49_p2, %p48_p1  ;;  %127 = sbr.rel (%p1061_p4) target bundleno = 52 (0x34), region = 24 }
   0xc   : > { %130 = sbr.rel (!%p50_p3) target bundleno = 52 (0x34), region = 28  ;;  %s132_s20 = sand.u32 (%p50_p3), 1, %s1312_s13  }
   0xd   : > { %s1147_s21 = sshll.u32 (%p50_p3), %s1316_s14, 4  ;;  %s1148_s22 = smul.u32 (%p50_p3), 576, %s132_s20 }
   0xe   : > { %s1374_s25 = scalar_lea.vmem (%p50_p3), %s1636_s1, %s1147_s21 }
   0xf   : > { %v150_v0 = vld [vmem:[%s1374_s25] sm:$0xff] (%p50_p3)  ;;  %v152_v1 = vld [vmem:[%s1374_s25 + $0x8] sm:$0xff] (%p50_p3)  ;;  %s1382_s26 = scalar_lea.vmem (%p50_p3), [#allocation2], %s1148_s22 }
  0x10   : > { %v154_v2 = vld [vmem:[%s1374_s25 + $0x60] sm:$0xff] (%p50_p3)  ;;  %v156_v3 = vld [vmem:[%s1374_s25 + $0x68] sm:$0xff] (%p50_p3)  ;;  %151 = vst [vmem:[%s1382_s26] sm:$0xff] (%p50_p3), %v150_v0  ;;  %153 = vst [vmem:[%s1382_s26 + $0x8] sm:$0xff] (%p50_p3), %v152_v1 }
  0x11   : > { %v158_v4 = vld [vmem:[%s1374_s25 + $0xc0] sm:$0xff]  ;;  %v160_v5 = vld [vmem:[%s1374_s25 + $0xc8] sm:$0xff]  ;;  %155 = vst [vmem:[%s1382_s26 + $0x10] sm:$0xff] %v154_v2  ;;  %157 = vst [vmem:[%s1382_s26 + $0x18] sm:$0xff] %v156_v3 }
  0x12   : > { %159 = vst [vmem:[%s1382_s26 + $0x20] sm:$0xff] %v158_v4  ;;  %161 = vst [vmem:[%s1382_s26 + $0x28] sm:$0xff] %v160_v5  ;;  %v162_v6 = vld [vmem:[%s1374_s25 + $0x120] sm:$0xff]  ;;  %v164_v7 = vld [vmem:[%s1374_s25 + $0x128] sm:$0xff] }
  0x13   : > { %v166_v8 = vld [vmem:[%s1374_s25 + $0x180] sm:$0xff]  ;;  %163 = vst [vmem:[%s1382_s26 + $0x30] sm:$0xff] %v162_v6  ;;  %165 = vst [vmem:[%s1382_s26 + $0x38] sm:$0xff] %v164_v7  ;;  %v168_v9 = vld [vmem:[%s1374_s25 + $0x188] sm:$0xff] }
  0x14   : > { %167 = vst [vmem:[%s1382_s26 + $0x40] sm:$0xff] %v166_v8  ;;  %v170_v10 = vld [vmem:[%s1374_s25 + $0x1e0] sm:$0xff]  ;;  %v172_v11 = vld [vmem:[%s1374_s25 + $0x1e8] sm:$0xff]  ;;  %169 = vst [vmem:[%s1382_s26 + $0x48] sm:$0xff] %v168_v9 }
  0x15   : > { %171 = vst [vmem:[%s1382_s26 + $0x50] sm:$0xff] %v170_v10  ;;  %173 = vst [vmem:[%s1382_s26 + $0x58] sm:$0xff] %v172_v11  ;;  %v174_v12 = vld [vmem:[%s1374_s25 + $0x240] sm:$0xff]  ;;  %v176_v13 = vld [vmem:[%s1374_s25 + $0x248] sm:$0xff] }
  0x16   : > { %v178_v14 = vld [vmem:[%s1374_s25 + $0x2a0] sm:$0xff]  ;;  %175 = vst [vmem:[%s1382_s26 + $0x60] sm:$0xff] %v174_v12  ;;  %177 = vst [vmem:[%s1382_s26 + $0x68] sm:$0xff] %v176_v13  ;;  %v180_v15 = vld [vmem:[%s1374_s25 + $0x2a8] sm:$0xff] }
  0x17   : > { %179 = vst [vmem:[%s1382_s26 + $0x70] sm:$0xff] %v178_v14  ;;  %v182_v16 = vld [vmem:[%s1374_s25 + $0x300] sm:$0xff]  ;;  %v184_v17 = vld [vmem:[%s1374_s25 + $0x308] sm:$0xff]  ;;  %181 = vst [vmem:[%s1382_s26 + $0x78] sm:$0xff] %v180_v15 }
  0x18   : > { %183 = vst [vmem:[%s1382_s26 + $0x80] sm:$0xff] %v182_v16  ;;  %185 = vst [vmem:[%s1382_s26 + $0x88] sm:$0xff] %v184_v17  ;;  %v186_v18 = vld [vmem:[%s1374_s25 + $0x360] sm:$0xff]  ;;  %v188_v19 = vld [vmem:[%s1374_s25 + $0x368] sm:$0xff] }
  0x19   : > { %v190_v20 = vld [vmem:[%s1374_s25 + $0x3c0] sm:$0xff]  ;;  %187 = vst [vmem:[%s1382_s26 + $0x90] sm:$0xff] %v186_v18  ;;  %189 = vst [vmem:[%s1382_s26 + $0x98] sm:$0xff] %v188_v19  ;;  %v192_v21 = vld [vmem:[%s1374_s25 + $0x3c8] sm:$0xff] }
  0x1a   : > { %191 = vst [vmem:[%s1382_s26 + $0xa0] sm:$0xff] %v190_v20  ;;  %v194_v22 = vld [vmem:[%s1374_s25 + $0x420] sm:$0xff]  ;;  %v196_v23 = vld [vmem:[%s1374_s25 + $0x428] sm:$0xff]  ;;  %193 = vst [vmem:[%s1382_s26 + $0xa8] sm:$0xff] %v192_v21 }
  0x1b   : > { %195 = vst [vmem:[%s1382_s26 + $0xb0] sm:$0xff] %v194_v22  ;;  %197 = vst [vmem:[%s1382_s26 + $0xb8] sm:$0xff] %v196_v23  ;;  %v198_v24 = vld [vmem:[%s1374_s25 + $0x480] sm:$0xff]  ;;  %v200_v25 = vld [vmem:[%s1374_s25 + $0x488] sm:$0xff] }
  0x1c   : > { %v202_v26 = vld [vmem:[%s1374_s25 + $0x4e0] sm:$0xff]  ;;  %199 = vst [vmem:[%s1382_s26 + $0xc0] sm:$0xff] %v198_v24  ;;  %201 = vst [vmem:[%s1382_s26 + $0xc8] sm:$0xff] %v200_v25  ;;  %v204_v27 = vld [vmem:[%s1374_s25 + $0x4e8] sm:$0xff] }
  0x1d   : > { %203 = vst [vmem:[%s1382_s26 + $0xd0] sm:$0xff] %v202_v26  ;;  %v206_v28 = vld [vmem:[%s1374_s25 + $0x540] sm:$0xff]  ;;  %v208_v29 = vld [vmem:[%s1374_s25 + $0x548] sm:$0xff]  ;;  %205 = vst [vmem:[%s1382_s26 + $0xd8] sm:$0xff] %v204_v27 }
  0x1e   : > { %207 = vst [vmem:[%s1382_s26 + $0xe0] sm:$0xff] %v206_v28  ;;  %209 = vst [vmem:[%s1382_s26 + $0xe8] sm:$0xff] %v208_v29  ;;  %v210_v30 = vld [vmem:[%s1374_s25 + $0x5a0] sm:$0xff]  ;;  %v212_v31 = vld [vmem:[%s1374_s25 + $0x5a8] sm:$0xff] }
  0x1f   : > { %v214_v32 = vld [vmem:[%s1374_s25 + $0x600] sm:$0xff]  ;;  %211 = vst [vmem:[%s1382_s26 + $0xf0] sm:$0xff] %v210_v30  ;;  %213 = vst [vmem:[%s1382_s26 + $0xf8] sm:$0xff] %v212_v31  ;;  %v216_v33 = vld [vmem:[%s1374_s25 + $0x608] sm:$0xff] }
  0x20   : > { %215 = vst [vmem:[%s1382_s26 + $0x100] sm:$0xff] %v214_v32  ;;  %v218_v34 = vld [vmem:[%s1374_s25 + $0x660] sm:$0xff]  ;;  %v220_v35 = vld [vmem:[%s1374_s25 + $0x668] sm:$0xff]  ;;  %217 = vst [vmem:[%s1382_s26 + $0x108] sm:$0xff] %v216_v33 }
  0x21   : > { %219 = vst [vmem:[%s1382_s26 + $0x110] sm:$0xff] %v218_v34  ;;  %221 = vst [vmem:[%s1382_s26 + $0x118] sm:$0xff] %v220_v35  ;;  %v222_v36 = vld [vmem:[%s1374_s25 + $0x6c0] sm:$0xff]  ;;  %v224_v37 = vld [vmem:[%s1374_s25 + $0x6c8] sm:$0xff] }
  0x22   : > { %v226_v38 = vld [vmem:[%s1374_s25 + $0x720] sm:$0xff]  ;;  %223 = vst [vmem:[%s1382_s26 + $0x120] sm:$0xff] %v222_v36  ;;  %225 = vst [vmem:[%s1382_s26 + $0x128] sm:$0xff] %v224_v37  ;;  %v228_v39 = vld [vmem:[%s1374_s25 + $0x728] sm:$0xff] }
  0x23   : > { %227 = vst [vmem:[%s1382_s26 + $0x130] sm:$0xff] %v226_v38  ;;  %v230_v40 = vld [vmem:[%s1374_s25 + $0x780] sm:$0xff]  ;;  %v232_v41 = vld [vmem:[%s1374_s25 + $0x788] sm:$0xff]  ;;  %229 = vst [vmem:[%s1382_s26 + $0x138] sm:$0xff] %v228_v39 }
  0x24   : > { %231 = vst [vmem:[%s1382_s26 + $0x140] sm:$0xff] %v230_v40  ;;  %233 = vst [vmem:[%s1382_s26 + $0x148] sm:$0xff] %v232_v41  ;;  %v234_v42 = vld [vmem:[%s1374_s25 + $0x7e0] sm:$0xff]  ;;  %v236_v43 = vld [vmem:[%s1374_s25 + $0x7e8] sm:$0xff] }
  0x25   : > { %v238_v44 = vld [vmem:[%s1374_s25 + $0x840] sm:$0xff]  ;;  %235 = vst [vmem:[%s1382_s26 + $0x150] sm:$0xff] %v234_v42  ;;  %237 = vst [vmem:[%s1382_s26 + $0x158] sm:$0xff] %v236_v43  ;;  %v240_v45 = vld [vmem:[%s1374_s25 + $0x848] sm:$0xff] }
  0x26   : > { %239 = vst [vmem:[%s1382_s26 + $0x160] sm:$0xff] %v238_v44  ;;  %v242_v46 = vld [vmem:[%s1374_s25 + $0x8a0] sm:$0xff]  ;;  %v244_v47 = vld [vmem:[%s1374_s25 + $0x8a8] sm:$0xff]  ;;  %241 = vst [vmem:[%s1382_s26 + $0x168] sm:$0xff] %v240_v45 }
  0x27   : > { %243 = vst [vmem:[%s1382_s26 + $0x170] sm:$0xff] %v242_v46  ;;  %245 = vst [vmem:[%s1382_s26 + $0x178] sm:$0xff] %v244_v47  ;;  %v246_v48 = vld [vmem:[%s1374_s25 + $0x900] sm:$0xff]  ;;  %v248_v49 = vld [vmem:[%s1374_s25 + $0x908] sm:$0xff] }
  0x28   : > { %v250_v50 = vld [vmem:[%s1374_s25 + $0x960] sm:$0xff]  ;;  %247 = vst [vmem:[%s1382_s26 + $0x180] sm:$0xff] %v246_v48  ;;  %249 = vst [vmem:[%s1382_s26 + $0x188] sm:$0xff] %v248_v49  ;;  %v252_v51 = vld [vmem:[%s1374_s25 + $0x968] sm:$0xff] }
  0x29   : > { %251 = vst [vmem:[%s1382_s26 + $0x190] sm:$0xff] %v250_v50  ;;  %v254_v52 = vld [vmem:[%s1374_s25 + $0x9c0] sm:$0xff]  ;;  %v256_v53 = vld [vmem:[%s1374_s25 + $0x9c8] sm:$0xff]  ;;  %253 = vst [vmem:[%s1382_s26 + $0x198] sm:$0xff] %v252_v51 }
  0x2a   : > { %255 = vst [vmem:[%s1382_s26 + $0x1a0] sm:$0xff] %v254_v52  ;;  %257 = vst [vmem:[%s1382_s26 + $0x1a8] sm:$0xff] %v256_v53  ;;  %v258_v54 = vld [vmem:[%s1374_s25 + $0xa20] sm:$0xff]  ;;  %v260_v55 = vld [vmem:[%s1374_s25 + $0xa28] sm:$0xff] }
  0x2b   : > { %v262_v56 = vld [vmem:[%s1374_s25 + $0xa80] sm:$0xff]  ;;  %259 = vst [vmem:[%s1382_s26 + $0x1b0] sm:$0xff] %v258_v54  ;;  %261 = vst [vmem:[%s1382_s26 + $0x1b8] sm:$0xff] %v260_v55  ;;  %v264_v57 = vld [vmem:[%s1374_s25 + $0xa88] sm:$0xff] }
  0x2c   : > { %263 = vst [vmem:[%s1382_s26 + $0x1c0] sm:$0xff] %v262_v56  ;;  %v266_v58 = vld [vmem:[%s1374_s25 + $0xae0] sm:$0xff]  ;;  %v268_v59 = vld [vmem:[%s1374_s25 + $0xae8] sm:$0xff]  ;;  %265 = vst [vmem:[%s1382_s26 + $0x1c8] sm:$0xff] %v264_v57 }
  0x2d   : > { %267 = vst [vmem:[%s1382_s26 + $0x1d0] sm:$0xff] %v266_v58  ;;  %269 = vst [vmem:[%s1382_s26 + $0x1d8] sm:$0xff] %v268_v59  ;;  %v270_v60 = vld [vmem:[%s1374_s25 + $0xb40] sm:$0xff]  ;;  %v272_v61 = vld [vmem:[%s1374_s25 + $0xb48] sm:$0xff] }
  0x2e   : > { %v274_v62 = vld [vmem:[%s1374_s25 + $0xba0] sm:$0xff]  ;;  %271 = vst [vmem:[%s1382_s26 + $0x1e0] sm:$0xff] %v270_v60  ;;  %273 = vst [vmem:[%s1382_s26 + $0x1e8] sm:$0xff] %v272_v61  ;;  %v276_v63 = vld [vmem:[%s1374_s25 + $0xba8] sm:$0xff] }
  0x2f   : > { %275 = vst [vmem:[%s1382_s26 + $0x1f0] sm:$0xff] %v274_v62  ;;  %v278_v0 = vld [vmem:[%s1374_s25 + $0xc00] sm:$0xff]  ;;  %v280_v1 = vld [vmem:[%s1374_s25 + $0xc08] sm:$0xff]  ;;  %277 = vst [vmem:[%s1382_s26 + $0x1f8] sm:$0xff] %v276_v63 }
  0x30   : > { %279 = vst [vmem:[%s1382_s26 + $0x200] sm:$0xff] %v278_v0  ;;  %281 = vst [vmem:[%s1382_s26 + $0x208] sm:$0xff] %v280_v1  ;;  %v282_v2 = vld [vmem:[%s1374_s25 + $0xc60] sm:$0xff]  ;;  %v284_v3 = vld [vmem:[%s1374_s25 + $0xc68] sm:$0xff] }
  0x31   : > { %v286_v4 = vld [vmem:[%s1374_s25 + $0xcc0] sm:$0xff]  ;;  %283 = vst [vmem:[%s1382_s26 + $0x210] sm:$0xff] %v282_v2  ;;  %285 = vst [vmem:[%s1382_s26 + $0x218] sm:$0xff] %v284_v3  ;;  %v288_v5 = vld [vmem:[%s1374_s25 + $0xcc8] sm:$0xff] }
  0x32   : > { %287 = vst [vmem:[%s1382_s26 + $0x220] sm:$0xff] %v286_v4  ;;  %v290_v6 = vld [vmem:[%s1374_s25 + $0xd20] sm:$0xff]  ;;  %v292_v7 = vld [vmem:[%s1374_s25 + $0xd28] sm:$0xff]  ;;  %289 = vst [vmem:[%s1382_s26 + $0x228] sm:$0xff] %v288_v5 }
  0x33   : > { %291 = vst [vmem:[%s1382_s26 + $0x230] sm:$0xff] %v290_v6  ;;  %293 = vst [vmem:[%s1382_s26 + $0x238] sm:$0xff] %v292_v7 }
  0x34 PF: > { %p1064_p5 = scmp.ge.s32.totalorder %s1316_s14, 1  ;;  %p298_p6 = scmp.lt.s32.totalorder %s1316_s14, 7 }
  0x36   : > { %p299_p7 = pnand %p1064_p5, %p298_p6 }
  0x37   : > { %s305_s27 = sand.u32 (!%p299_p7), 1, %s1308_s12   ;;  %s1065_s7 = sshll.u32 (!%p299_p7), %s1058_s15, 2 }
  0x38   : > { %302 = sbr.rel (%p299_p7) target bundleno = 360 (0x168), region = 51  ;;  %p330_p8 = scmp.lt.s32.totalorder (!%p299_p7), %s1065_s7, 23 }
  0x39   : > { %s1149_s28 = smul.u32 (!%p299_p7), 576, %s305_s27 }
  0x3b   : > { %s1533_s6 = scalar_lea.vmem (!%p299_p7), [#allocation2], %s1149_s28 }
  0x3d   : > { %v420_v8 = vlaneseq  ;;  %v1318_v9 = vmov 0   ;;  %v1319_v10 = vmov 1983009808   ;;  %v409_v12 = vld [vmem:[%s1637_s2] sm:$0xf]  ;;  %vm794_vm0 = vcmask 261120  }
  0x3e   : > { %871 = vmatprep.mubr.bf16.mxu1 %v1318_v9  ;;  %v418_v11 = vunpack.c.l.s4 %v1319_v10  ;;  %1176 = vset.pattern.permute.xlu0 %v1318_v9  ;;  %v336_v14 = vld [vmem:[%s1635_s0] sm:$0x3f]  ;;  %v1192_v30 = vld [vmem:[%s1533_s6 + $0xe8] ss:$16 sps:$4 sm:$0xff]   ;;  %v1194_v31 = vld [vmem:[%s1533_s6 + $0xec] ss:$16 sps:$4 sm:$0xff]  }
  0x3f   : > { %v421_v13 = vshrl.u32 %v420_v8, 7  ;;  %412 = vperm.xlu0 %1176, %v409_v12   ;;  %v1177_v16 = vld [vmem:[%s1533_s6 + $0xe4] ss:$16 sps:$4 sm:$0xff]   ;;  %v1181_v19 = vld [vmem:[%s1533_s6 + $0xe0] ss:$16 sps:$4 sm:$0xff]   ;;  %v416_v22 = vcombine.high %v336_v14, %v336_v14  ;;  %s1643_s7 = smov (!%p330_p8, %s1065_s7), 23 }
  0x40   : > { %v419_v15 = vunpack.c.0.s8 %v418_v11  ;;  %v1179_v17 = vld [vmem:[%s1533_s6 + $0x224] ss:$16 sps:$4 sm:$0xff]   ;;  %798 = vmatprep.subr.bf16.mxu0 %v1177_v16  ;;  %v1182_v20 = vld [vmem:[%s1533_s6 + $0x220] ss:$16 sps:$4 sm:$0xff]   ;;  %v1200_v34 = vld [vmem:[%s1533_s6 + $0xcc] ss:$16 sps:$4 sm:$0xff]  }
  0x41   : > { %851 = vmatprep.subr.bf16.mxu1 %v1179_v17  ;;  %v1183_v21 = vld [vmem:[%s1533_s6 + $0xc4] ss:$16 sps:$4 sm:$0xff]   ;;  %799 = vmatpush1.bf16.msra.mxu0 %v1181_v19  ;;  %v1187_v25 = vld [vmem:[%s1533_s6 + $0xc0] ss:$16 sps:$4 sm:$0xff]   ;;  %v1198_v35 = vld [vmem:[%s1533_s6 + $0xc8] ss:$16 sps:$4 sm:$0xff]  }
  0x42   : > { %v422_v18 = vsub.s32 %v419_v15, %v421_v13  ;;  %852 = vmatpush1.bf16.msra.mxu1 %v1182_v20  ;;  %v1185_v24 = vld [vmem:[%s1533_s6 + $0x204] ss:$16 sps:$4 sm:$0xff]   ;;  %800 = vmatprep.subr.bf16.mxu0 %v1183_v21  ;;  %v1188_v26 = vld [vmem:[%s1533_s6 + $0x200] ss:$16 sps:$4 sm:$0xff]   ;;  %v1206_v38 = vld [vmem:[%s1533_s6 + $0xac] ss:$16 sps:$4 sm:$0xff]  }
  0x43   : > { %853 = vmatprep.subr.bf16.mxu1 %v1185_v24  ;;  %v1189_v28 = vld [vmem:[%s1533_s6 + $0xa4] ss:$16 sps:$4 sm:$0xff]   ;;  %v1195_v32 = vld [vmem:[%s1533_s6 + $0xa0] ss:$16 sps:$4 sm:$0xff]   ;;  %v1204_v39 = vld [vmem:[%s1533_s6 + $0xa8] ss:$16 sps:$4 sm:$0xff]  }
  0x44   : > { %v1540_v23 = vrot.slane %v336_v14, %v422_v18  ;;  %v1548_v29 = vrot.slane %v416_v22, %v422_v18  ;;  %v1196_v33 = vld [vmem:[%s1533_s6 + $0x84] ss:$16 sps:$4 sm:$0xff]   ;;  %v1201_v36 = vld [vmem:[%s1533_s6 + $0x80] ss:$16 sps:$4 sm:$0xff]   ;;  %v1212_v42 = vld [vmem:[%s1533_s6 + $0x8c] ss:$16 sps:$4 sm:$0xff]  }
  0x45   : > { %801 = vmatpush1.bf16.msra.mxu0 %v1187_v25  ;;  %v1202_v37 = vld [vmem:[%s1533_s6 + $0x64] ss:$16 sps:$4 sm:$0xff]   ;;  %v1207_v40 = vld [vmem:[%s1533_s6 + $0x60] ss:$16 sps:$4 sm:$0xff]   ;;  %v1210_v43 = vld [vmem:[%s1533_s6 + $0x88] ss:$16 sps:$4 sm:$0xff]  }
  0x46   : > { %v431_v27 = vcombine.high %v1540_v23, %v1540_v23  ;;  %854 = vmatpush1.bf16.msra.mxu1 %v1188_v26  ;;  %802 = vmatprep.subr.bf16.mxu0 %v1189_v28  ;;  %v1208_v41 = vld [vmem:[%s1533_s6 + $0x44] ss:$16 sps:$4 sm:$0xff]   ;;  %v1213_v44 = vld [vmem:[%s1533_s6 + $0x40] ss:$16 sps:$4 sm:$0xff]   ;;  %v1218_v46 = vld [vmem:[%s1533_s6 + $0x6c] ss:$16 sps:$4 sm:$0xff]  }
  0x47   : > { %880 = vmatprep.subr.bf16.mxu1 %v1194_v31  ;;  %v1214_v45 = vld [vmem:[%s1533_s6 + $0x24] ss:$16 sps:$4 sm:$0xff]   ;;  %v1216_v47 = vld [vmem:[%s1533_s6 + $0x68] ss:$16 sps:$4 sm:$0xff]   ;;  %v1219_v48 = vld [vmem:[%s1533_s6 + $0x20] ss:$16 sps:$4 sm:$0xff]  }
  0x48   : > { %830 = vmatprep.mubr.bf16.mxu0 %v431_v27  ;;  %v1220_v49 = vld [vmem:[%s1533_s6 + $0x4] ss:$16 sps:$4 sm:$0xff]   ;;  %v1224_v50 = vld [vmem:[%s1533_s6 + $0x4c] ss:$16 sps:$4 sm:$0xff]   ;;  %v1222_v51 = vld [vmem:[%s1533_s6 + $0x48] ss:$16 sps:$4 sm:$0xff]  }
  0x49   : > { %1139 = vmatmul.mubr.msk.bf16.vlgmr.msra.gmra.mxu1 %vm794_vm0, %v1548_v29  ;;  %803 = vmatpush1.bf16.msra.mxu0 %v1195_v32  ;;  %v1225_v52 = vld [vmem:[%s1533_s6] ss:$16 sps:$4 sm:$0xff]   ;;  %v1226_v53 = vld [vmem:[%s1533_s6 + $0x1e4] ss:$16 sps:$4 sm:$0xff]   ;;  %v1230_v54 = vld [vmem:[%s1533_s6 + $0x2c] ss:$16 sps:$4 sm:$0xff]  }
  0x4a   : > { %881 = vmatpush1.bf16.msra.mxu1 %v1192_v30  ;;  %804 = vmatprep.subr.bf16.mxu0 %v1196_v33  ;;  %v1228_v55 = vld [vmem:[%s1533_s6 + $0x28] ss:$16 sps:$4 sm:$0xff]   ;;  %v1231_v56 = vld [vmem:[%s1533_s6 + $0x1e0] ss:$16 sps:$4 sm:$0xff]   ;;  %v1232_v57 = vld [vmem:[%s1533_s6 + $0x1c4] ss:$16 sps:$4 sm:$0xff]  }
  0x4b   : > { %882 = vmatprep.subr.bf16.mxu1 %v1200_v34  ;;  %912 = vmatprep.mubr.bf16.mxu1 %v431_v27  ;;  %v1236_v58 = vld [vmem:[%s1533_s6 + $0xc] ss:$16 sps:$4 sm:$0xff]   ;;  %v1234_v59 = vld [vmem:[%s1533_s6 + $0x8] ss:$16 sps:$4 sm:$0xff]   ;;  %v1237_v60 = vld [vmem:[%s1533_s6 + $0x1c0] ss:$16 sps:$4 sm:$0xff]  }
  0x4c   : > { %v1238_v61 = vld [vmem:[%s1533_s6 + $0x1a4] ss:$16 sps:$4 sm:$0xff]   ;;  %v1242_v62 = vld [vmem:[%s1533_s6 + $0x1ec] ss:$16 sps:$4 sm:$0xff]   ;;  %v1240_v63 = vld [vmem:[%s1533_s6 + $0x1e8] ss:$16 sps:$4 sm:$0xff]  }
  0x4d   : > { %805 = vmatpush1.bf16.msra.mxu0 %v1201_v36  ;;  %v1243_v0 = vld [vmem:[%s1533_s6 + $0x1a0] ss:$16 sps:$4 sm:$0xff]   ;;  %v1244_v1 = vld [vmem:[%s1533_s6 + $0x184] ss:$16 sps:$4 sm:$0xff]   ;;  %v1248_v2 = vld [vmem:[%s1533_s6 + $0x1cc] ss:$16 sps:$4 sm:$0xff]  }
  0x4e   : > { %883 = vmatpush1.bf16.msra.mxu1 %v1198_v35  ;;  %806 = vmatprep.subr.bf16.mxu0 %v1202_v37  ;;  %v1246_v3 = vld [vmem:[%s1533_s6 + $0x1c8] ss:$16 sps:$4 sm:$0xff]   ;;  %v1249_v4 = vld [vmem:[%s1533_s6 + $0x180] ss:$16 sps:$4 sm:$0xff]   ;;  %v1250_v5 = vld [vmem:[%s1533_s6 + $0x164] ss:$16 sps:$4 sm:$0xff]  }
  0x4f   : > { %884 = vmatprep.subr.bf16.mxu1 %v1206_v38  ;;  %v1254_v6 = vld [vmem:[%s1533_s6 + $0x1ac] ss:$16 sps:$4 sm:$0xff]   ;;  %v1252_v7 = vld [vmem:[%s1533_s6 + $0x1a8] ss:$16 sps:$4 sm:$0xff]   ;;  %v1255_v8 = vld [vmem:[%s1533_s6 + $0x160] ss:$16 sps:$4 sm:$0xff]  }
  0x50   : > { %v1256_v10 = vld [vmem:[%s1533_s6 + $0x144] ss:$16 sps:$4 sm:$0xff]   ;;  %v1260_v11 = vld [vmem:[%s1533_s6 + $0x18c] ss:$16 sps:$4 sm:$0xff]   ;;  %v1258_v12 = vld [vmem:[%s1533_s6 + $0x188] ss:$16 sps:$4 sm:$0xff]  }
  0x51   : > { %807 = vmatpush1.bf16.msra.mxu0 %v1207_v40  ;;  %v1261_v13 = vld [vmem:[%s1533_s6 + $0x140] ss:$16 sps:$4 sm:$0xff]   ;;  %v1262_v14 = vld [vmem:[%s1533_s6 + $0x124] ss:$16 sps:$4 sm:$0xff]   ;;  %v1266_v15 = vld [vmem:[%s1533_s6 + $0x16c] ss:$16 sps:$4 sm:$0xff]  }
  0x52   : > { %885 = vmatpush1.bf16.msra.mxu1 %v1204_v39  ;;  %808 = vmatprep.subr.bf16.mxu0 %v1208_v41  ;;  %v1264_v16 = vld [vmem:[%s1533_s6 + $0x168] ss:$16 sps:$4 sm:$0xff]   ;;  %v1267_v17 = vld [vmem:[%s1533_s6 + $0x120] ss:$16 sps:$4 sm:$0xff]   ;;  %v1268_v18 = vld [vmem:[%s1533_s6 + $0x104] ss:$16 sps:$4 sm:$0xff]  }
  0x53   : > { %886 = vmatprep.subr.bf16.mxu1 %v1212_v42  ;;  %v1272_v19 = vld [vmem:[%s1533_s6 + $0x14c] ss:$16 sps:$4 sm:$0xff]   ;;  %v1270_v20 = vld [vmem:[%s1533_s6 + $0x148] ss:$16 sps:$4 sm:$0xff]   ;;  %v1273_v21 = vld [vmem:[%s1533_s6 + $0x100] ss:$16 sps:$4 sm:$0xff]  }
  0x54   : > { %v1276_v22 = vld [vmem:[%s1533_s6 + $0x12c] ss:$16 sps:$4 sm:$0xff]   ;;  %v1274_v25 = vld [vmem:[%s1533_s6 + $0x128] ss:$16 sps:$4 sm:$0xff]   ;;  %s1066_s8 = sshll.u32 %s1643_s7, 2 }
  0x55   : > { %809 = vmatpush1.bf16.msra.mxu0 %v1213_v44  ;;  %v1279_v24 = vld [vmem:[%s1533_s6 + $0x22c] ss:$16 sps:$4 sm:$0xff]   ;;  %v1277_v26 = vld [vmem:[%s1533_s6 + $0x228] ss:$16 sps:$4 sm:$0xff]   ;;  %s333_s11 = scalar_lea.vmem %s1638_s3, %s1066_s8 }
  0x56   : > { %887 = vmatpush1.bf16.msra.mxu1 %v1210_v43  ;;  %810 = vmatprep.subr.bf16.mxu0 %v1214_v45  ;;  %v1282_v27 = vld [vmem:[%s1533_s6 + $0x10c] ss:$16 sps:$4 sm:$0xff]   ;;  %v1280_v30 = vld [vmem:[%s1533_s6 + $0x108] ss:$16 sps:$4 sm:$0xff]  }
  0x57   : > { %888 = vmatprep.subr.bf16.mxu1 %v1218_v46  ;;  %v1285_v28 = vld [vmem:[%s1533_s6 + $0x20c] ss:$16 sps:$4 sm:$0xff]   ;;  %v1283_v31 = vld [vmem:[%s1533_s6 + $0x208] ss:$16 sps:$4 sm:$0xff]  }
  0x59   : > { %811 = vmatpush1.bf16.msra.mxu0 %v1219_v48 }
  0x5a   : > { %889 = vmatpush1.bf16.msra.mxu1 %v1216_v47  ;;  %812 = vmatprep.subr.bf16.mxu0 %v1220_v49 }
  0x5b   : > { %890 = vmatprep.subr.bf16.mxu1 %v1224_v50 }
  0x5d   : > { %813 = vmatpush1.bf16.msra.mxu0 %v1225_v52 }
  0x5e   : > { %891 = vmatpush1.bf16.msra.mxu1 %v1222_v51  ;;  %814 = vmatprep.subr.bf16.mxu0 %v1226_v53 }
  0x5f   : > { %892 = vmatprep.subr.bf16.mxu1 %v1230_v54 }
  0x61   : > { %815 = vmatpush2.bf16.msra.mxu0 %v1231_v56 }
  0x62   : > { %893 = vmatpush1.bf16.msra.mxu1 %v1228_v55  ;;  %816 = vmatprep.subr.bf16.mxu0 %v1232_v57 }
  0x63   : > { %894 = vmatprep.subr.bf16.mxu1 %v1236_v58 }
  0x65   : > { %817 = vmatpush2.bf16.msra.mxu0 %v1237_v60 }
  0x66   : > { %895 = vmatpush1.bf16.msra.mxu1 %v1234_v59  ;;  %818 = vmatprep.subr.bf16.mxu0 %v1238_v61 }
  0x67   : > { %896 = vmatprep.subr.bf16.mxu1 %v1242_v62 }
  0x69   : > { %819 = vmatpush2.bf16.msra.mxu0 %v1243_v0 }
  0x6a   : > { %897 = vmatpush2.bf16.msra.mxu1 %v1240_v63  ;;  %820 = vmatprep.subr.bf16.mxu0 %v1244_v1 }
  0x6b   : > { %898 = vmatprep.subr.bf16.mxu1 %v1248_v2 }
  0x6d   : > { %821 = vmatpush2.bf16.msra.mxu0 %v1249_v4 }
  0x6e   : > { %899 = vmatpush2.bf16.msra.mxu1 %v1246_v3  ;;  %822 = vmatprep.subr.bf16.mxu0 %v1250_v5 }
  0x6f   : > { %900 = vmatprep.subr.bf16.mxu1 %v1254_v6 }
  0x71   : > { %823 = vmatpush2.bf16.msra.mxu0 %v1255_v8 }
  0x72   : > { %901 = vmatpush2.bf16.msra.mxu1 %v1252_v7  ;;  %824 = vmatprep.subr.bf16.mxu0 %v1256_v10 }
  0x73   : > { %902 = vmatprep.subr.bf16.mxu1 %v1260_v11 }
  0x75   : > { %825 = vmatpush2.bf16.msra.mxu0 %v1261_v13 }
  0x76   : > { %903 = vmatpush2.bf16.msra.mxu1 %v1258_v12  ;;  %826 = vmatprep.subr.bf16.mxu0 %v1262_v14 }
  0x77   : > { %904 = vmatprep.subr.bf16.mxu1 %v1266_v15 }
  0x79   : > { %827 = vmatpush2.bf16.msra.mxu0 %v1267_v17 }
  0x7a   : > { %905 = vmatpush2.bf16.msra.mxu1 %v1264_v16  ;;  %828 = vmatprep.subr.bf16.mxu0 %v1268_v18 }
  0x7b   : > { %906 = vmatprep.subr.bf16.mxu1 %v1272_v19 }
  0x7d   : > { %829 = vmatpush2.bf16.msra.mxu0 %v1273_v21 }
  0x7e   : > { %907 = vmatpush2.bf16.msra.mxu1 %v1270_v20  ;;  %933 = vmatprep.subr.bf16.mxu0 %v1279_v24 }
  0x7f   : > { %908 = vmatprep.subr.bf16.mxu1 %v1276_v22 }
  0x80   : > { %831 = vmatmul.mubr.bf16.vlgmr.msra.gmra.mxu0 %v1540_v23 }
  0x81   : > { %934 = vmatpush1.bf16.msra.mxu0 %v1277_v26  ;;  %953 = vmatprep.mubr.bf16.mxu0 %v1318_v9 }
  0x82   : > { %909 = vmatpush2.bf16.msra.mxu1 %v1274_v25  ;;  %935 = vmatprep.subr.bf16.mxu0 %v1285_v28 }
  0x83   : > { %910 = vmatprep.subr.bf16.mxu1 %v1282_v27 }
  0x85   : > { %936 = vmatpush1.bf16.msra.mxu0 %v1283_v31 }
  0x86   : > { %911 = vmatpush2.bf16.msra.mxu1 %v1280_v30 }
  0x88   : > { %1140 = vmatmul.mubr.msk.bf16.vlgmr.msra.gmra.mxu0 %vm794_vm0, %v1548_v29 }
  0x89   : > { %913 = vmatmul.mubr.bf16.vlgmr.msra.gmra.mxu1 %v1540_v23 }
  0xba   : > { %v413_v36 = vpop.permute.xlu0 %412 }
 0x109   : > { %v873_v32 = vpop.f32.mrf.mxu1 }
 0x10b   : > { %v875_v33 = vpop.f32.mrf.mxu1 }
 0x10d   : > { %v877_v34 = vpop.f32.mrf.mxu1 }
 0x10f   : > { %v878_v35 = vpop.f32.mrf.mxu1 }
 0x140   : > { %v832_v37 = vpop.f32.mrf.mxu0 }
 0x141   : > { %v833_v38 = vadd.f32 %v832_v37, %v413_v36 }
 0x142   : > { %v834_v39 = vpop.f32.mrf.mxu0 }
 0x143   : > { %v874_v40 = vadd.f32 %v873_v32, %v833_v38  ;;  %v835_v41 = vadd.f32 %v834_v39, %v413_v36 }
 0x144   : > { %v836_v42 = vpop.f32.mrf.mxu0 }
 0x145   : > { %v966_v43 = vmin.f32 %v874_v40, 0.0  ;;  %v876_v9 = vadd.f32 %v875_v33, %v835_v41  ;;  %vm962_vm1 = vcmp.gt.f32.partialorder %v874_v40, 0.0 }
 0x146   : > { %v837_v44 = vpop.f32.mrf.mxu0 }
 0x147   : > { %v970_v45 = vmul.f32 1.442695, %v966_v43  ;;  %v967_v23 = vmin.f32 %v876_v9, 0.0  ;;  %vm963_vm2 = vcmp.gt.f32.partialorder %v876_v9, 0.0 }
 0x148   : > { %v955_v47 = vpop.f32.mrf.mxu0 }
 0x149   : > { %v914_v46 = vpop.f32.mrf.mxu1  ;;  %1286 = vpow2.f32 %v970_v45  ;;  %v972_v29 = vmul.f32 1.442695, %v967_v23 }
 0x14a   : > { %v915_v48 = vadd.f32 %v914_v46, %v413_v36  ;;  %v957_v50 = vpop.f32.mrf.mxu0 }
 0x14b   : > { %v916_v49 = vpop.f32.mrf.mxu1  ;;  %1288 = vpow2.f32 %v972_v29 }
 0x14c   : > { %v956_v51 = vadd.f32 %v955_v47, %v915_v48  ;;  %v917_v52 = vadd.f32 %v916_v49, %v413_v36  ;;  %v959_v54 = vpop.f32.mrf.mxu0 }
 0x14d   : > { %v918_v53 = vpop.f32.mrf.mxu1 }
 0x14e   : > { %v968_v55 = vmin.f32 %v956_v51, 0.0  ;;  %v958_v56 = vadd.f32 %v957_v50, %v917_v52  ;;  %v960_v58 = vpop.f32.mrf.mxu0  ;;  %vm964_vm3 = vcmp.gt.f32.partialorder %v956_v51, 0.0 }
 0x14f   : > { %v919_v57 = vpop.f32.mrf.mxu1 }
 0x150   : > { %v974_v59 = vmul.f32 1.442695, %v968_v55  ;;  %v969_v60 = vmin.f32 %v958_v56, 0.0  ;;  %vm965_vm4 = vcmp.gt.f32.partialorder %v958_v56, 0.0 }
 0x152   : > { %1290 = vpow2.f32 %v974_v59  ;;  %v976_v61 = vmul.f32 1.442695, %v969_v60 }
 0x154   : > { %1292 = vpow2.f32 %v976_v61 }
 0x156   : > { %v1287_v62 = vpop.eup %1286 }
 0x157   : > { %v1141_v63 = vadd.f32 -1.0, %v1287_v62 }
 0x158   : > { %v1289_v0 = vpop.eup %1288 }
 0x159   : > { %v1142_v1 = vadd.f32 -1.0, %v1289_v0  ;;  %v982_v2 = vsel %vm962_vm1, %v874_v40, %v1141_v63 }
 0x15b   : > { %v983_v3 = vsel %vm963_vm2, %v876_v9, %v1142_v1 }
 0x15c   : > { %v990_v4 = vcombine.low %v982_v2, %v983_v3 }
 0x15e   : > { %994 = vst [vmem:[%s333_s11] sm:$0xff] %v990_v4 }
 0x15f   : > { %v1291_v5 = vpop.eup %1290 }
 0x160   : > { %v1143_v6 = vadd.f32 -1.0, %v1291_v5 }
 0x161   : > { %v1293_v7 = vpop.eup %1292 }
 0x162   : > { %v1144_v8 = vadd.f32 -1.0, %v1293_v7  ;;  %v984_v10 = vsel %vm964_vm3, %v956_v51, %v1143_v6 }
 0x164   : > { %v985_v11 = vsel %vm965_vm4, %v958_v56, %v1144_v8 }
 0x165   : > { %v991_v12 = vcombine.low %v984_v10, %v985_v11 }
 0x167   : > { %995 = vst [vmem:[%s333_s11 + $0x8] sm:$0xff] %v991_v12 }
 0x168 PF: > { %p10_p9 = scmp.ge.s32.totalorder %s1357_s16, 8   ;;  %s1639_s12 = smov %s1312_s13 }
 0x169   : > { %s1640_s13 = smov %s1366_s19  ;;  %s1641_s14 = smov %s1357_s16 }
 0x16a   :  { %12 = sbr.rel (!%p10_p9) target bundleno = 2 (0x2), region = 90 }

// kernel: stft_discriminator_forward.16
= control target key start
LH: loop header
LB: loop body
LE: loop exit
PB: predicated region body
PF: predicated region fallthrough
CT: control target
= control target key end

     0   :  { %s945_s21 = smov 0   ;;  %s947_s22 = smov 0   ;;  %s1022_s0 = inlined_call_operand.vmem [shape: bf16[8,48], index: 0, kind: input, shape index: {}]   ;;  %s1023_s1 = inlined_call_operand.vmem [shape: bf16[48,1536], index: 1, kind: input, shape index: {}]   ;;  %s1024_s2 = inlined_call_operand.vmem [shape: f32[8,1], index: 2, kind: input, shape index: {}]   ;;  %s1025_s3 = inlined_call_operand.vmem [shape: bf16[8,32], index: 3, kind: input, shape index: {}]   ;;  %s1026_s4 = inlined_call_operand.vmem [shape: bf16[32,1536], index: 4, kind: input, shape index: {}]   ;;  %s1027_s5 = inlined_call_operand.vmem [shape: f32[8,1], index: 5, kind: input, shape index: {}]   ;;  %s1028_s6 = inlined_call_operand.vmem [shape: f32[8,1536], index: 6, kind: output, shape index: {}]  }
   0x1   :  { %s949_s23 = smov 0  }
   0x2 LB: > { %s774_s24 = sadd.s32 4294967295, %s907_s23   ;;  %s962_s25 = sadd.s32 1, %s907_s23   ;;  %s907_s23 = sphi %s949_s23, %s1032_s23   ;;  %s903_s22 = sphi %s947_s22, %s1031_s22   ;;  %s899_s21 = sphi %s945_s21, %s1030_s21  }
   0x3   : > { %s41_s26 = ssub.s32 %s907_s23, %s962_s25  ;;  %s44_s27 = sadd.s32 1, %s903_s22 }
   0x4   : > { %p42_p0 = scmp.eq.s32.totalorder %s41_s26, 0  ;;  %p51_p1 = scmp.ne.s32.totalorder %s903_s22, %s899_s21 }
   0x5   : > { %p52_p2 = scmp.eq.s32.totalorder %s907_s23, 0  ;;  %p777_p4 = scmp.ge.s32.totalorder %s907_s23, 3 }
   0x6   : > { %s971_s28 = scalar_select %p42_p0, %s903_s22, %s44_s27  }
   0x7   : > { %p973_p3 = por %p52_p2, %p51_p1  ;;  %204 = sbr.rel (%p777_p4) target bundleno = 31 (0x1f), region = 32 }
   0xc   : > { %207 = sbr.rel (!%p973_p3) target bundleno = 23 (0x17), region = 36  ;;  %s209_s30 = sand.u32 (%p973_p3), 1, %s903_s22  }
   0xd   : > { %s817_s7 = sshll.u32 (%p973_p3), %s907_s23, 4  ;;  %s819_s8 = smul.u32 (%p973_p3), 96, %s209_s30 }
   0xe   : > { %s214_s11 = scalar_lea.vmem (%p973_p3), %s1023_s1, %s817_s7 }
   0xf   : > { %v227_v0 = vld [vmem:[%s214_s11] sm:$0xff] (%p973_p3)  ;;  %v229_v1 = vld [vmem:[%s214_s11 + $0x8] sm:$0xff] (%p973_p3)  ;;  %v231_v2 = vld [vmem:[%s214_s11 + $0x30] sm:$0xff] (%p973_p3)  ;;  %s211_s12 = scalar_lea.vmem (%p973_p3), [#allocation2], %s819_s8 }
  0x10   : > { %v233_v3 = vld [vmem:[%s214_s11 + $0x38] sm:$0xff] (%p973_p3)  ;;  %v235_v4 = vld [vmem:[%s214_s11 + $0x60] sm:$0xff] (%p973_p3)  ;;  %v237_v5 = vld [vmem:[%s214_s11 + $0x68] sm:$0xff] (%p973_p3)  ;;  %228 = vst [vmem:[%s211_s12] sm:$0xff] (%p973_p3), %v227_v0 }
  0x11   : > { %230 = vst [vmem:[%s211_s12 + $0x8] sm:$0xff] %v229_v1  ;;  %232 = vst [vmem:[%s211_s12 + $0x10] sm:$0xff] %v231_v2  ;;  %v239_v6 = vld [vmem:[%s214_s11 + $0x90] sm:$0xff]  ;;  %v241_v7 = vld [vmem:[%s214_s11 + $0x98] sm:$0xff] }
  0x12   : > { %234 = vst [vmem:[%s211_s12 + $0x18] sm:$0xff] %v233_v3  ;;  %236 = vst [vmem:[%s211_s12 + $0x20] sm:$0xff] %v235_v4  ;;  %v243_v8 = vld [vmem:[%s214_s11 + $0xc0] sm:$0xff]  ;;  %v245_v9 = vld [vmem:[%s214_s11 + $0xc8] sm:$0xff] }
  0x13   : > { %238 = vst [vmem:[%s211_s12 + $0x28] sm:$0xff] %v237_v5  ;;  %240 = vst [vmem:[%s211_s12 + $0x30] sm:$0xff] %v239_v6  ;;  %v247_v10 = vld [vmem:[%s214_s11 + $0xf0] sm:$0xff]  ;;  %v249_v11 = vld [vmem:[%s214_s11 + $0xf8] sm:$0xff] }
  0x14   : > { %242 = vst [vmem:[%s211_s12 + $0x38] sm:$0xff] %v241_v7  ;;  %244 = vst [vmem:[%s211_s12 + $0x40] sm:$0xff] %v243_v8 }
  0x15   : > { %246 = vst [vmem:[%s211_s12 + $0x48] sm:$0xff] %v245_v9  ;;  %248 = vst [vmem:[%s211_s12 + $0x50] sm:$0xff] %v247_v10 }
  0x16   : > { %250 = vst [vmem:[%s211_s12 + $0x58] sm:$0xff] %v249_v11 }
  0x17 PF: > { %256 = sbr.rel (!%p973_p3) target bundleno = 31 (0x1f), region = 59  ;;  %s258_s13 = sand.u32 (%p973_p3), 1, %s903_s22  }
  0x18   : > { %s818_s14 = sshll.u32 (%p973_p3), %s907_s23, 4  ;;  %s780_s15 = sshll.u32 (%p973_p3), %s258_s13, 6 }
  0x19   : > { %s263_s18 = scalar_lea.vmem (%p973_p3), %s1026_s4, %s818_s14  ;;  %s260_s19 = scalar_lea.vmem (%p973_p3), [#allocation3], %s780_s15 }
  0x1a   : > { %v276_v12 = vld [vmem:[%s263_s18] sm:$0xff] (%p973_p3)  ;;  %v278_v13 = vld [vmem:[%s263_s18 + $0x8] sm:$0xff] (%p973_p3)  ;;  %v280_v14 = vld [vmem:[%s263_s18 + $0x30] sm:$0xff] (%p973_p3) }
  0x1b   : > { %277 = vst [vmem:[%s260_s19] sm:$0xff] (%p973_p3), %v276_v12  ;;  %279 = vst [vmem:[%s260_s19 + $0x8] sm:$0xff] (%p973_p3), %v278_v13  ;;  %v282_v15 = vld [vmem:[%s263_s18 + $0x38] sm:$0xff] (%p973_p3)  ;;  %v284_v16 = vld [vmem:[%s263_s18 + $0x60] sm:$0xff] (%p973_p3) }
  0x1c   : > { %281 = vst [vmem:[%s260_s19 + $0x10] sm:$0xff] %v280_v14  ;;  %v286_v17 = vld [vmem:[%s263_s18 + $0x68] sm:$0xff]  ;;  %283 = vst [vmem:[%s260_s19 + $0x18] sm:$0xff] %v282_v15  ;;  %v288_v18 = vld [vmem:[%s263_s18 + $0x90] sm:$0xff] }
  0x1d   : > { %285 = vst [vmem:[%s260_s19 + $0x20] sm:$0xff] %v284_v16  ;;  %287 = vst [vmem:[%s260_s19 + $0x28] sm:$0xff] %v286_v17  ;;  %v290_v19 = vld [vmem:[%s263_s18 + $0x98] sm:$0xff] }
  0x1e   : > { %289 = vst [vmem:[%s260_s19 + $0x30] sm:$0xff] %v288_v18  ;;  %291 = vst [vmem:[%s260_s19 + $0x38] sm:$0xff] %v290_v19 }
  0x1f PF: > { %p783_p5 = scmp.ge.s32.totalorder %s907_s23, 1  ;;  %p296_p6 = scmp.lt.s32.totalorder %s907_s23, 4 }
  0x21   : > { %p297_p7 = pnand %p783_p5, %p296_p6 }
  0x22   : > { %s303_s20 = sand.u32 (!%p297_p7), 1, %s899_s21   ;;  %s785_s14 = sshll.u32 (!%p297_p7), %s774_s24, 2 }
  0x23   : > { %300 = sbr.rel (%p297_p7) target bundleno = 287 (0x11f), region = 82  ;;  %s784_s26 = sshll.u32 (!%p297_p7), %s303_s20, 6 }
  0x24   : > { %s820_s30 = smul.u32 (!%p297_p7), 96, %s303_s20  ;;  %s312_s7 = scalar_lea.vmem (!%p297_p7), [#allocation3], %s784_s26 }
  0x25   : > { %p346_p8 = scmp.lt.s32.totalorder (!%p297_p7), %s785_s14, 11 }
  0x26   : > { %s305_s21 = scalar_lea.vmem (!%p297_p7), [#allocation2], %s820_s30 }
  0x28   : > { %v909_v20 = vmov 0   ;;  %v646_v21 = vld [vmem:[%s1024_s2] sm:$0xff]  ;;  %v849_v24 = vld [vmem:[%s312_s7 + $0x2c] ss:$16 sps:$4 sm:$0xff]   ;;  %v852_v26 = vld [vmem:[%s312_s7 + $0x28] ss:$16 sps:$4 sm:$0xff]  }
  0x29   : > { %450 = vmatprep.mubr.bf16.mxu0 %v909_v20  ;;  %491 = vmatprep.mubr.bf16.mxu1 %v909_v20  ;;  %v847_v22 = vld [vmem:[%s312_s7 + $0x24] ss:$16 sps:$4 sm:$0xff]   ;;  %v851_v25 = vld [vmem:[%s312_s7 + $0x20] ss:$16 sps:$4 sm:$0xff]   ;;  %v855_v28 = vld [vmem:[%s312_s7 + $0xc] ss:$16 sps:$4 sm:$0xff]  }
  0x2a   : > { %846 = vset.pattern.permute.xlu0 %v909_v20  ;;  %v656_v23 = vld [vmem:[%s1027_s5] sm:$0xff]  ;;  %430 = vmatprep.subr.bf16.mxu0 %v847_v22  ;;  %v858_v30 = vld [vmem:[%s312_s7 + $0x8] ss:$16 sps:$4 sm:$0xff]   ;;  %v864_v34 = vld [vmem:[%s305_s21 + $0x4c] ss:$16 sps:$4 sm:$0xff]   ;;  %vm414_vm0 = vcmask 261120  }
  0x2b   : > { %649 = vperm.xlu0 %846, %v646_v21   ;;  %471 = vmatprep.subr.bf16.mxu1 %v849_v24  ;;  %v853_v27 = vld [vmem:[%s312_s7 + $0x4] ss:$16 sps:$4 sm:$0xff]   ;;  %v857_v29 = vld [vmem:[%s312_s7] ss:$16 sps:$4 sm:$0xff]   ;;  %v862_v35 = vld [vmem:[%s305_s21 + $0x48] ss:$16 sps:$4 sm:$0xff]  }
  0x2c   : > { %431 = vmatpush1.bf16.msra.mxu0 %v851_v25  ;;  %472 = vmatpush1.bf16.msra.mxu1 %v852_v26  ;;  %v365_v31 = vld [vmem:[%s1025_s3] sm:$0xf]  ;;  %v861_v32 = vld [vmem:[%s305_s21 + $0x44] ss:$16 sps:$4 sm:$0xff]   ;;  %v870_v37 = vld [vmem:[%s305_s21 + $0x2c] ss:$16 sps:$4 sm:$0xff]  }
  0x2d   : > { %432 = vmatprep.subr.bf16.mxu0 %v853_v27  ;;  %473 = vmatprep.subr.bf16.mxu1 %v855_v28  ;;  %v859_v33 = vld [vmem:[%s305_s21 + $0x40] ss:$16 sps:$4 sm:$0xff]   ;;  %v867_v36 = vld [vmem:[%s305_s21 + $0x24] ss:$16 sps:$4 sm:$0xff]   ;;  %v868_v39 = vld [vmem:[%s305_s21 + $0x28] ss:$16 sps:$4 sm:$0xff]  }
  0x2e   : > { %v865_v38 = vld [vmem:[%s305_s21 + $0x20] ss:$16 sps:$4 sm:$0xff]   ;;  %v873_v40 = vld [vmem:[%s305_s21 + $0x4] ss:$16 sps:$4 sm:$0xff]   ;;  %v876_v41 = vld [vmem:[%s305_s21 + $0xc] ss:$16 sps:$4 sm:$0xff]  }
  0x2f   : > { %659 = vperm.xlu0 %846, %v656_v23   ;;  %v871_v42 = vld [vmem:[%s305_s21] ss:$16 sps:$4 sm:$0xff]   ;;  %v874_v43 = vld [vmem:[%s305_s21 + $0x8] ss:$16 sps:$4 sm:$0xff]   ;;  %vm560_vm1 = vcmask 392192   ;;  %s1034_s14 = smov (!%p346_p8, %s785_s14), 11 }
  0x30   : > { %433 = vmatpush1.bf16.msra.mxu0 %v857_v29  ;;  %474 = vmatpush1.bf16.msra.mxu1 %v858_v30  ;;  %v352_v44 = vld [vmem:[%s1022_s0] sm:$0xf]  ;;  %s786_s15 = sshll.u32 %s1034_s14, 3 }
  0x31   : > { %574 = vmatprep.subr.bf16.mxu0 %v861_v32  ;;  %615 = vmatprep.subr.bf16.mxu1 %v864_v34  ;;  %s349_s18 = scalar_lea.vmem %s1028_s6, %s786_s15 }
  0x33   : > { %795 = vmatmul.mubr.msk.bf16.vlgmr.msra.gmra.mxu0 %vm414_vm0, %v365_v31  ;;  %796 = vmatmul.mubr.msk.bf16.vlgmr.msra.gmra.mxu1 %vm414_vm0, %v365_v31 }
  0x34   : > { %575 = vmatpush1.bf16.msra.mxu0 %v859_v33  ;;  %616 = vmatpush1.bf16.msra.mxu1 %v862_v35 }
  0x35   : > { %576 = vmatprep.subr.bf16.mxu0 %v867_v36  ;;  %617 = vmatprep.subr.bf16.mxu1 %v870_v37 }
  0x36   : > { %596 = vmatprep.mubr.bf16.mxu0 %v909_v20  ;;  %637 = vmatprep.mubr.bf16.mxu1 %v909_v20 }
  0x38   : > { %577 = vmatpush1.bf16.msra.mxu0 %v865_v38  ;;  %618 = vmatpush1.bf16.msra.mxu1 %v868_v39 }
  0x39   : > { %578 = vmatprep.subr.bf16.mxu0 %v873_v40  ;;  %619 = vmatprep.subr.bf16.mxu1 %v876_v41 }
  0x3c   : > { %579 = vmatpush1.bf16.msra.mxu0 %v871_v42  ;;  %620 = vmatpush1.bf16.msra.mxu1 %v874_v43 }
  0x3f   : > { %809 = vmatmul.mubr.msk.bf16.vlgmr.msra.gmra.mxu0 %vm560_vm1, %v352_v44  ;;  %810 = vmatmul.mubr.msk.bf16.vlgmr.msra.gmra.mxu1 %vm560_vm1, %v352_v44 }
  0xa6   : > { %v650_v53 = vpop.permute.xlu0 %649 }
  0xaa   : > { %v660_v62 = vpop.permute.xlu0 %659 }
  0xf3   : > { %v452_v45 = vpop.f32.mrf.mxu0  ;;  %v493_v46 = vpop.f32.mrf.mxu1 }
  0xf5   : > { %v454_v47 = vpop.f32.mrf.mxu0  ;;  %v495_v48 = vpop.f32.mrf.mxu1 }
  0xf7   : > { %v456_v49 = vpop.f32.mrf.mxu0  ;;  %v497_v50 = vpop.f32.mrf.mxu1 }
  0xf9   : > { %v457_v51 = vpop.f32.mrf.mxu0  ;;  %v498_v52 = vpop.f32.mrf.mxu1 }
  0xff   : > { %v598_v54 = vpop.f32.mrf.mxu0  ;;  %v639_v55 = vpop.f32.mrf.mxu1 }
 0x100   : > { %v599_v56 = vadd.f32 %v598_v54, %v452_v45  ;;  %v640_v57 = vadd.f32 %v639_v55, %v493_v46 }
 0x101   : > { %v600_v58 = vpop.f32.mrf.mxu0  ;;  %v641_v59 = vpop.f32.mrf.mxu1 }
 0x102   : > { %v652_v60 = vadd.f32 %v650_v53, %v599_v56  ;;  %v654_v61 = vadd.f32 %v650_v53, %v640_v57  ;;  %v601_v63 = vadd.f32 %v600_v58, %v454_v47  ;;  %v642_v0 = vadd.f32 %v641_v59, %v495_v48 }
 0x103   : > { %v602_v1 = vpop.f32.mrf.mxu0  ;;  %v643_v2 = vpop.f32.mrf.mxu1 }
 0x104   : > { %v662_v3 = vadd.f32 %v660_v62, %v652_v60  ;;  %v664_v4 = vadd.f32 %v660_v62, %v654_v61  ;;  %v653_v5 = vadd.f32 %v650_v53, %v601_v63  ;;  %v655_v6 = vadd.f32 %v650_v53, %v642_v0 }
 0x105   : > { %v603_v7 = vpop.f32.mrf.mxu0  ;;  %v644_v8 = vpop.f32.mrf.mxu1 }
 0x106   : > { %v670_v9 = vmin.f32 %v662_v3, 0.0  ;;  %v672_v10 = vmin.f32 %v664_v4, 0.0  ;;  %v663_v11 = vadd.f32 %v660_v62, %v653_v5  ;;  %v665_v12 = vadd.f32 %v660_v62, %v655_v6 }
 0x107   : > { %vm666_vm2 = vcmp.gt.f32.partialorder %v662_v3, 0.0  ;;  %vm668_vm3 = vcmp.gt.f32.partialorder %v664_v4, 0.0 }
 0x108   : > { %v674_v13 = vmul.f32 1.442695, %v670_v9  ;;  %v678_v14 = vmul.f32 1.442695, %v672_v10  ;;  %v671_v15 = vmin.f32 %v663_v11, 0.0  ;;  %v673_v16 = vmin.f32 %v665_v12, 0.0 }
 0x109   : > { %vm667_vm4 = vcmp.gt.f32.partialorder %v663_v11, 0.0  ;;  %vm669_vm5 = vcmp.gt.f32.partialorder %v665_v12, 0.0 }
 0x10a   : > { %877 = vpow2.f32 %v674_v13  ;;  %v676_v17 = vmul.f32 1.442695, %v671_v15  ;;  %v680_v18 = vmul.f32 1.442695, %v673_v16 }
 0x10b   : > { %879 = vpow2.f32 %v678_v14 }
 0x10c   : > { %881 = vpow2.f32 %v676_v17 }
 0x10d   : > { %883 = vpow2.f32 %v680_v18 }
 0x117   : > { %v878_v19 = vpop.eup %877 }
 0x118   : > { %v880_v20 = vpop.eup %879  ;;  %v811_v21 = vadd.f32 -1.0, %v878_v19 }
 0x119   : > { %v813_v22 = vadd.f32 -1.0, %v880_v20  ;;  %v882_v23 = vpop.eup %881 }
 0x11a   : > { %v686_v24 = vsel %vm666_vm2, %v662_v3, %v811_v21  ;;  %v884_v25 = vpop.eup %883  ;;  %v812_v27 = vadd.f32 -1.0, %v882_v23 }
 0x11b   : > { %v688_v26 = vsel %vm668_vm3, %v664_v4, %v813_v22  ;;  %690 = vst [vmem:[%s349_s18] sm:$0xff] %v686_v24  ;;  %v814_v28 = vadd.f32 -1.0, %v884_v25 }
 0x11c   : > { %692 = vst [vmem:[%s349_s18 + $0x10] sm:$0xff] %v688_v26  ;;  %v687_v29 = vsel %vm667_vm4, %v663_v11, %v812_v27 }
 0x11d   : > { %691 = vst [vmem:[%s349_s18 + $0x8] sm:$0xff] %v687_v29  ;;  %v689_v30 = vsel %vm669_vm5, %v665_v12, %v814_v28 }
 0x11e   : > { %693 = vst [vmem:[%s349_s18 + $0x18] sm:$0xff] %v689_v30 }
 0x11f PF: > { %p13_p9 = scmp.ge.s32.totalorder %s962_s25, 5   ;;  %s1030_s21 = smov %s903_s22 }
 0x120   : > { %s1031_s22 = smov %s971_s28  ;;  %s1032_s23 = smov %s962_s25 }
 0x121   :  { %15 = sbr.rel (!%p13_p9) target bundleno = 2 (0x2), region = 133 }

// kernel: stft_discriminator_forward.17
= control target key start
LH: loop header
LB: loop body
LE: loop exit
PB: predicated region body
PF: predicated region fallthrough
CT: control target
= control target key end

     0   :  { %s684_s12 = smov 0   ;;  %s686_s13 = smov 0   ;;  %s808_s0 = inlined_call_operand.vmem [shape: bf16[8,80], index: 0, kind: input, shape index: {}]   ;;  %s809_s1 = inlined_call_operand.vmem [shape: bf16[80,2048], index: 1, kind: input, shape index: {}]   ;;  %s810_s2 = inlined_call_operand.vmem [shape: f32[8,1], index: 2, kind: input, shape index: {}]   ;;  %s811_s3 = inlined_call_operand.vmem [shape: f32[8,2048], index: 3, kind: output, shape index: {}]  }
   0x1   :  { %s688_s14 = smov 0  }
   0x2 LB: > { %s535_s15 = sadd.s32 4294967295, %s661_s14   ;;  %s701_s16 = sadd.s32 1, %s661_s14   ;;  %s661_s14 = sphi %s688_s14, %s814_s14   ;;  %s657_s13 = sphi %s686_s13, %s813_s13   ;;  %s653_s12 = sphi %s684_s12, %s812_s12  }
   0x3   : > { %s38_s17 = ssub.s32 %s661_s14, %s701_s16  ;;  %s41_s18 = sadd.s32 1, %s657_s13 }
   0x4   : > { %p39_p0 = scmp.eq.s32.totalorder %s38_s17, 0  ;;  %p48_p1 = scmp.ne.s32.totalorder %s657_s13, %s653_s12 }
   0x5   : > { %p49_p2 = scmp.eq.s32.totalorder %s661_s14, 0  ;;  %p538_p4 = scmp.ge.s32.totalorder %s661_s14, 4 }
   0x6   : > { %s710_s19 = scalar_select %p39_p0, %s657_s13, %s41_s18  }
   0x7   : > { %p50_p3 = por %p49_p2, %p48_p1  ;;  %127 = sbr.rel (%p538_p4) target bundleno = 26 (0x1a), region = 24 }
   0xc   : > { %130 = sbr.rel (!%p50_p3) target bundleno = 26 (0x1a), region = 28  ;;  %s132_s20 = sand.u32 (%p50_p3), 1, %s657_s13  }
   0xd   : > { %s572_s21 = sshll.u32 (%p50_p3), %s661_s14, 4  ;;  %s573_s22 = smul.u32 (%p50_p3), 160, %s132_s20 }
   0xe   : > { %s718_s25 = scalar_lea.vmem (%p50_p3), %s809_s1, %s572_s21 }
   0xf   : > { %v150_v0 = vld [vmem:[%s718_s25] sm:$0xff] (%p50_p3)  ;;  %v152_v1 = vld [vmem:[%s718_s25 + $0x8] sm:$0xff] (%p50_p3)  ;;  %s726_s26 = scalar_lea.vmem (%p50_p3), [#allocation2], %s573_s22 }
  0x10   : > { %v154_v2 = vld [vmem:[%s718_s25 + $0x40] sm:$0xff] (%p50_p3)  ;;  %v156_v3 = vld [vmem:[%s718_s25 + $0x48] sm:$0xff] (%p50_p3)  ;;  %151 = vst [vmem:[%s726_s26] sm:$0xff] (%p50_p3), %v150_v0  ;;  %153 = vst [vmem:[%s726_s26 + $0x8] sm:$0xff] (%p50_p3), %v152_v1 }
  0x11   : > { %v158_v4 = vld [vmem:[%s718_s25 + $0x80] sm:$0xff]  ;;  %v160_v5 = vld [vmem:[%s718_s25 + $0x88] sm:$0xff]  ;;  %155 = vst [vmem:[%s726_s26 + $0x10] sm:$0xff] %v154_v2  ;;  %157 = vst [vmem:[%s726_s26 + $0x18] sm:$0xff] %v156_v3 }
  0x12   : > { %159 = vst [vmem:[%s726_s26 + $0x20] sm:$0xff] %v158_v4  ;;  %161 = vst [vmem:[%s726_s26 + $0x28] sm:$0xff] %v160_v5  ;;  %v162_v6 = vld [vmem:[%s718_s25 + $0xc0] sm:$0xff]  ;;  %v164_v7 = vld [vmem:[%s718_s25 + $0xc8] sm:$0xff] }
  0x13   : > { %v166_v8 = vld [vmem:[%s718_s25 + $0x100] sm:$0xff]  ;;  %163 = vst [vmem:[%s726_s26 + $0x30] sm:$0xff] %v162_v6  ;;  %165 = vst [vmem:[%s726_s26 + $0x38] sm:$0xff] %v164_v7  ;;  %v168_v9 = vld [vmem:[%s718_s25 + $0x108] sm:$0xff] }
  0x14   : > { %167 = vst [vmem:[%s726_s26 + $0x40] sm:$0xff] %v166_v8  ;;  %v170_v10 = vld [vmem:[%s718_s25 + $0x140] sm:$0xff]  ;;  %v172_v11 = vld [vmem:[%s718_s25 + $0x148] sm:$0xff]  ;;  %169 = vst [vmem:[%s726_s26 + $0x48] sm:$0xff] %v168_v9 }
  0x15   : > { %171 = vst [vmem:[%s726_s26 + $0x50] sm:$0xff] %v170_v10  ;;  %173 = vst [vmem:[%s726_s26 + $0x58] sm:$0xff] %v172_v11  ;;  %v174_v12 = vld [vmem:[%s718_s25 + $0x180] sm:$0xff]  ;;  %v176_v13 = vld [vmem:[%s718_s25 + $0x188] sm:$0xff] }
  0x16   : > { %v178_v14 = vld [vmem:[%s718_s25 + $0x1c0] sm:$0xff]  ;;  %175 = vst [vmem:[%s726_s26 + $0x60] sm:$0xff] %v174_v12  ;;  %177 = vst [vmem:[%s726_s26 + $0x68] sm:$0xff] %v176_v13  ;;  %v180_v15 = vld [vmem:[%s718_s25 + $0x1c8] sm:$0xff] }
  0x17   : > { %179 = vst [vmem:[%s726_s26 + $0x70] sm:$0xff] %v178_v14  ;;  %v182_v16 = vld [vmem:[%s718_s25 + $0x200] sm:$0xff]  ;;  %v184_v17 = vld [vmem:[%s718_s25 + $0x208] sm:$0xff]  ;;  %181 = vst [vmem:[%s726_s26 + $0x78] sm:$0xff] %v180_v15 }
  0x18   : > { %183 = vst [vmem:[%s726_s26 + $0x80] sm:$0xff] %v182_v16  ;;  %185 = vst [vmem:[%s726_s26 + $0x88] sm:$0xff] %v184_v17  ;;  %v186_v18 = vld [vmem:[%s718_s25 + $0x240] sm:$0xff]  ;;  %v188_v19 = vld [vmem:[%s718_s25 + $0x248] sm:$0xff] }
  0x19   : > { %187 = vst [vmem:[%s726_s26 + $0x90] sm:$0xff] %v186_v18  ;;  %189 = vst [vmem:[%s726_s26 + $0x98] sm:$0xff] %v188_v19 }
  0x1a PF: > { %p541_p5 = scmp.ge.s32.totalorder %s661_s14, 1  ;;  %p194_p6 = scmp.lt.s32.totalorder %s661_s14, 5 }
  0x1c   : > { %p195_p7 = pnand %p541_p5, %p194_p6 }
  0x1d   : > { %s201_s27 = sand.u32 (!%p195_p7), 1, %s653_s12   ;;  %s542_s7 = sshll.u32 (!%p195_p7), %s535_s15, 2 }
  0x1e   : > { %198 = sbr.rel (%p195_p7) target bundleno = 278 (0x116), region = 51  ;;  %p226_p8 = scmp.lt.s32.totalorder (!%p195_p7), %s542_s7, 15 }
  0x1f   : > { %s574_s30 = smul.u32 (!%p195_p7), 160, %s201_s27 }
  0x21   : > { %s768_s4 = scalar_lea.vmem (!%p195_p7), [#allocation2], %s574_s30 }
  0x23   : > { %v253_v20 = vld [vmem:[%s810_s2] sm:$0xff]  ;;  %v663_v21 = vmov 0   ;;  %v603_v23 = vld [vmem:[%s768_s4 + $0x8c] ss:$16 sps:$4 sm:$0xff]   ;;  %v606_v25 = vld [vmem:[%s768_s4 + $0x88] ss:$16 sps:$4 sm:$0xff]  }
  0x24   : > { %395 = vmatprep.mubr.bf16.mxu0 %v663_v21  ;;  %436 = vmatprep.mubr.bf16.mxu1 %v663_v21  ;;  %v601_v22 = vld [vmem:[%s768_s4 + $0x84] ss:$16 sps:$4 sm:$0xff]   ;;  %v605_v24 = vld [vmem:[%s768_s4 + $0x80] ss:$16 sps:$4 sm:$0xff]   ;;  %v609_v27 = vld [vmem:[%s768_s4 + $0x6c] ss:$16 sps:$4 sm:$0xff]  }
  0x25   : > { %600 = vset.pattern.permute.xlu0 %v663_v21  ;;  %369 = vmatprep.subr.bf16.mxu0 %v601_v22  ;;  %v607_v26 = vld [vmem:[%s768_s4 + $0x64] ss:$16 sps:$4 sm:$0xff]   ;;  %v611_v28 = vld [vmem:[%s768_s4 + $0x60] ss:$16 sps:$4 sm:$0xff]   ;;  %v612_v29 = vld [vmem:[%s768_s4 + $0x68] ss:$16 sps:$4 sm:$0xff]  }
  0x26   : > { %256 = vperm.xlu0 %600, %v253_v20   ;;  %410 = vmatprep.subr.bf16.mxu1 %v603_v23  ;;  %v613_v30 = vld [vmem:[%s768_s4 + $0x44] ss:$16 sps:$4 sm:$0xff]   ;;  %v615_v31 = vld [vmem:[%s768_s4 + $0x4c] ss:$16 sps:$4 sm:$0xff]   ;;  %v617_v32 = vld [vmem:[%s768_s4 + $0x40] ss:$16 sps:$4 sm:$0xff]  }
  0x27   : > { %370 = vmatpush1.bf16.msra.mxu0 %v605_v24  ;;  %411 = vmatpush1.bf16.msra.mxu1 %v606_v25  ;;  %v618_v33 = vld [vmem:[%s768_s4 + $0x48] ss:$16 sps:$4 sm:$0xff]   ;;  %v619_v34 = vld [vmem:[%s768_s4 + $0x24] ss:$16 sps:$4 sm:$0xff]   ;;  %v621_v35 = vld [vmem:[%s768_s4 + $0x2c] ss:$16 sps:$4 sm:$0xff]  }
  0x28   : > { %371 = vmatprep.subr.bf16.mxu0 %v607_v26  ;;  %412 = vmatprep.subr.bf16.mxu1 %v609_v27  ;;  %v623_v36 = vld [vmem:[%s768_s4 + $0x20] ss:$16 sps:$4 sm:$0xff]   ;;  %v624_v37 = vld [vmem:[%s768_s4 + $0x28] ss:$16 sps:$4 sm:$0xff]   ;;  %v625_v38 = vld [vmem:[%s768_s4 + $0x4] ss:$16 sps:$4 sm:$0xff]  }
  0x29   : > { %v627_v39 = vld [vmem:[%s768_s4 + $0xc] ss:$16 sps:$4 sm:$0xff]   ;;  %v629_v40 = vld [vmem:[%s768_s4] ss:$16 sps:$4 sm:$0xff]   ;;  %v630_v41 = vld [vmem:[%s768_s4 + $0x8] ss:$16 sps:$4 sm:$0xff]  }
  0x2a   : > { %v232_v42 = vld [vmem:[%s808_s0] sm:$0xf]  ;;  %vm359_vm0 = vcmask 654336   ;;  %s816_s7 = smov (!%p226_p8, %s542_s7), 15 }
  0x2b   : > { %372 = vmatpush1.bf16.msra.mxu0 %v611_v28  ;;  %413 = vmatpush1.bf16.msra.mxu1 %v612_v29  ;;  %s543_s8 = sshll.u32 %s816_s7, 3 }
  0x2c   : > { %373 = vmatprep.subr.bf16.mxu0 %v613_v30  ;;  %414 = vmatprep.subr.bf16.mxu1 %v615_v31  ;;  %s229_s11 = scalar_lea.vmem %s811_s3, %s543_s8 }
  0x2f   : > { %374 = vmatpush1.bf16.msra.mxu0 %v617_v32  ;;  %415 = vmatpush1.bf16.msra.mxu1 %v618_v33 }
  0x30   : > { %375 = vmatprep.subr.bf16.mxu0 %v619_v34  ;;  %416 = vmatprep.subr.bf16.mxu1 %v621_v35 }
  0x33   : > { %376 = vmatpush1.bf16.msra.mxu0 %v623_v36  ;;  %417 = vmatpush1.bf16.msra.mxu1 %v624_v37 }
  0x34   : > { %377 = vmatprep.subr.bf16.mxu0 %v625_v38  ;;  %418 = vmatprep.subr.bf16.mxu1 %v627_v39 }
  0x37   : > { %378 = vmatpush1.bf16.msra.mxu0 %v629_v40  ;;  %419 = vmatpush1.bf16.msra.mxu1 %v630_v41 }
  0x3a   : > { %564 = vmatmul.mubr.msk.bf16.vlgmr.msra.gmra.mxu0 %vm359_vm0, %v232_v42  ;;  %565 = vmatmul.mubr.msk.bf16.vlgmr.msra.gmra.mxu1 %vm359_vm0, %v232_v42 }
  0xa1   : > { %v257_v43 = vpop.permute.xlu0 %256 }
  0xfa   : > { %v397_v44 = vpop.f32.mrf.mxu0  ;;  %v438_v45 = vpop.f32.mrf.mxu1 }
  0xfb   : > { %v398_v46 = vadd.f32 %v397_v44, %v257_v43  ;;  %v439_v47 = vadd.f32 %v438_v45, %v257_v43 }
  0xfc   : > { %v399_v48 = vpop.f32.mrf.mxu0  ;;  %v440_v49 = vpop.f32.mrf.mxu1 }
  0xfd   : > { %v449_v50 = vmin.f32 %v398_v46, 0.0  ;;  %v451_v51 = vmin.f32 %v439_v47, 0.0  ;;  %v400_v52 = vadd.f32 %v399_v48, %v257_v43  ;;  %v441_v53 = vadd.f32 %v440_v49, %v257_v43 }
  0xfe   : > { %v401_v54 = vpop.f32.mrf.mxu0  ;;  %v442_v55 = vpop.f32.mrf.mxu1  ;;  %vm445_vm1 = vcmp.gt.f32.partialorder %v398_v46, 0.0  ;;  %vm447_vm2 = vcmp.gt.f32.partialorder %v439_v47, 0.0 }
  0xff   : > { %v453_v56 = vmul.f32 1.442695, %v449_v50  ;;  %v457_v57 = vmul.f32 1.442695, %v451_v51  ;;  %v450_v58 = vmin.f32 %v400_v52, 0.0  ;;  %v452_v59 = vmin.f32 %v441_v53, 0.0 }
 0x100   : > { %v402_v60 = vpop.f32.mrf.mxu0  ;;  %v443_v61 = vpop.f32.mrf.mxu1  ;;  %vm446_vm3 = vcmp.gt.f32.partialorder %v400_v52, 0.0  ;;  %vm448_vm4 = vcmp.gt.f32.partialorder %v441_v53, 0.0 }
 0x101   : > { %631 = vpow2.f32 %v453_v56  ;;  %v455_v62 = vmul.f32 1.442695, %v450_v58  ;;  %v459_v63 = vmul.f32 1.442695, %v452_v59 }
 0x102   : > { %633 = vpow2.f32 %v457_v57 }
 0x103   : > { %635 = vpow2.f32 %v455_v62 }
 0x104   : > { %637 = vpow2.f32 %v459_v63 }
 0x10e   : > { %v632_v0 = vpop.eup %631 }
 0x10f   : > { %v634_v1 = vpop.eup %633  ;;  %v566_v2 = vadd.f32 -1.0, %v632_v0 }
 0x110   : > { %v568_v3 = vadd.f32 -1.0, %v634_v1  ;;  %v636_v4 = vpop.eup %635 }
 0x111   : > { %v465_v5 = vsel %vm445_vm1, %v398_v46, %v566_v2  ;;  %v638_v6 = vpop.eup %637  ;;  %v567_v8 = vadd.f32 -1.0, %v636_v4 }
 0x112   : > { %469 = vst [vmem:[%s229_s11] sm:$0xff] %v465_v5  ;;  %v467_v7 = vsel %vm447_vm2, %v439_v47, %v568_v3  ;;  %v569_v9 = vadd.f32 -1.0, %v638_v6 }
 0x113   : > { %471 = vst [vmem:[%s229_s11 + $0x10] sm:$0xff] %v467_v7  ;;  %v466_v10 = vsel %vm446_vm3, %v400_v52, %v567_v8 }
 0x114   : > { %470 = vst [vmem:[%s229_s11 + $0x8] sm:$0xff] %v466_v10  ;;  %v468_v11 = vsel %vm448_vm4, %v441_v53, %v569_v9 }
 0x115   : > { %472 = vst [vmem:[%s229_s11 + $0x18] sm:$0xff] %v468_v11 }
 0x116 PF: > { %p10_p9 = scmp.ge.s32.totalorder %s701_s16, 6   ;;  %s812_s12 = smov %s657_s13 }
 0x117   : > { %s813_s13 = smov %s710_s19  ;;  %s814_s14 = smov %s701_s16 }
 0x118   :  { %12 = sbr.rel (!%p10_p9) target bundleno = 2 (0x2), region = 90 }

// kernel: stft_discriminator_forward.18
= control target key start
LH: loop header
LB: loop body
LE: loop exit
PB: predicated region body
PF: predicated region fallthrough
CT: control target
= control target key end

     0   :  { %v602_v0 = vmov 0.0   ;;  %vm603_vm0 = vmmov 0   ;;  %v604_v3 = vmov 0   ;;  %vm85_vm1 = vcmask 130048   ;;  %s770_s4 = inlined_call_operand.vmem [shape: bf16[16,384], index: 4, kind: input, shape index: {}]   ;;  %s771_s3 = inlined_call_operand.vmem [shape: bf16[16,16], index: 3, kind: input, shape index: {}]   ;;  %s772_s1 = inlined_call_operand.vmem [shape: bf16[128,384], index: 1, kind: input, shape index: {}]   ;;  %s773_s2 = inlined_call_operand.vmem [shape: f32[16,1], index: 2, kind: input, shape index: {}]   ;;  %s774_s5 = inlined_call_operand.vmem [shape: f32[16,1], index: 5, kind: input, shape index: {}]   ;;  %s775_s0 = inlined_call_operand.vmem [shape: bf16[16,128], index: 0, kind: input, shape index: {}]   ;;  %s776_s6 = inlined_call_operand.vmem [shape: f32[16,384], index: 6, kind: output, shape index: {}]  }
   0x1   :  { %521 = vmatprep.subr.bf16.mxu1 %v602_v0  ;;  %v552_v1 = vld [vmem:[%s770_s4 + $0x4] ss:$12 sps:$4 sm:$0xff]   ;;  %523 = vmatprep.mubr.msk.bf16.mxu1 %vm603_vm0, %v602_v0  ;;  %v554_v2 = vld [vmem:[%s770_s4 + $0x8] ss:$12 sps:$4 sm:$0xff]   ;;  %v555_v4 = vld [vmem:[%s770_s4] ss:$12 sps:$4 sm:$0xff]  }
   0x2   :  { %121 = vmatprep.mubr.bf16.mxu0 %v604_v3  ;;  %550 = vset.pattern.permute.xlu0 %v604_v3  ;;  %v556_v5 = vld [vmem:[%s771_s3] sm:$0xff]   ;;  %v557_v6 = vld [vmem:[%s772_s1 + $0xa8] ss:$12 sps:$4 sm:$0xff]   ;;  %v559_v7 = vld [vmem:[%s772_s1 + $0xac] ss:$12 sps:$4 sm:$0xff]  }
   0x3   :  { %103 = vmatprep.subr.bf16.mxu0 %v552_v1  ;;  %551 = vset.pattern.permute.xlu1 %v604_v3  ;;  %v560_v8 = vld [vmem:[%s772_s1 + $0xb0] ss:$12 sps:$4 sm:$0xff]   ;;  %v563_v9 = vld [vmem:[%s772_s1 + $0x94] ss:$12 sps:$4 sm:$0xff]   ;;  %v564_v10 = vld [vmem:[%s772_s1 + $0x98] ss:$12 sps:$4 sm:$0xff]  }
   0x4   :  { %522 = vmatpush3.bf16.msra.mxu1 %v554_v2  ;;  %104 = vmatpush1.bf16.msra.mxu0 %v555_v4  ;;  %v561_v11 = vld [vmem:[%s772_s1 + $0x90] ss:$12 sps:$4 sm:$0xff]   ;;  %v568_v13 = vld [vmem:[%s772_s1 + $0x80] ss:$12 sps:$4 sm:$0xff]   ;;  %v565_v14 = vld [vmem:[%s772_s1 + $0x78] ss:$12 sps:$4 sm:$0xff]  }
   0x5   :  { %527 = vmatprep.subr.bf16.mxu1 %v602_v0  ;;  %307 = vmatprep.subr.bf16.mxu0 %v559_v7  ;;  %v567_v12 = vld [vmem:[%s772_s1 + $0x7c] ss:$12 sps:$4 sm:$0xff]   ;;  %v571_v15 = vld [vmem:[%s772_s1 + $0x64] ss:$12 sps:$4 sm:$0xff]   ;;  %v569_v17 = vld [vmem:[%s772_s1 + $0x60] ss:$12 sps:$4 sm:$0xff]  }
   0x6   :  { %v572_v16 = vld [vmem:[%s772_s1 + $0x68] ss:$12 sps:$4 sm:$0xff]   ;;  %v575_v18 = vld [vmem:[%s772_s1 + $0x4c] ss:$12 sps:$4 sm:$0xff]   ;;  %v576_v19 = vld [vmem:[%s772_s1 + $0x50] ss:$12 sps:$4 sm:$0xff]  }
   0x7   :  { %524 = vmatmul.mubr.msk.bf16.vlgmr.msra.gmra.mxu1 %vm85_vm1, %v556_v5  ;;  %477 = vmatmul.mubr.msk.bf16.vlgmr.msra.gmra.mxu0 %vm85_vm1, %v556_v5  ;;  %v573_v20 = vld [vmem:[%s772_s1 + $0x48] ss:$12 sps:$4 sm:$0xff]   ;;  %v580_v22 = vld [vmem:[%s772_s1 + $0x38] ss:$12 sps:$4 sm:$0xff]   ;;  %v577_v25 = vld [vmem:[%s772_s1 + $0x30] ss:$12 sps:$4 sm:$0xff]  }
   0x8   :  { %528 = vmatpush3.bf16.msra.mxu1 %v560_v8  ;;  %308 = vmatpush1.bf16.msra.mxu0 %v557_v6  ;;  %v579_v21 = vld [vmem:[%s772_s1 + $0x34] ss:$12 sps:$4 sm:$0xff]   ;;  %v583_v26 = vld [vmem:[%s772_s1 + $0x1c] ss:$12 sps:$4 sm:$0xff]   ;;  %v581_v30 = vld [vmem:[%s772_s1 + $0x18] ss:$12 sps:$4 sm:$0xff]  }
   0x9   :  { %529 = vmatprep.subr.bf16.mxu1 %v602_v0  ;;  %309 = vmatprep.subr.bf16.mxu0 %v563_v9  ;;  %v391_v23 = vld [vmem:[%s773_s2] sm:$0xff]  ;;  %v392_v27 = vld [vmem:[%s773_s2 + $0x8] sm:$0xff] }
   0xa   :  { %543 = vmatprep.mubr.msk.bf16.mxu1 %vm603_vm0, %v602_v0  ;;  %339 = vmatprep.mubr.bf16.mxu0 %v604_v3  ;;  %v409_v24 = vld [vmem:[%s774_s5] sm:$0xff]  ;;  %v410_v29 = vld [vmem:[%s774_s5 + $0x8] sm:$0xff] }
   0xb   :  { %395 = vperm.xlu0 %550, %v391_v23   ;;  %413 = vperm.xlu1 %551, %v409_v24   ;;  %v584_v28 = vld [vmem:[%s772_s1 + $0x20] ss:$12 sps:$4 sm:$0xff]   ;;  %v587_v31 = vld [vmem:[%s772_s1 + $0x4] ss:$12 sps:$4 sm:$0xff]   ;;  %v588_v32 = vld [vmem:[%s772_s1 + $0x8] ss:$12 sps:$4 sm:$0xff]  }
   0xc   :  { %530 = vmatpush3.bf16.msra.mxu1 %v564_v10  ;;  %310 = vmatpush1.bf16.msra.mxu0 %v561_v11  ;;  %v585_v33 = vld [vmem:[%s772_s1] ss:$12 sps:$4 sm:$0xff]  }
   0xd   :  { %531 = vmatprep.subr.bf16.mxu1 %v602_v0  ;;  %311 = vmatprep.subr.bf16.mxu0 %v567_v12  ;;  %v589_v34 = vld [vmem:[%s775_s0] sm:$0xff]  }
   0xf   :  { %400 = vperm.xlu0 %550, %v392_v27   ;;  %418 = vperm.xlu1 %551, %v410_v29  }
  0x10   :  { %532 = vmatpush3.bf16.msra.mxu1 %v568_v13  ;;  %312 = vmatpush1.bf16.msra.mxu0 %v565_v14 }
  0x11   :  { %533 = vmatprep.subr.bf16.mxu1 %v602_v0  ;;  %313 = vmatprep.subr.bf16.mxu0 %v571_v15 }
  0x14   :  { %534 = vmatpush3.bf16.msra.mxu1 %v572_v16  ;;  %314 = vmatpush1.bf16.msra.mxu0 %v569_v17 }
  0x15   :  { %535 = vmatprep.subr.bf16.mxu1 %v602_v0  ;;  %315 = vmatprep.subr.bf16.mxu0 %v575_v18 }
  0x18   :  { %536 = vmatpush3.bf16.msra.mxu1 %v576_v19  ;;  %316 = vmatpush1.bf16.msra.mxu0 %v573_v20 }
  0x19   :  { %537 = vmatprep.subr.bf16.mxu1 %v602_v0  ;;  %317 = vmatprep.subr.bf16.mxu0 %v579_v21 }
  0x1c   :  { %538 = vmatpush3.bf16.msra.mxu1 %v580_v22  ;;  %318 = vmatpush1.bf16.msra.mxu0 %v577_v25 }
  0x1d   :  { %539 = vmatprep.subr.bf16.mxu1 %v602_v0  ;;  %319 = vmatprep.subr.bf16.mxu0 %v583_v26 }
  0x20   :  { %540 = vmatpush3.bf16.msra.mxu1 %v584_v28  ;;  %320 = vmatpush1.bf16.msra.mxu0 %v581_v30 }
  0x21   :  { %541 = vmatprep.subr.bf16.mxu1 %v602_v0  ;;  %321 = vmatprep.subr.bf16.mxu0 %v587_v31 }
  0x24   :  { %542 = vmatpush3.bf16.msra.mxu1 %v588_v32  ;;  %322 = vmatpush1.bf16.msra.mxu0 %v585_v33 }
  0x27   :  { %544 = vmatmul.mubr.bf16.vlgmr.msra.gmra.mxu1 %v589_v34  ;;  %340 = vmatmul.mubr.bf16.vlgmr.msra.gmra.mxu0 %v589_v34 }
  0x86   :  { %v396_v42 = vpop.permute.xlu0 %395  ;;  %v414_v45 = vpop.permute.xlu1 %413 }
  0x8a   :  { %v401_v55 = vpop.permute.xlu0 %400  ;;  %v419_v63 = vpop.permute.xlu1 %418 }
  0xc7   :  { %v166_v35 = vpop.f32.mrf.mxu1  ;;  %v123_v39 = vpop.f32.mrf.mxu0 }
  0xc9   :  { %v525_v36 = vpop.f32.mrf.mxu1  ;;  %v125_v40 = vpop.f32.mrf.mxu0 }
  0xcb   :  { %v169_v37 = vpop.f32.mrf.mxu1  ;;  %v127_v41 = vpop.f32.mrf.mxu0 }
  0xcd   :  { %v526_v38 = vpop.f32.mrf.mxu1  ;;  %v129_v43 = vpop.f32.mrf.mxu0 }
  0xe7   :  { %v384_v44 = vpop.f32.mrf.mxu1  ;;  %v341_v47 = vpop.f32.mrf.mxu0 }
  0xe8   :  { %v385_v46 = vadd.f32 %v384_v44, %v166_v35  ;;  %v342_v48 = vadd.f32 %v341_v47, %v123_v39 }
  0xe9   :  { %v545_v49 = vpop.f32.mrf.mxu1  ;;  %v343_v51 = vpop.f32.mrf.mxu0 }
  0xea   :  { %v405_v50 = vadd.f32 %v396_v42, %v385_v46  ;;  %v403_v52 = vadd.f32 %v396_v42, %v342_v48  ;;  %v344_v53 = vadd.f32 %v343_v51, %v125_v40 }
  0xeb   :  { %v387_v54 = vpop.f32.mrf.mxu1  ;;  %v345_v58 = vpop.f32.mrf.mxu0 }
  0xec   :  { %v423_v56 = vadd.f32 %v414_v45, %v405_v50  ;;  %v388_v57 = vadd.f32 %v387_v54, %v169_v37  ;;  %v421_v59 = vadd.f32 %v414_v45, %v403_v52  ;;  %v404_v60 = vadd.f32 %v396_v42, %v344_v53 }
  0xed   :  { %v346_v61 = vadd.f32 %v345_v58, %v127_v41  ;;  %v546_v62 = vpop.f32.mrf.mxu1  ;;  %v347_v2 = vpop.f32.mrf.mxu0 }
  0xee   :  { %v435_v0 = vmin.f32 %v423_v56, 0.0  ;;  %v408_v1 = vadd.f32 %v401_v55, %v388_v57  ;;  %v433_v3 = vmin.f32 %v421_v59, 0.0  ;;  %v422_v4 = vadd.f32 %v414_v45, %v404_v60 }
  0xef   :  { %v406_v5 = vadd.f32 %v401_v55, %v346_v61  ;;  %v348_v8 = vadd.f32 %v347_v2, %v129_v43  ;;  %vm429_vm2 = vcmp.gt.f32.partialorder %v423_v56, 0.0  ;;  %vm427_vm3 = vcmp.gt.f32.partialorder %v421_v59, 0.0 }
  0xf0   :  { %v443_v6 = vmul.f32 1.442695, %v435_v0  ;;  %v426_v7 = vadd.f32 %v419_v63, %v408_v1  ;;  %v439_v9 = vmul.f32 1.442695, %v433_v3  ;;  %v434_v10 = vmin.f32 %v422_v4, 0.0 }
  0xf1   :  { %v424_v11 = vadd.f32 %v419_v63, %v406_v5  ;;  %v407_v13 = vadd.f32 %v401_v55, %v348_v8  ;;  %vm428_vm4 = vcmp.gt.f32.partialorder %v422_v4, 0.0 }
  0xf2   :  { %590 = vpow2.f32 %v443_v6  ;;  %v438_v12 = vmin.f32 %v426_v7, 0.0  ;;  %v441_v14 = vmul.f32 1.442695, %v434_v10  ;;  %vm432_vm5 = vcmp.gt.f32.partialorder %v426_v7, 0.0 }
  0xf3   :  { %592 = vpow2.f32 %v439_v9  ;;  %v436_v15 = vmin.f32 %v424_v11, 0.0  ;;  %v425_v17 = vadd.f32 %v419_v63, %v407_v13  ;;  %vm430_vm6 = vcmp.gt.f32.partialorder %v424_v11, 0.0 }
  0xf4   :  { %v449_v16 = vmul.f32 1.442695, %v438_v12  ;;  %594 = vpow2.f32 %v441_v14 }
  0xf5   :  { %v445_v18 = vmul.f32 1.442695, %v436_v15  ;;  %v437_v19 = vmin.f32 %v425_v17, 0.0  ;;  %vm431_vm7 = vcmp.gt.f32.partialorder %v425_v17, 0.0 }
  0xf6   :  { %596 = vpow2.f32 %v449_v16 }
  0xf7   :  { %598 = vpow2.f32 %v445_v18  ;;  %v447_v20 = vmul.f32 1.442695, %v437_v19 }
  0xf9   :  { %600 = vpow2.f32 %v447_v20 }
  0xff   :  { %v591_v21 = vpop.eup %590 }
 0x100   :  { %v593_v22 = vpop.eup %592  ;;  %v506_v23 = vadd.f32 -1.0, %v591_v21 }
 0x101   :  { %v504_v24 = vadd.f32 -1.0, %v593_v22  ;;  %v595_v25 = vpop.eup %594 }
 0x102   :  { %v459_v26 = vsel %vm429_vm2, %v423_v56, %v506_v23  ;;  %v505_v29 = vadd.f32 -1.0, %v595_v25 }
 0x103   :  { %v597_v27 = vpop.eup %596  ;;  %v457_v28 = vsel %vm427_vm3, %v421_v59, %v504_v24  ;;  %465 = vst [vmem:[%s776_s6 + $0x10] sm:$0xff] %v459_v26 }
 0x104   :  { %v599_v30 = vpop.eup %598  ;;  %463 = vst [vmem:[%s776_s6] sm:$0xff] %v457_v28  ;;  %v509_v31 = vadd.f32 -1.0, %v597_v27  ;;  %v458_v32 = vsel %vm428_vm4, %v422_v4, %v505_v29 }
 0x105   :  { %v507_v33 = vadd.f32 -1.0, %v599_v30  ;;  %464 = vst [vmem:[%s776_s6 + $0x8] sm:$0xff] %v458_v32 }
 0x106   :  { %v462_v34 = vsel %vm432_vm5, %v426_v7, %v509_v31  ;;  %v601_v35 = vpop.eup %600 }
 0x107   :  { %v460_v36 = vsel %vm430_vm6, %v424_v11, %v507_v33  ;;  %468 = vst [vmem:[%s776_s6 + $0x28] sm:$0xff] %v462_v34  ;;  %v508_v37 = vadd.f32 -1.0, %v601_v35 }
 0x108   :  { %466 = vst [vmem:[%s776_s6 + $0x18] sm:$0xff] %v460_v36 }
 0x109   :  { %v461_v38 = vsel %vm431_vm7, %v425_v17, %v508_v37 }
 0x10a   :  { %467 = vst [vmem:[%s776_s6 + $0x20] sm:$0xff] %v461_v38 }

// kernel: stft_discriminator_forward.19
= control target key start
LH: loop header
LB: loop body
LE: loop exit
PB: predicated region body
PF: predicated region fallthrough
CT: control target
= control target key end

     0   :  { %v527_v1 = vmov 0   ;;  %vm254_vm0 = vcmask 130048   ;;  %s692_s1 = inlined_call_operand.vmem [shape: bf16[144,512], index: 1, kind: input, shape index: {}]   ;;  %s693_s0 = inlined_call_operand.vmem [shape: bf16[16,144], index: 0, kind: input, shape index: {}]   ;;  %s694_s2 = inlined_call_operand.vmem [shape: f32[16,1], index: 2, kind: input, shape index: {}]   ;;  %s695_s3 = inlined_call_operand.vmem [shape: f32[16,512], index: 3, kind: output, shape index: {}]  }
   0x1   :  { %v454_v0 = vld [vmem:[%s692_s1 + $0xe4] ss:$16 sps:$4 sm:$0xff]   ;;  %453 = vset.pattern.permute.xlu0 %v527_v1  ;;  %v456_v2 = vld [vmem:[%s692_s1 + $0xec] ss:$16 sps:$4 sm:$0xff]   ;;  %v458_v3 = vld [vmem:[%s692_s1 + $0xe0] ss:$16 sps:$4 sm:$0xff]  }
   0x2   :  { %258 = vmatprep.subr.bf16.mxu0 %v454_v0  ;;  %v459_v4 = vld [vmem:[%s692_s1 + $0xe8] ss:$16 sps:$4 sm:$0xff]   ;;  %301 = vmatprep.subr.bf16.mxu1 %v456_v2  ;;  %v460_v5 = vld [vmem:[%s692_s1 + $0xc4] ss:$16 sps:$4 sm:$0xff]   ;;  %v462_v6 = vld [vmem:[%s692_s1 + $0xcc] ss:$16 sps:$4 sm:$0xff]  }
   0x3   :  { %259 = vmatpush1.bf16.msra.mxu0 %v458_v3  ;;  %302 = vmatpush1.bf16.msra.mxu1 %v459_v4  ;;  %v464_v7 = vld [vmem:[%s692_s1 + $0xc0] ss:$16 sps:$4 sm:$0xff]   ;;  %v465_v8 = vld [vmem:[%s692_s1 + $0xc8] ss:$16 sps:$4 sm:$0xff]   ;;  %v466_v9 = vld [vmem:[%s692_s1 + $0xa4] ss:$16 sps:$4 sm:$0xff]  }
   0x4   :  { %260 = vmatprep.subr.bf16.mxu0 %v460_v5  ;;  %303 = vmatprep.subr.bf16.mxu1 %v462_v6  ;;  %v468_v10 = vld [vmem:[%s692_s1 + $0xac] ss:$16 sps:$4 sm:$0xff]   ;;  %v470_v11 = vld [vmem:[%s692_s1 + $0xa0] ss:$16 sps:$4 sm:$0xff]   ;;  %v471_v12 = vld [vmem:[%s692_s1 + $0xa8] ss:$16 sps:$4 sm:$0xff]  }
   0x5   :  { %v472_v13 = vld [vmem:[%s692_s1 + $0x84] ss:$16 sps:$4 sm:$0xff]   ;;  %v474_v14 = vld [vmem:[%s692_s1 + $0x8c] ss:$16 sps:$4 sm:$0xff]   ;;  %v476_v15 = vld [vmem:[%s692_s1 + $0x80] ss:$16 sps:$4 sm:$0xff]  }
   0x6   :  { %v477_v16 = vld [vmem:[%s692_s1 + $0x88] ss:$16 sps:$4 sm:$0xff]   ;;  %v478_v17 = vld [vmem:[%s692_s1 + $0x64] ss:$16 sps:$4 sm:$0xff]   ;;  %v480_v18 = vld [vmem:[%s692_s1 + $0x6c] ss:$16 sps:$4 sm:$0xff]  }
   0x7   :  { %261 = vmatpush1.bf16.msra.mxu0 %v464_v7  ;;  %304 = vmatpush1.bf16.msra.mxu1 %v465_v8  ;;  %v482_v19 = vld [vmem:[%s692_s1 + $0x60] ss:$16 sps:$4 sm:$0xff]   ;;  %v483_v20 = vld [vmem:[%s692_s1 + $0x68] ss:$16 sps:$4 sm:$0xff]   ;;  %v484_v21 = vld [vmem:[%s692_s1 + $0x44] ss:$16 sps:$4 sm:$0xff]  }
   0x8   :  { %262 = vmatprep.subr.bf16.mxu0 %v466_v9  ;;  %305 = vmatprep.subr.bf16.mxu1 %v468_v10  ;;  %v486_v22 = vld [vmem:[%s692_s1 + $0x4c] ss:$16 sps:$4 sm:$0xff]   ;;  %v488_v23 = vld [vmem:[%s692_s1 + $0x40] ss:$16 sps:$4 sm:$0xff]   ;;  %v489_v24 = vld [vmem:[%s692_s1 + $0x48] ss:$16 sps:$4 sm:$0xff]  }
   0x9   :  { %v490_v25 = vld [vmem:[%s692_s1 + $0x24] ss:$16 sps:$4 sm:$0xff]   ;;  %v492_v26 = vld [vmem:[%s692_s1 + $0x2c] ss:$16 sps:$4 sm:$0xff]   ;;  %v494_v27 = vld [vmem:[%s692_s1 + $0x20] ss:$16 sps:$4 sm:$0xff]  }
   0xa   :  { %v495_v28 = vld [vmem:[%s692_s1 + $0x28] ss:$16 sps:$4 sm:$0xff]   ;;  %v496_v29 = vld [vmem:[%s692_s1 + $0x4] ss:$16 sps:$4 sm:$0xff]   ;;  %v498_v30 = vld [vmem:[%s692_s1 + $0xc] ss:$16 sps:$4 sm:$0xff]  }
   0xb   :  { %263 = vmatpush1.bf16.msra.mxu0 %v470_v11  ;;  %306 = vmatpush1.bf16.msra.mxu1 %v471_v12  ;;  %v510_v31 = vld [vmem:[%s693_s0 + $0x4] ss:$8 sps:$4 sm:$0xff]   ;;  %v500_v34 = vld [vmem:[%s692_s1] ss:$16 sps:$4 sm:$0xff]   ;;  %v501_v35 = vld [vmem:[%s692_s1 + $0x8] ss:$16 sps:$4 sm:$0xff]  }
   0xc   :  { %264 = vmatprep.subr.bf16.mxu0 %v472_v13  ;;  %307 = vmatprep.subr.bf16.mxu1 %v474_v14  ;;  %v53_v32 = vld [vmem:[%s694_s2] sm:$0xff]  ;;  %v54_v33 = vld [vmem:[%s694_s2 + $0x8] sm:$0xff] }
   0xd   :  { %57 = vperm.xlu0 %453, %v53_v32   ;;  %442 = vmatprep.mubr.msk.bf16.mxu0 %vm254_vm0, %v510_v31  ;;  %v502_v36 = vld [vmem:[%s692_s1 + $0x104] ss:$16 sps:$4 sm:$0xff]   ;;  %v504_v37 = vld [vmem:[%s692_s1 + $0x10c] ss:$16 sps:$4 sm:$0xff]   ;;  %v506_v38 = vld [vmem:[%s692_s1 + $0x100] ss:$16 sps:$4 sm:$0xff]  }
   0xe   :  { %443 = vmatprep.mubr.msk.bf16.mxu1 %vm254_vm0, %v510_v31  ;;  %v507_v39 = vld [vmem:[%s692_s1 + $0x108] ss:$16 sps:$4 sm:$0xff]  }
   0xf   :  { %265 = vmatpush1.bf16.msra.mxu0 %v476_v15  ;;  %308 = vmatpush1.bf16.msra.mxu1 %v477_v16  ;;  %v508_v40 = vld [vmem:[%s693_s0] ss:$8 sps:$4 sm:$0xff]  }
  0x10   :  { %266 = vmatprep.subr.bf16.mxu0 %v478_v17  ;;  %309 = vmatprep.subr.bf16.mxu1 %v480_v18 }
  0x11   :  { %62 = vperm.xlu0 %453, %v54_v33  }
  0x13   :  { %267 = vmatpush1.bf16.msra.mxu0 %v482_v19  ;;  %310 = vmatpush1.bf16.msra.mxu1 %v483_v20 }
  0x14   :  { %268 = vmatprep.subr.bf16.mxu0 %v484_v21  ;;  %311 = vmatprep.subr.bf16.mxu1 %v486_v22 }
  0x17   :  { %269 = vmatpush1.bf16.msra.mxu0 %v488_v23  ;;  %312 = vmatpush1.bf16.msra.mxu1 %v489_v24 }
  0x18   :  { %270 = vmatprep.subr.bf16.mxu0 %v490_v25  ;;  %313 = vmatprep.subr.bf16.mxu1 %v492_v26 }
  0x1b   :  { %271 = vmatpush1.bf16.msra.mxu0 %v494_v27  ;;  %314 = vmatpush1.bf16.msra.mxu1 %v495_v28 }
  0x1c   :  { %272 = vmatprep.subr.bf16.mxu0 %v496_v29  ;;  %315 = vmatprep.subr.bf16.mxu1 %v498_v30 }
  0x1f   :  { %273 = vmatpush1.bf16.msra.mxu0 %v500_v34  ;;  %316 = vmatpush1.bf16.msra.mxu1 %v501_v35 }
  0x20   :  { %288 = vmatprep.subr.bf16.mxu0 %v502_v36  ;;  %331 = vmatprep.subr.bf16.mxu1 %v504_v37 }
  0x23   :  { %289 = vmatpush2.bf16.msra.mxu0 %v506_v38  ;;  %332 = vmatpush2.bf16.msra.mxu1 %v507_v39 }
  0x26   :  { %291 = vmatmul.mubr.bf16.vlgmr.msra.gmra.mxu0 %v508_v40  ;;  %334 = vmatmul.mubr.bf16.vlgmr.msra.gmra.mxu1 %v508_v40 }
  0x88   :  { %v58_v41 = vpop.permute.xlu0 %57 }
  0x8c   :  { %v63_v50 = vpop.permute.xlu0 %62 }
  0xe6   :  { %v292_v42 = vpop.f32.mrf.mxu0  ;;  %v335_v43 = vpop.f32.mrf.mxu1 }
  0xe7   :  { %v293_v44 = vadd.f32 %v292_v42, %v58_v41  ;;  %v336_v45 = vadd.f32 %v335_v43, %v58_v41 }
  0xe8   :  { %v294_v46 = vpop.f32.mrf.mxu0  ;;  %v337_v47 = vpop.f32.mrf.mxu1 }
  0xe9   :  { %v352_v48 = vmin.f32 %v293_v44, 0.0  ;;  %v354_v49 = vmin.f32 %v336_v45, 0.0  ;;  %v295_v51 = vadd.f32 %v294_v46, %v58_v41  ;;  %v338_v52 = vadd.f32 %v337_v47, %v58_v41 }
  0xea   :  { %v296_v53 = vpop.f32.mrf.mxu0  ;;  %v339_v54 = vpop.f32.mrf.mxu1  ;;  %vm344_vm1 = vcmp.gt.f32.partialorder %v293_v44, 0.0  ;;  %vm346_vm2 = vcmp.gt.f32.partialorder %v336_v45, 0.0 }
  0xeb   :  { %v360_v55 = vmul.f32 1.442695, %v352_v48  ;;  %v364_v56 = vmul.f32 1.442695, %v354_v49  ;;  %v297_v57 = vadd.f32 %v296_v53, %v63_v50  ;;  %v340_v58 = vadd.f32 %v339_v54, %v63_v50 }
  0xec   :  { %v353_v59 = vmin.f32 %v295_v51, 0.0  ;;  %v355_v60 = vmin.f32 %v338_v52, 0.0  ;;  %v298_v61 = vpop.f32.mrf.mxu0  ;;  %v341_v62 = vpop.f32.mrf.mxu1  ;;  %vm345_vm3 = vcmp.gt.f32.partialorder %v295_v51, 0.0  ;;  %vm347_vm4 = vcmp.gt.f32.partialorder %v338_v52, 0.0 }
  0xed   :  { %511 = vpow2.f32 %v360_v55  ;;  %v356_v63 = vmin.f32 %v297_v57, 0.0  ;;  %v358_v2 = vmin.f32 %v340_v58, 0.0  ;;  %v299_v4 = vadd.f32 %v298_v61, %v63_v50 }
  0xee   :  { %513 = vpow2.f32 %v364_v56  ;;  %v362_v0 = vmul.f32 1.442695, %v353_v59  ;;  %v366_v1 = vmul.f32 1.442695, %v355_v60  ;;  %v342_v5 = vadd.f32 %v341_v62, %v63_v50 }
  0xef   :  { %v368_v3 = vmul.f32 1.442695, %v356_v63  ;;  %v372_v6 = vmul.f32 1.442695, %v358_v2  ;;  %v357_v7 = vmin.f32 %v299_v4, 0.0  ;;  %vm348_vm5 = vcmp.gt.f32.partialorder %v297_v57, 0.0 }
  0xf0   :  { %515 = vpow2.f32 %v362_v0  ;;  %v359_v8 = vmin.f32 %v342_v5, 0.0  ;;  %vm350_vm6 = vcmp.gt.f32.partialorder %v340_v58, 0.0  ;;  %vm349_vm7 = vcmp.gt.f32.partialorder %v299_v4, 0.0 }
  0xf1   :  { %517 = vpow2.f32 %v366_v1  ;;  %v370_v9 = vmul.f32 1.442695, %v357_v7  ;;  %vm351_vm8 = vcmp.gt.f32.partialorder %v342_v5, 0.0 }
  0xf2   :  { %519 = vpow2.f32 %v368_v3  ;;  %v374_v10 = vmul.f32 1.442695, %v359_v8 }
  0xf3   :  { %521 = vpow2.f32 %v372_v6 }
  0xf4   :  { %523 = vpow2.f32 %v370_v9 }
  0xf5   :  { %525 = vpow2.f32 %v374_v10 }
  0xfa   :  { %v512_v11 = vpop.eup %511 }
  0xfb   :  { %v514_v12 = vpop.eup %513  ;;  %v444_v13 = vadd.f32 -1.0, %v512_v11 }
  0xfc   :  { %v446_v14 = vadd.f32 -1.0, %v514_v12 }
  0xfd   :  { %v516_v15 = vpop.eup %515  ;;  %v384_v16 = vsel %vm344_vm1, %v293_v44, %v444_v13 }
  0xfe   :  { %v518_v17 = vpop.eup %517  ;;  %392 = vst [vmem:[%s695_s3] sm:$0xff] %v384_v16  ;;  %v386_v18 = vsel %vm346_vm2, %v336_v45, %v446_v14  ;;  %v445_v19 = vadd.f32 -1.0, %v516_v15 }
  0xff   :  { %v520_v20 = vpop.eup %519  ;;  %394 = vst [vmem:[%s695_s3 + $0x10] sm:$0xff] %v386_v18  ;;  %v447_v21 = vadd.f32 -1.0, %v518_v17 }
 0x100   :  { %v522_v22 = vpop.eup %521  ;;  %v385_v23 = vsel %vm345_vm3, %v295_v51, %v445_v19  ;;  %v448_v24 = vadd.f32 -1.0, %v520_v20 }
 0x101   :  { %393 = vst [vmem:[%s695_s3 + $0x8] sm:$0xff] %v385_v23  ;;  %v387_v25 = vsel %vm347_vm4, %v338_v52, %v447_v21  ;;  %v450_v26 = vadd.f32 -1.0, %v522_v22  ;;  %v524_v27 = vpop.eup %523 }
 0x102   :  { %395 = vst [vmem:[%s695_s3 + $0x18] sm:$0xff] %v387_v25  ;;  %v388_v28 = vsel %vm348_vm5, %v297_v57, %v448_v24  ;;  %v526_v29 = vpop.eup %525  ;;  %v449_v31 = vadd.f32 -1.0, %v524_v27 }
 0x103   :  { %396 = vst [vmem:[%s695_s3 + $0x20] sm:$0xff] %v388_v28  ;;  %v390_v30 = vsel %vm350_vm6, %v340_v58, %v450_v26  ;;  %v451_v32 = vadd.f32 -1.0, %v526_v29 }
 0x104   :  { %398 = vst [vmem:[%s695_s3 + $0x30] sm:$0xff] %v390_v30  ;;  %v389_v33 = vsel %vm349_vm7, %v299_v4, %v449_v31 }
 0x105   :  { %397 = vst [vmem:[%s695_s3 + $0x28] sm:$0xff] %v389_v33  ;;  %v391_v34 = vsel %vm351_vm8, %v342_v5, %v451_v32 }
 0x106   :  { %399 = vst [vmem:[%s695_s3 + $0x38] sm:$0xff] %v391_v34 }

// kernel: stft_discriminator_forward.20
= control target key start
LH: loop header
LB: loop body
LE: loop exit
PB: predicated region body
PF: predicated region fallthrough
CT: control target
= control target key end

     0   :  { %v445_v1 = vmov 0   ;;  %vm69_vm0 = vcmask 130048   ;;  %vm245_vm1 = vcmask 523264   ;;  %s592_s1 = inlined_call_operand.vmem [shape: bf16[192,256], index: 1, kind: input, shape index: {}]   ;;  %s593_s4 = inlined_call_operand.vmem [shape: bf16[16,256], index: 4, kind: input, shape index: {}]   ;;  %s594_s3 = inlined_call_operand.vmem [shape: bf16[16,16], index: 3, kind: input, shape index: {}]   ;;  %s595_s0 = inlined_call_operand.vmem [shape: bf16[16,192], index: 0, kind: input, shape index: {}]   ;;  %s596_s2 = inlined_call_operand.vmem [shape: f32[16,1], index: 2, kind: input, shape index: {}]   ;;  %s597_s5 = inlined_call_operand.vmem [shape: f32[16,1], index: 5, kind: input, shape index: {}]   ;;  %s598_s6 = inlined_call_operand.vmem [shape: f32[16,256], index: 6, kind: output, shape index: {}]  }
   0x1   :  { %v394_v0 = vld [vmem:[%s592_s1 + $0x74] ss:$8 sps:$4 sm:$0xff]   ;;  %105 = vmatprep.mubr.bf16.mxu0 %v445_v1  ;;  %392 = vset.pattern.permute.xlu0 %v445_v1  ;;  %v396_v2 = vld [vmem:[%s592_s1 + $0x70] ss:$8 sps:$4 sm:$0xff]   ;;  %v397_v3 = vld [vmem:[%s592_s1 + $0x64] ss:$8 sps:$4 sm:$0xff]  }
   0x2   :  { %393 = vset.pattern.permute.xlu1 %v445_v1  ;;  %249 = vmatprep.subr.bf16.mxu1 %v394_v0  ;;  %v399_v4 = vld [vmem:[%s592_s1 + $0x60] ss:$8 sps:$4 sm:$0xff]   ;;  %v400_v5 = vld [vmem:[%s592_s1 + $0x54] ss:$8 sps:$4 sm:$0xff]   ;;  %v402_v6 = vld [vmem:[%s592_s1 + $0x50] ss:$8 sps:$4 sm:$0xff]  }
   0x3   :  { %250 = vmatpush1.bf16.msra.mxu1 %v396_v2  ;;  %v403_v7 = vld [vmem:[%s592_s1 + $0x44] ss:$8 sps:$4 sm:$0xff]   ;;  %v405_v8 = vld [vmem:[%s592_s1 + $0x40] ss:$8 sps:$4 sm:$0xff]   ;;  %v406_v9 = vld [vmem:[%s592_s1 + $0x34] ss:$8 sps:$4 sm:$0xff]  }
   0x4   :  { %251 = vmatprep.subr.bf16.mxu1 %v397_v3  ;;  %v424_v10 = vld [vmem:[%s593_s4 + $0x4] ss:$8 sps:$4 sm:$0xff]   ;;  %v426_v11 = vld [vmem:[%s593_s4] ss:$8 sps:$4 sm:$0xff]   ;;  %v408_v12 = vld [vmem:[%s592_s1 + $0x30] ss:$8 sps:$4 sm:$0xff]  }
   0x5   :  { %v409_v13 = vld [vmem:[%s592_s1 + $0x24] ss:$8 sps:$4 sm:$0xff]   ;;  %87 = vmatprep.subr.bf16.mxu0 %v424_v10  ;;  %v411_v15 = vld [vmem:[%s592_s1 + $0x20] ss:$8 sps:$4 sm:$0xff]   ;;  %v412_v18 = vld [vmem:[%s592_s1 + $0x14] ss:$8 sps:$4 sm:$0xff]  }
   0x6   :  { %v430_v14 = vld [vmem:[%s594_s3] sm:$0xff]   ;;  %88 = vmatpush1.bf16.msra.mxu0 %v426_v11  ;;  %v293_v20 = vld [vmem:[%s596_s2 + $0x8] sm:$0xff]  ;;  %v414_v21 = vld [vmem:[%s592_s1 + $0x10] ss:$8 sps:$4 sm:$0xff]  }
   0x7   :  { %252 = vmatpush1.bf16.msra.mxu1 %v399_v4  ;;  %v436_v16 = vld [vmem:[%s595_s0 + $0x4] ss:$8 sps:$4 sm:$0xff]   ;;  %v417_v24 = vld [vmem:[%s592_s1] ss:$8 sps:$4 sm:$0xff]   ;;  %v418_v25 = vld [vmem:[%s592_s1 + $0xb4] ss:$8 sps:$4 sm:$0xff]  }
   0x8   :  { %253 = vmatprep.subr.bf16.mxu1 %v400_v5  ;;  %v292_v17 = vld [vmem:[%s596_s2] sm:$0xff]  ;;  %386 = vmatprep.mubr.msk.bf16.mxu1 %vm245_vm1, %v436_v16  ;;  %v309_v22 = vld [vmem:[%s597_s5 + $0x8] sm:$0xff]  ;;  %v420_v26 = vld [vmem:[%s592_s1 + $0xb0] ss:$8 sps:$4 sm:$0xff]  }
   0x9   :  { %359 = vmatmul.mubr.msk.bf16.vlgmr.msra.gmra.mxu0 %vm69_vm0, %v430_v14  ;;  %v308_v19 = vld [vmem:[%s597_s5] sm:$0xff]  ;;  %296 = vperm.xlu0 %392, %v292_v17   ;;  %v427_v29 = vld [vmem:[%s592_s1 + $0x94] ss:$8 sps:$4 sm:$0xff]   ;;  %v429_v30 = vld [vmem:[%s592_s1 + $0x90] ss:$8 sps:$4 sm:$0xff]  }
   0xa   :  { %312 = vperm.xlu1 %393, %v308_v19   ;;  %v415_v23 = vld [vmem:[%s592_s1 + $0x4] ss:$8 sps:$4 sm:$0xff]   ;;  %v423_v28 = vld [vmem:[%s592_s1 + $0xa0] ss:$8 sps:$4 sm:$0xff]  }
   0xb   :  { %254 = vmatpush1.bf16.msra.mxu1 %v402_v6  ;;  %v421_v27 = vld [vmem:[%s592_s1 + $0xa4] ss:$8 sps:$4 sm:$0xff]   ;;  %v433_v32 = vld [vmem:[%s592_s1 + $0x80] ss:$8 sps:$4 sm:$0xff]  }
   0xc   :  { %255 = vmatprep.subr.bf16.mxu1 %v403_v7  ;;  %v431_v31 = vld [vmem:[%s592_s1 + $0x84] ss:$8 sps:$4 sm:$0xff]   ;;  %v434_v33 = vld [vmem:[%s595_s0] ss:$8 sps:$4 sm:$0xff]  }
   0xd   :  { %301 = vperm.xlu0 %392, %v293_v20  }
   0xe   :  { %317 = vperm.xlu1 %393, %v309_v22  }
   0xf   :  { %256 = vmatpush1.bf16.msra.mxu1 %v405_v8 }
  0x10   :  { %257 = vmatprep.subr.bf16.mxu1 %v406_v9 }
  0x13   :  { %258 = vmatpush1.bf16.msra.mxu1 %v408_v12 }
  0x14   :  { %259 = vmatprep.subr.bf16.mxu1 %v409_v13 }
  0x17   :  { %260 = vmatpush1.bf16.msra.mxu1 %v411_v15 }
  0x18   :  { %261 = vmatprep.subr.bf16.mxu1 %v412_v18 }
  0x1b   :  { %262 = vmatpush1.bf16.msra.mxu1 %v414_v21 }
  0x1c   :  { %263 = vmatprep.subr.bf16.mxu1 %v415_v23 }
  0x1f   :  { %264 = vmatpush1.bf16.msra.mxu1 %v417_v24 }
  0x20   :  { %273 = vmatprep.subr.bf16.mxu1 %v418_v25 }
  0x23   :  { %274 = vmatpush2.bf16.msra.mxu1 %v420_v26 }
  0x24   :  { %275 = vmatprep.subr.bf16.mxu1 %v421_v27 }
  0x27   :  { %276 = vmatpush2.bf16.msra.mxu1 %v423_v28 }
  0x28   :  { %277 = vmatprep.subr.bf16.mxu1 %v427_v29 }
  0x2b   :  { %278 = vmatpush2.bf16.msra.mxu1 %v429_v30 }
  0x2c   :  { %279 = vmatprep.subr.bf16.mxu1 %v431_v31 }
  0x2f   :  { %280 = vmatpush2.bf16.msra.mxu1 %v433_v32 }
  0x32   :  { %282 = vmatmul.mubr.bf16.vlgmr.msra.gmra.mxu1 %v434_v33 }
  0x84   :  { %v297_v36 = vpop.permute.xlu0 %296 }
  0x85   :  { %v313_v39 = vpop.permute.xlu1 %312 }
  0x88   :  { %v302_v48 = vpop.permute.xlu0 %301 }
  0x89   :  { %v318_v54 = vpop.permute.xlu1 %317 }
  0xc9   :  { %v107_v34 = vpop.f32.mrf.mxu0 }
  0xcb   :  { %v109_v35 = vpop.f32.mrf.mxu0 }
  0xcd   :  { %v111_v41 = vpop.f32.mrf.mxu0 }
  0xcf   :  { %v113_v50 = vpop.f32.mrf.mxu0 }
  0xf2   :  { %v283_v37 = vpop.f32.mrf.mxu1 }
  0xf3   :  { %v284_v38 = vadd.f32 %v283_v37, %v107_v34 }
  0xf4   :  { %v285_v40 = vpop.f32.mrf.mxu1 }
  0xf5   :  { %v304_v42 = vadd.f32 %v297_v36, %v284_v38  ;;  %v286_v43 = vadd.f32 %v285_v40, %v109_v35 }
  0xf6   :  { %v287_v44 = vpop.f32.mrf.mxu1 }
  0xf7   :  { %v320_v45 = vadd.f32 %v313_v39, %v304_v42  ;;  %v305_v46 = vadd.f32 %v297_v36, %v286_v43  ;;  %v288_v47 = vadd.f32 %v287_v44, %v111_v41 }
  0xf8   :  { %v289_v49 = vpop.f32.mrf.mxu1 }
  0xf9   :  { %v328_v51 = vmin.f32 %v320_v45, 0.0  ;;  %v321_v52 = vadd.f32 %v313_v39, %v305_v46  ;;  %v306_v53 = vadd.f32 %v302_v48, %v288_v47  ;;  %v290_v55 = vadd.f32 %v289_v49, %v113_v50 }
  0xfa   :  { %vm324_vm2 = vcmp.gt.f32.partialorder %v320_v45, 0.0 }
  0xfb   :  { %v332_v56 = vmul.f32 1.442695, %v328_v51  ;;  %v329_v57 = vmin.f32 %v321_v52, 0.0  ;;  %v322_v58 = vadd.f32 %v318_v54, %v306_v53  ;;  %v307_v59 = vadd.f32 %v302_v48, %v290_v55 }
  0xfc   :  { %vm325_vm3 = vcmp.gt.f32.partialorder %v321_v52, 0.0 }
  0xfd   :  { %437 = vpow2.f32 %v332_v56  ;;  %v334_v60 = vmul.f32 1.442695, %v329_v57  ;;  %v330_v61 = vmin.f32 %v322_v58, 0.0  ;;  %v323_v62 = vadd.f32 %v318_v54, %v307_v59 }
  0xfe   :  { %vm326_vm4 = vcmp.gt.f32.partialorder %v322_v58, 0.0 }
  0xff   :  { %439 = vpow2.f32 %v334_v60  ;;  %v336_v63 = vmul.f32 1.442695, %v330_v61  ;;  %v331_v0 = vmin.f32 %v323_v62, 0.0  ;;  %vm327_vm5 = vcmp.gt.f32.partialorder %v323_v62, 0.0 }
 0x101   :  { %441 = vpow2.f32 %v336_v63  ;;  %v338_v1 = vmul.f32 1.442695, %v331_v0 }
 0x103   :  { %443 = vpow2.f32 %v338_v1 }
 0x10a   :  { %v438_v2 = vpop.eup %437 }
 0x10b   :  { %v387_v3 = vadd.f32 -1.0, %v438_v2 }
 0x10c   :  { %v440_v4 = vpop.eup %439 }
 0x10d   :  { %v344_v5 = vsel %vm324_vm2, %v320_v45, %v387_v3  ;;  %v388_v6 = vadd.f32 -1.0, %v440_v4 }
 0x10e   :  { %v442_v7 = vpop.eup %441  ;;  %348 = vst [vmem:[%s598_s6] sm:$0xff] %v344_v5 }
 0x10f   :  { %v345_v8 = vsel %vm325_vm3, %v321_v52, %v388_v6  ;;  %v389_v9 = vadd.f32 -1.0, %v442_v7 }
 0x110   :  { %349 = vst [vmem:[%s598_s6 + $0x8] sm:$0xff] %v345_v8  ;;  %v444_v10 = vpop.eup %443 }
 0x111   :  { %v346_v11 = vsel %vm326_vm4, %v322_v58, %v389_v9  ;;  %v390_v12 = vadd.f32 -1.0, %v444_v10 }
 0x112   :  { %350 = vst [vmem:[%s598_s6 + $0x10] sm:$0xff] %v346_v11 }
 0x113   :  { %v347_v13 = vsel %vm327_vm5, %v323_v62, %v390_v12 }
 0x114   :  { %351 = vst [vmem:[%s598_s6 + $0x18] sm:$0xff] %v347_v13 }

// kernel: stft_discriminator_forward.21
= control target key start
LH: loop header
LB: loop body
LE: loop exit
PB: predicated region body
PF: predicated region fallthrough
CT: control target
= control target key end

     0   :  { %v442_v0 = vmov 0   ;;  %vm218_vm0 = vcmask 130048   ;;  %s584_s1 = inlined_call_operand.vmem [shape: bf16[144,384], index: 1, kind: input, shape index: {}]   ;;  %s585_s0 = inlined_call_operand.vmem [shape: bf16[16,144], index: 0, kind: input, shape index: {}]   ;;  %s586_s2 = inlined_call_operand.vmem [shape: f32[16,1], index: 2, kind: input, shape index: {}]   ;;  %s587_s3 = inlined_call_operand.vmem [shape: f32[16,384], index: 3, kind: output, shape index: {}]  }
   0x1   :  { %265 = vmatprep.subr.bf16.mxu1 %v442_v0  ;;  %v391_v1 = vld [vmem:[%s584_s1 + $0xac] ss:$12 sps:$4 sm:$0xff]   ;;  %390 = vset.pattern.permute.xlu0 %v442_v0  ;;  %v393_v2 = vld [vmem:[%s584_s1 + $0xb0] ss:$12 sps:$4 sm:$0xff]   ;;  %v394_v3 = vld [vmem:[%s584_s1 + $0xa8] ss:$12 sps:$4 sm:$0xff]  }
   0x2   :  { %222 = vmatprep.subr.bf16.mxu0 %v391_v1  ;;  %266 = vmatpush1.bf16.msra.mxu1 %v393_v2  ;;  %v395_v4 = vld [vmem:[%s584_s1 + $0x94] ss:$12 sps:$4 sm:$0xff]   ;;  %v397_v5 = vld [vmem:[%s584_s1 + $0x98] ss:$12 sps:$4 sm:$0xff]   ;;  %v398_v6 = vld [vmem:[%s584_s1 + $0x90] ss:$12 sps:$4 sm:$0xff]  }
   0x3   :  { %223 = vmatpush1.bf16.msra.mxu0 %v394_v3  ;;  %267 = vmatprep.subr.bf16.mxu1 %v442_v0  ;;  %v399_v7 = vld [vmem:[%s584_s1 + $0x7c] ss:$12 sps:$4 sm:$0xff]   ;;  %v401_v8 = vld [vmem:[%s584_s1 + $0x80] ss:$12 sps:$4 sm:$0xff]   ;;  %v402_v9 = vld [vmem:[%s584_s1 + $0x78] ss:$12 sps:$4 sm:$0xff]  }
   0x4   :  { %224 = vmatprep.subr.bf16.mxu0 %v395_v4  ;;  %v403_v10 = vld [vmem:[%s584_s1 + $0x64] ss:$12 sps:$4 sm:$0xff]   ;;  %v405_v11 = vld [vmem:[%s584_s1 + $0x68] ss:$12 sps:$4 sm:$0xff]   ;;  %v406_v12 = vld [vmem:[%s584_s1 + $0x60] ss:$12 sps:$4 sm:$0xff]  }
   0x5   :  { %v407_v13 = vld [vmem:[%s584_s1 + $0x4c] ss:$12 sps:$4 sm:$0xff]   ;;  %v409_v14 = vld [vmem:[%s584_s1 + $0x50] ss:$12 sps:$4 sm:$0xff]   ;;  %v410_v15 = vld [vmem:[%s584_s1 + $0x48] ss:$12 sps:$4 sm:$0xff]  }
   0x6   :  { %268 = vmatpush1.bf16.msra.mxu1 %v397_v5  ;;  %v411_v16 = vld [vmem:[%s584_s1 + $0x34] ss:$12 sps:$4 sm:$0xff]   ;;  %v413_v17 = vld [vmem:[%s584_s1 + $0x38] ss:$12 sps:$4 sm:$0xff]   ;;  %v414_v18 = vld [vmem:[%s584_s1 + $0x30] ss:$12 sps:$4 sm:$0xff]  }
   0x7   :  { %225 = vmatpush1.bf16.msra.mxu0 %v398_v6  ;;  %269 = vmatprep.subr.bf16.mxu1 %v442_v0  ;;  %v415_v19 = vld [vmem:[%s584_s1 + $0x1c] ss:$12 sps:$4 sm:$0xff]   ;;  %v429_v20 = vld [vmem:[%s585_s0 + $0x4] ss:$8 sps:$4 sm:$0xff]  }
   0x8   :  { %226 = vmatprep.subr.bf16.mxu0 %v399_v7  ;;  %v53_v21 = vld [vmem:[%s586_s2] sm:$0xff]  ;;  %v54_v24 = vld [vmem:[%s586_s2 + $0x8] sm:$0xff]  ;;  %382 = vmatprep.mubr.msk.bf16.mxu1 %vm218_vm0, %v429_v20 }
   0x9   :  { %v417_v22 = vld [vmem:[%s584_s1 + $0x20] ss:$12 sps:$4 sm:$0xff]   ;;  %57 = vperm.xlu0 %390, %v53_v21   ;;  %v418_v23 = vld [vmem:[%s584_s1 + $0x18] ss:$12 sps:$4 sm:$0xff]   ;;  %381 = vmatprep.mubr.msk.bf16.mxu0 %vm218_vm0, %v429_v20  ;;  %v421_v26 = vld [vmem:[%s584_s1 + $0x8] ss:$12 sps:$4 sm:$0xff]  }
   0xa   :  { %270 = vmatpush1.bf16.msra.mxu1 %v401_v8  ;;  %v419_v25 = vld [vmem:[%s584_s1 + $0x4] ss:$12 sps:$4 sm:$0xff]   ;;  %v422_v27 = vld [vmem:[%s584_s1] ss:$12 sps:$4 sm:$0xff]   ;;  %v425_v29 = vld [vmem:[%s584_s1 + $0xc8] ss:$12 sps:$4 sm:$0xff]  }
   0xb   :  { %227 = vmatpush1.bf16.msra.mxu0 %v402_v9  ;;  %271 = vmatprep.subr.bf16.mxu1 %v442_v0  ;;  %v423_v28 = vld [vmem:[%s584_s1 + $0xc4] ss:$12 sps:$4 sm:$0xff]   ;;  %v426_v30 = vld [vmem:[%s584_s1 + $0xc0] ss:$12 sps:$4 sm:$0xff]  }
   0xc   :  { %228 = vmatprep.subr.bf16.mxu0 %v403_v10  ;;  %v427_v31 = vld [vmem:[%s585_s0] ss:$8 sps:$4 sm:$0xff]  }
   0xd   :  { %62 = vperm.xlu0 %390, %v54_v24  }
   0xe   :  { %272 = vmatpush1.bf16.msra.mxu1 %v405_v11 }
   0xf   :  { %229 = vmatpush1.bf16.msra.mxu0 %v406_v12  ;;  %273 = vmatprep.subr.bf16.mxu1 %v442_v0 }
  0x10   :  { %230 = vmatprep.subr.bf16.mxu0 %v407_v13 }
  0x12   :  { %274 = vmatpush1.bf16.msra.mxu1 %v409_v14 }
  0x13   :  { %231 = vmatpush1.bf16.msra.mxu0 %v410_v15  ;;  %275 = vmatprep.subr.bf16.mxu1 %v442_v0 }
  0x14   :  { %232 = vmatprep.subr.bf16.mxu0 %v411_v16 }
  0x16   :  { %276 = vmatpush1.bf16.msra.mxu1 %v413_v17 }
  0x17   :  { %233 = vmatpush1.bf16.msra.mxu0 %v414_v18  ;;  %277 = vmatprep.subr.bf16.mxu1 %v442_v0 }
  0x18   :  { %234 = vmatprep.subr.bf16.mxu0 %v415_v19 }
  0x1a   :  { %278 = vmatpush1.bf16.msra.mxu1 %v417_v22 }
  0x1b   :  { %235 = vmatpush1.bf16.msra.mxu0 %v418_v23  ;;  %279 = vmatprep.subr.bf16.mxu1 %v442_v0 }
  0x1c   :  { %236 = vmatprep.subr.bf16.mxu0 %v419_v25 }
  0x1e   :  { %280 = vmatpush1.bf16.msra.mxu1 %v421_v26 }
  0x1f   :  { %237 = vmatpush1.bf16.msra.mxu0 %v422_v27  ;;  %295 = vmatprep.subr.bf16.mxu1 %v442_v0 }
  0x20   :  { %252 = vmatprep.subr.bf16.mxu0 %v423_v28 }
  0x22   :  { %296 = vmatpush2.bf16.msra.mxu1 %v425_v29 }
  0x23   :  { %253 = vmatpush2.bf16.msra.mxu0 %v426_v30 }
  0x25   :  { %298 = vmatmul.mubr.bf16.vlgmr.msra.gmra.mxu1 %v427_v31 }
  0x26   :  { %255 = vmatmul.mubr.bf16.vlgmr.msra.gmra.mxu0 %v427_v31 }
  0x84   :  { %v58_v32 = vpop.permute.xlu0 %57 }
  0x88   :  { %v63_v38 = vpop.permute.xlu0 %62 }
  0xe5   :  { %v299_v33 = vpop.f32.mrf.mxu1 }
  0xe6   :  { %v300_v34 = vadd.f32 %v299_v33, %v58_v32  ;;  %v256_v35 = vpop.f32.mrf.mxu0 }
  0xe7   :  { %v257_v36 = vadd.f32 %v256_v35, %v58_v32  ;;  %v301_v37 = vpop.f32.mrf.mxu1 }
  0xe8   :  { %v314_v39 = vmin.f32 %v300_v34, 0.0  ;;  %v258_v40 = vpop.f32.mrf.mxu0  ;;  %vm308_vm1 = vcmp.gt.f32.partialorder %v300_v34, 0.0 }
  0xe9   :  { %v312_v41 = vmin.f32 %v257_v36, 0.0  ;;  %v259_v42 = vadd.f32 %v258_v40, %v58_v32  ;;  %v302_v43 = vpop.f32.mrf.mxu1  ;;  %vm306_vm2 = vcmp.gt.f32.partialorder %v257_v36, 0.0 }
  0xea   :  { %v322_v44 = vmul.f32 1.442695, %v314_v39  ;;  %v303_v45 = vadd.f32 %v302_v43, %v63_v38  ;;  %v260_v46 = vpop.f32.mrf.mxu0 }
  0xeb   :  { %v318_v47 = vmul.f32 1.442695, %v312_v41  ;;  %v313_v48 = vmin.f32 %v259_v42, 0.0  ;;  %v261_v49 = vadd.f32 %v260_v46, %v63_v38  ;;  %v304_v50 = vpop.f32.mrf.mxu1  ;;  %vm307_vm3 = vcmp.gt.f32.partialorder %v259_v42, 0.0 }
  0xec   :  { %430 = vpow2.f32 %v322_v44  ;;  %v317_v51 = vmin.f32 %v303_v45, 0.0  ;;  %v262_v52 = vpop.f32.mrf.mxu0  ;;  %vm311_vm4 = vcmp.gt.f32.partialorder %v303_v45, 0.0 }
  0xed   :  { %432 = vpow2.f32 %v318_v47  ;;  %v320_v53 = vmul.f32 1.442695, %v313_v48  ;;  %v315_v54 = vmin.f32 %v261_v49, 0.0  ;;  %v263_v56 = vadd.f32 %v262_v52, %v63_v38 }
  0xee   :  { %v328_v55 = vmul.f32 1.442695, %v317_v51  ;;  %vm309_vm5 = vcmp.gt.f32.partialorder %v261_v49, 0.0 }
  0xef   :  { %434 = vpow2.f32 %v320_v53  ;;  %v324_v57 = vmul.f32 1.442695, %v315_v54  ;;  %v316_v58 = vmin.f32 %v263_v56, 0.0  ;;  %vm310_vm6 = vcmp.gt.f32.partialorder %v263_v56, 0.0 }
  0xf0   :  { %436 = vpow2.f32 %v328_v55 }
  0xf1   :  { %438 = vpow2.f32 %v324_v57  ;;  %v326_v59 = vmul.f32 1.442695, %v316_v58 }
  0xf3   :  { %440 = vpow2.f32 %v326_v59 }
  0xf9   :  { %v431_v60 = vpop.eup %430 }
  0xfa   :  { %v433_v61 = vpop.eup %432  ;;  %v385_v62 = vadd.f32 -1.0, %v431_v60 }
  0xfb   :  { %v383_v63 = vadd.f32 -1.0, %v433_v61 }
  0xfc   :  { %v435_v0 = vpop.eup %434  ;;  %v338_v1 = vsel %vm308_vm1, %v300_v34, %v385_v62 }
  0xfd   :  { %v437_v2 = vpop.eup %436  ;;  %344 = vst [vmem:[%s587_s3 + $0x10] sm:$0xff] %v338_v1  ;;  %v336_v3 = vsel %vm306_vm2, %v257_v36, %v383_v63  ;;  %v384_v4 = vadd.f32 -1.0, %v435_v0 }
  0xfe   :  { %v439_v5 = vpop.eup %438  ;;  %342 = vst [vmem:[%s587_s3] sm:$0xff] %v336_v3  ;;  %v388_v6 = vadd.f32 -1.0, %v437_v2 }
  0xff   :  { %v337_v7 = vsel %vm307_vm3, %v259_v42, %v384_v4  ;;  %v386_v8 = vadd.f32 -1.0, %v439_v5 }
 0x100   :  { %343 = vst [vmem:[%s587_s3 + $0x8] sm:$0xff] %v337_v7  ;;  %v341_v9 = vsel %vm311_vm4, %v303_v45, %v388_v6  ;;  %v441_v10 = vpop.eup %440 }
 0x101   :  { %347 = vst [vmem:[%s587_s3 + $0x28] sm:$0xff] %v341_v9  ;;  %v339_v11 = vsel %vm309_vm5, %v261_v49, %v386_v8  ;;  %v387_v12 = vadd.f32 -1.0, %v441_v10 }
 0x102   :  { %345 = vst [vmem:[%s587_s3 + $0x18] sm:$0xff] %v339_v11 }
 0x103   :  { %v340_v13 = vsel %vm310_vm6, %v263_v56, %v387_v12 }
 0x104   :  { %346 = vst [vmem:[%s587_s3 + $0x20] sm:$0xff] %v340_v13 }

// kernel: stft_discriminator_forward.22
= control target key start
LH: loop header
LB: loop body
LE: loop exit
PB: predicated region body
PF: predicated region fallthrough
CT: control target
= control target key end

     0   :  { %v509_v1 = vmov 0   ;;  %vm82_vm0 = vcmask 130048   ;;  %s650_s4 = inlined_call_operand.vmem [shape: bf16[16,128], index: 4, kind: input, shape index: {}]   ;;  %s651_s1 = inlined_call_operand.vmem [shape: bf16[256,128], index: 1, kind: input, shape index: {}]   ;;  %s652_s3 = inlined_call_operand.vmem [shape: bf16[32,16], index: 3, kind: input, shape index: {}]   ;;  %s653_s0 = inlined_call_operand.vmem [shape: bf16[32,256], index: 0, kind: input, shape index: {}]   ;;  %s654_s2 = inlined_call_operand.vmem [shape: f32[32,1], index: 2, kind: input, shape index: {}]   ;;  %s655_s5 = inlined_call_operand.vmem [shape: f32[32,1], index: 5, kind: input, shape index: {}]   ;;  %s656_s6 = inlined_call_operand.vmem [shape: f32[32,128], index: 6, kind: output, shape index: {}]  }
   0x1   :  { %v476_v0 = vld [vmem:[%s650_s4] sm:$0xff]   ;;  %475 = vset.pattern.permute.xlu1 %v509_v1  ;;  %474 = vset.pattern.permute.xlu0 %v509_v1  ;;  %v477_v2 = vld [vmem:[%s651_s1 + $0x78] sm:$0xff]   ;;  %v480_v5 = vld [vmem:[%s652_s3 + $0x8] sm:$0xff]  }
   0x2   :  { %451 = vmatprep.subr.bf16.mxu0 %v476_v0  ;;  %v478_v3 = vld [vmem:[%s651_s1 + $0x38] sm:$0xff]   ;;  %457 = vmatprep.subr.bf16.mxu1 %v477_v2  ;;  %v479_v4 = vld [vmem:[%s652_s3] sm:$0xff]   ;;  %v481_v6 = vld [vmem:[%s651_s1 + $0x70] sm:$0xff]  }
   0x3   :  { %452 = vmatpush3.bf16.msra.mxu0 %v476_v0  ;;  %465 = vmatpush3.bf16.msra.mxu1 %v478_v3  ;;  %v482_v7 = vld [vmem:[%s651_s1 + $0x30] sm:$0xff]   ;;  %v483_v8 = vld [vmem:[%s651_s1 + $0x68] sm:$0xff]   ;;  %v485_v10 = vld [vmem:[%s651_s1 + $0x60] sm:$0xff]  }
   0x4   :  { %423 = vmatprep.subr.bf16.mxu0 %v477_v2  ;;  %453 = vmatprep.mubr.msk.bf16.mxu0 %vm82_vm0, %v479_v4  ;;  %v484_v9 = vld [vmem:[%s651_s1 + $0x28] sm:$0xff]   ;;  %v486_v11 = vld [vmem:[%s651_s1 + $0x20] sm:$0xff]   ;;  %v487_v12 = vld [vmem:[%s651_s1 + $0x58] sm:$0xff]  }
   0x5   :  { %458 = vmatprep.subr.bf16.mxu1 %v481_v6  ;;  %v488_v13 = vld [vmem:[%s651_s1 + $0x18] sm:$0xff]   ;;  %v489_v14 = vld [vmem:[%s651_s1 + $0x50] sm:$0xff]   ;;  %v491_v17 = vld [vmem:[%s651_s1 + $0x48] sm:$0xff]  }
   0x6   :  { %454 = vmatmul.mubr.msk.bf16.vlgmr.msra.gmra.mxu0 %vm82_vm0, %v480_v5  ;;  %v490_v15 = vld [vmem:[%s651_s1 + $0x10] sm:$0xff]   ;;  %v500_v18 = vld [vmem:[%s653_s0 + $0x4] ss:$8 sps:$4 sm:$0xff]   ;;  %v306_v21 = vld [vmem:[%s654_s2 + $0x18] sm:$0xff] }
   0x7   :  { %424 = vmatpush3.bf16.msra.mxu0 %v478_v3  ;;  %466 = vmatpush3.bf16.msra.mxu1 %v482_v7  ;;  %v497_v16 = vld [vmem:[%s653_s0 + $0x14] ss:$8 sps:$4 sm:$0xff]   ;;  %v303_v20 = vld [vmem:[%s654_s2] sm:$0xff]  ;;  %v492_v22 = vld [vmem:[%s651_s1 + $0x8] sm:$0xff]  }
   0x8   :  { %425 = vmatprep.subr.bf16.mxu0 %v481_v6  ;;  %459 = vmatprep.subr.bf16.mxu1 %v483_v8  ;;  %v305_v19 = vld [vmem:[%s654_s2 + $0x10] sm:$0xff]  ;;  %v493_v23 = vld [vmem:[%s651_s1 + $0x40] sm:$0xff]   ;;  %v304_v24 = vld [vmem:[%s654_s2 + $0x8] sm:$0xff] }
   0x9   :  { %294 = vmatprep.mubr.bf16.mxu1 %v497_v16  ;;  %319 = vperm.xlu1 %475, %v305_v19   ;;  %v332_v25 = vld [vmem:[%s655_s5 + $0x8] sm:$0xff]  ;;  %v494_v26 = vld [vmem:[%s651_s1] sm:$0xff]   ;;  %v495_v28 = vld [vmem:[%s653_s0 + $0x10] ss:$8 sps:$4 sm:$0xff]  }
   0xa   :  { %286 = vmatprep.mubr.bf16.mxu0 %v500_v18  ;;  %309 = vperm.xlu0 %474, %v303_v20   ;;  %v331_v27 = vld [vmem:[%s655_s5] sm:$0xff]  ;;  %v334_v29 = vld [vmem:[%s655_s5 + $0x18] sm:$0xff]  ;;  %v333_v31 = vld [vmem:[%s655_s5 + $0x10] sm:$0xff] }
   0xb   :  { %426 = vmatpush3.bf16.msra.mxu0 %v482_v7  ;;  %467 = vmatpush3.bf16.msra.mxu1 %v484_v9  ;;  %v498_v30 = vld [vmem:[%s653_s0] ss:$8 sps:$4 sm:$0xff]  }
   0xc   :  { %427 = vmatprep.subr.bf16.mxu0 %v483_v8  ;;  %460 = vmatprep.subr.bf16.mxu1 %v485_v10 }
   0xd   :  { %324 = vperm.xlu1 %475, %v306_v21  }
   0xe   :  { %314 = vperm.xlu0 %474, %v304_v24  }
   0xf   :  { %428 = vmatpush3.bf16.msra.mxu0 %v484_v9  ;;  %468 = vmatpush3.bf16.msra.mxu1 %v486_v11 }
  0x10   :  { %429 = vmatprep.subr.bf16.mxu0 %v485_v10  ;;  %461 = vmatprep.subr.bf16.mxu1 %v487_v12 }
  0x11   :  { %342 = vperm.xlu1 %475, %v332_v25  }
  0x12   :  { %337 = vperm.xlu0 %474, %v331_v27  }
  0x13   :  { %430 = vmatpush3.bf16.msra.mxu0 %v486_v11  ;;  %469 = vmatpush3.bf16.msra.mxu1 %v488_v13 }
  0x14   :  { %431 = vmatprep.subr.bf16.mxu0 %v487_v12  ;;  %462 = vmatprep.subr.bf16.mxu1 %v489_v14 }
  0x15   :  { %352 = vperm.xlu1 %475, %v334_v29  }
  0x16   :  { %347 = vperm.xlu0 %474, %v333_v31  }
  0x17   :  { %432 = vmatpush3.bf16.msra.mxu0 %v488_v13  ;;  %470 = vmatpush3.bf16.msra.mxu1 %v490_v15 }
  0x18   :  { %433 = vmatprep.subr.bf16.mxu0 %v489_v14  ;;  %463 = vmatprep.subr.bf16.mxu1 %v491_v17 }
  0x1b   :  { %434 = vmatpush3.bf16.msra.mxu0 %v490_v15  ;;  %471 = vmatpush3.bf16.msra.mxu1 %v492_v22 }
  0x1c   :  { %435 = vmatprep.subr.bf16.mxu0 %v491_v17  ;;  %464 = vmatprep.subr.bf16.mxu1 %v493_v23 }
  0x1f   :  { %436 = vmatpush3.bf16.msra.mxu0 %v492_v22  ;;  %472 = vmatpush3.bf16.msra.mxu1 %v494_v26 }
  0x20   :  { %437 = vmatprep.subr.bf16.mxu0 %v493_v23 }
  0x22   :  { %295 = vmatmul.mubr.bf16.vlgmr.msra.gmra.mxu1 %v495_v28 }
  0x23   :  { %438 = vmatpush3.bf16.msra.mxu0 %v494_v26 }
  0x26   :  { %287 = vmatmul.mubr.bf16.vlgmr.msra.gmra.mxu0 %v498_v30 }
  0x84   :  { %v320_v35 = vpop.permute.xlu1 %319 }
  0x85   :  { %v310_v33 = vpop.permute.xlu0 %309 }
  0x88   :  { %v325_v38 = vpop.permute.xlu1 %324 }
  0x89   :  { %v315_v36 = vpop.permute.xlu0 %314 }
  0x8c   :  { %v343_v48 = vpop.permute.xlu1 %342 }
  0x8d   :  { %v338_v41 = vpop.permute.xlu0 %337 }
  0x90   :  { %v353_v63 = vpop.permute.xlu1 %352 }
  0x91   :  { %v348_v54 = vpop.permute.xlu0 %347 }
  0xc6   :  { %v455_v32 = vpop.f32.mrf.mxu0 }
  0xc8   :  { %v123_v34 = vpop.f32.mrf.mxu0 }
  0xca   :  { %v456_v37 = vpop.f32.mrf.mxu0 }
  0xcc   :  { %v126_v40 = vpop.f32.mrf.mxu0 }
  0xe2   :  { %v445_v39 = vpop.f32.mrf.mxu1 }
  0xe4   :  { %v446_v42 = vpop.f32.mrf.mxu1 }
  0xe5   :  { %v447_v43 = vadd.f32 %v446_v42, %v445_v39 }
  0xe6   :  { %v439_v44 = vpop.f32.mrf.mxu0  ;;  %v448_v45 = vpop.f32.mrf.mxu1 }
  0xe7   :  { %v297_v46 = vadd.f32 %v455_v32, %v447_v43 }
  0xe8   :  { %v440_v47 = vpop.f32.mrf.mxu0  ;;  %v449_v50 = vpop.f32.mrf.mxu1 }
  0xe9   :  { %v441_v49 = vadd.f32 %v440_v47, %v439_v44  ;;  %v329_v51 = vadd.f32 %v320_v35, %v297_v46  ;;  %v450_v52 = vadd.f32 %v449_v50, %v448_v45 }
  0xea   :  { %v442_v53 = vpop.f32.mrf.mxu0 }
  0xeb   :  { %v289_v55 = vadd.f32 %v441_v49, %v123_v34  ;;  %v357_v56 = vadd.f32 %v348_v54, %v329_v51  ;;  %v300_v57 = vadd.f32 %v456_v37, %v450_v52 }
  0xec   :  { %v443_v58 = vpop.f32.mrf.mxu0 }
  0xed   :  { %v327_v59 = vadd.f32 %v310_v33, %v289_v55  ;;  %v444_v60 = vadd.f32 %v443_v58, %v442_v53  ;;  %v365_v61 = vmin.f32 %v357_v56, 0.0  ;;  %v330_v62 = vadd.f32 %v325_v38, %v300_v57 }
  0xee   :  { %vm361_vm1 = vcmp.gt.f32.partialorder %v357_v56, 0.0 }
  0xef   :  { %v355_v0 = vadd.f32 %v338_v41, %v327_v59  ;;  %v292_v1 = vadd.f32 %v444_v60, %v126_v40  ;;  %v371_v2 = vmul.f32 1.442695, %v365_v61  ;;  %v358_v3 = vadd.f32 %v353_v63, %v330_v62 }
  0xf1   :  { %v363_v4 = vmin.f32 %v355_v0, 0.0  ;;  %v328_v5 = vadd.f32 %v315_v36, %v292_v1  ;;  %501 = vpow2.f32 %v371_v2  ;;  %v366_v6 = vmin.f32 %v358_v3, 0.0 }
  0xf2   :  { %vm359_vm2 = vcmp.gt.f32.partialorder %v355_v0, 0.0  ;;  %vm362_vm3 = vcmp.gt.f32.partialorder %v358_v3, 0.0 }
  0xf3   :  { %v367_v7 = vmul.f32 1.442695, %v363_v4  ;;  %v356_v8 = vadd.f32 %v343_v48, %v328_v5  ;;  %v373_v9 = vmul.f32 1.442695, %v366_v6 }
  0xf5   :  { %503 = vpow2.f32 %v367_v7  ;;  %v364_v10 = vmin.f32 %v356_v8, 0.0  ;;  %vm360_vm4 = vcmp.gt.f32.partialorder %v356_v8, 0.0 }
  0xf6   :  { %505 = vpow2.f32 %v373_v9 }
  0xf7   :  { %v369_v11 = vmul.f32 1.442695, %v364_v10 }
  0xf9   :  { %507 = vpow2.f32 %v369_v11 }
  0xfe   :  { %v502_v12 = vpop.eup %501 }
  0xff   :  { %v418_v13 = vadd.f32 -1.0, %v502_v12 }
 0x101   :  { %v381_v15 = vsel %vm361_vm1, %v357_v56, %v418_v13 }
 0x102   :  { %v504_v14 = vpop.eup %503  ;;  %385 = vst [vmem:[%s656_s6 + $0x10] sm:$0xff] %v381_v15 }
 0x103   :  { %v506_v16 = vpop.eup %505  ;;  %v416_v17 = vadd.f32 -1.0, %v504_v14 }
 0x104   :  { %v419_v18 = vadd.f32 -1.0, %v506_v16 }
 0x105   :  { %v379_v19 = vsel %vm359_vm2, %v355_v0, %v416_v17 }
 0x106   :  { %v508_v20 = vpop.eup %507  ;;  %383 = vst [vmem:[%s656_s6] sm:$0xff] %v379_v19  ;;  %v382_v21 = vsel %vm362_vm3, %v358_v3, %v419_v18 }
 0x107   :  { %386 = vst [vmem:[%s656_s6 + $0x18] sm:$0xff] %v382_v21  ;;  %v417_v22 = vadd.f32 -1.0, %v508_v20 }
 0x109   :  { %v380_v23 = vsel %vm360_vm4, %v356_v8, %v417_v22 }
 0x10a   :  { %384 = vst [vmem:[%s656_s6 + $0x8] sm:$0xff] %v380_v23 }

// kernel: stft_discriminator_forward.23
= control target key start
LH: loop header
LB: loop body
LE: loop exit
PB: predicated region body
PF: predicated region fallthrough
CT: control target
= control target key end

     0   :  { %v465_v1 = vmov 0   ;;  %vm221_vm0 = vcmask 261120   ;;  %s584_s1 = inlined_call_operand.vmem [shape: bf16[288,128], index: 1, kind: input, shape index: {}]   ;;  %s585_s0 = inlined_call_operand.vmem [shape: bf16[32,288], index: 0, kind: input, shape index: {}]   ;;  %s586_s2 = inlined_call_operand.vmem [shape: f32[32,1], index: 2, kind: input, shape index: {}]   ;;  %s587_s3 = inlined_call_operand.vmem [shape: f32[32,128], index: 3, kind: output, shape index: {}]  }
   0x1   :  { %v431_v0 = vld [vmem:[%s584_s1 + $0x78] sm:$0xff]   ;;  %429 = vset.pattern.permute.xlu0 %v465_v1  ;;  %430 = vset.pattern.permute.xlu1 %v465_v1  ;;  %v433_v3 = vld [vmem:[%s584_s1 + $0x70] sm:$0xff]   ;;  %v435_v5 = vld [vmem:[%s584_s1 + $0x68] sm:$0xff]  }
   0x2   :  { %v432_v2 = vld [vmem:[%s584_s1 + $0x38] sm:$0xff]   ;;  %388 = vmatprep.subr.bf16.mxu0 %v431_v0  ;;  %v434_v4 = vld [vmem:[%s584_s1 + $0x30] sm:$0xff]   ;;  %v436_v6 = vld [vmem:[%s584_s1 + $0x28] sm:$0xff]  }
   0x3   :  { %389 = vmatpush3.bf16.msra.mxu0 %v432_v2  ;;  %v437_v7 = vld [vmem:[%s584_s1 + $0x60] sm:$0xff]   ;;  %v439_v9 = vld [vmem:[%s584_s1 + $0x58] sm:$0xff]   ;;  %v446_v11 = vld [vmem:[%s584_s1 + $0x88] sm:$0xff]  }
   0x4   :  { %390 = vmatprep.subr.bf16.mxu0 %v433_v3  ;;  %v438_v8 = vld [vmem:[%s584_s1 + $0x20] sm:$0xff]   ;;  %v440_v10 = vld [vmem:[%s584_s1 + $0x18] sm:$0xff]   ;;  %v441_v12 = vld [vmem:[%s584_s1 + $0x50] sm:$0xff]   ;;  %420 = vmatprep.subr.bf16.mxu1 %v446_v11 }
   0x5   :  { %v442_v13 = vld [vmem:[%s584_s1 + $0x10] sm:$0xff]   ;;  %v443_v14 = vld [vmem:[%s584_s1 + $0x48] sm:$0xff]   ;;  %421 = vmatpush3.bf16.msra.mxu1 %v446_v11  ;;  %v451_v16 = vld [vmem:[%s584_s1 + $0x80] sm:$0xff]  }
   0x6   :  { %v450_v15 = vld [vmem:[%s585_s0 + $0x4] ss:$12 sps:$4 sm:$0xff]   ;;  %v452_v17 = vld [vmem:[%s585_s0 + $0x8] ss:$12 sps:$4 sm:$0xff]   ;;  %422 = vmatprep.subr.bf16.mxu1 %v451_v16  ;;  %v453_v18 = vld [vmem:[%s585_s0 + $0x20] ss:$12 sps:$4 sm:$0xff]  }
   0x7   :  { %391 = vmatpush3.bf16.msra.mxu0 %v434_v4  ;;  %260 = vmatprep.mubr.bf16.mxu0 %v450_v15  ;;  %v59_v19 = vld [vmem:[%s586_s2] sm:$0xff]  ;;  %v444_v20 = vld [vmem:[%s584_s1 + $0x8] sm:$0xff]   ;;  %v61_v21 = vld [vmem:[%s586_s2 + $0x10] sm:$0xff] }
   0x8   :  { %392 = vmatprep.subr.bf16.mxu0 %v435_v5  ;;  %424 = vmatprep.mubr.msk.bf16.mxu1 %vm221_vm0, %v452_v17  ;;  %v445_v22 = vld [vmem:[%s584_s1 + $0x40] sm:$0xff]   ;;  %v60_v23 = vld [vmem:[%s586_s2 + $0x8] sm:$0xff]  ;;  %v62_v24 = vld [vmem:[%s586_s2 + $0x18] sm:$0xff] }
   0x9   :  { %423 = vmatpush3.bf16.msra.mxu1 %v451_v16  ;;  %65 = vperm.xlu0 %429, %v59_v19   ;;  %v447_v25 = vld [vmem:[%s584_s1] sm:$0xff]   ;;  %v454_v27 = vld [vmem:[%s585_s0 + $0x1c] ss:$12 sps:$4 sm:$0xff]  }
   0xa   :  { %75 = vperm.xlu1 %430, %v61_v21   ;;  %v448_v26 = vld [vmem:[%s585_s0] ss:$12 sps:$4 sm:$0xff]   ;;  %v456_v28 = vld [vmem:[%s585_s0 + $0x18] ss:$12 sps:$4 sm:$0xff]  }
   0xb   :  { %393 = vmatpush3.bf16.msra.mxu0 %v436_v6 }
   0xc   :  { %394 = vmatprep.subr.bf16.mxu0 %v437_v7  ;;  %425 = vmatmul.mubr.msk.bf16.vlgmr.msra.gmra.mxu1 %vm221_vm0, %v453_v18 }
   0xd   :  { %70 = vperm.xlu0 %429, %v60_v23  }
   0xe   :  { %80 = vperm.xlu1 %430, %v62_v24  }
   0xf   :  { %395 = vmatpush3.bf16.msra.mxu0 %v438_v8 }
  0x10   :  { %396 = vmatprep.subr.bf16.mxu0 %v439_v9 }
  0x13   :  { %397 = vmatpush3.bf16.msra.mxu0 %v440_v10 }
  0x14   :  { %398 = vmatprep.subr.bf16.mxu0 %v441_v12 }
  0x17   :  { %399 = vmatpush3.bf16.msra.mxu0 %v442_v13 }
  0x18   :  { %400 = vmatprep.subr.bf16.mxu0 %v443_v14 }
  0x1b   :  { %401 = vmatpush3.bf16.msra.mxu0 %v444_v20 }
  0x1c   :  { %402 = vmatprep.subr.bf16.mxu0 %v445_v22 }
  0x1f   :  { %403 = vmatpush3.bf16.msra.mxu0 %v447_v25 }
  0x22   :  { %261 = vmatmul.mubr.bf16.vlgmr.msra.gmra.mxu0 %v448_v26 }
  0x23   :  { %268 = vmatprep.mubr.bf16.mxu0 %v454_v27 }
  0x2a   :  { %269 = vmatmul.mubr.bf16.gmra.mxu0 %v456_v28 }
  0x84   :  { %v66_v30 = vpop.permute.xlu0 %65 }
  0x85   :  { %v76_v46 = vpop.permute.xlu1 %75 }
  0x88   :  { %v71_v39 = vpop.permute.xlu0 %70 }
  0x89   :  { %v81_v58 = vpop.permute.xlu1 %80 }
  0xcc   :  { %v426_v29 = vpop.f32.mrf.mxu1 }
  0xce   :  { %v311_v32 = vpop.f32.mrf.mxu1 }
  0xd0   :  { %v427_v36 = vpop.f32.mrf.mxu1 }
  0xd2   :  { %v314_v43 = vpop.f32.mrf.mxu1 }
  0xe2   :  { %v404_v31 = vpop.f32.mrf.mxu0 }
  0xe4   :  { %v405_v33 = vpop.f32.mrf.mxu0 }
  0xe5   :  { %v406_v34 = vadd.f32 %v405_v33, %v404_v31 }
  0xe6   :  { %v407_v35 = vpop.f32.mrf.mxu0 }
  0xe7   :  { %v263_v37 = vadd.f32 %v406_v34, %v66_v30 }
  0xe8   :  { %v408_v38 = vpop.f32.mrf.mxu0 }
  0xe9   :  { %v409_v40 = vadd.f32 %v408_v38, %v407_v35  ;;  %v312_v41 = vadd.f32 %v311_v32, %v263_v37 }
  0xea   :  { %v410_v42 = vpop.f32.mrf.mxu0 }
  0xeb   :  { %v330_v44 = vmin.f32 %v312_v41, 0.0  ;;  %v266_v45 = vadd.f32 %v409_v40, %v71_v39  ;;  %vm326_vm1 = vcmp.gt.f32.partialorder %v312_v41, 0.0 }
  0xec   :  { %v411_v47 = vpop.f32.mrf.mxu0 }
  0xed   :  { %v334_v48 = vmul.f32 1.442695, %v330_v44  ;;  %v412_v49 = vadd.f32 %v411_v47, %v410_v42  ;;  %v315_v50 = vadd.f32 %v314_v43, %v266_v45 }
  0xee   :  { %v413_v51 = vpop.f32.mrf.mxu0 }
  0xef   :  { %457 = vpow2.f32 %v334_v48  ;;  %v271_v52 = vadd.f32 %v412_v49, %v76_v46  ;;  %v331_v53 = vmin.f32 %v315_v50, 0.0  ;;  %vm327_vm2 = vcmp.gt.f32.partialorder %v315_v50, 0.0 }
  0xf0   :  { %v414_v54 = vpop.f32.mrf.mxu0 }
  0xf1   :  { %v320_v55 = vadd.f32 %v426_v29, %v271_v52  ;;  %v336_v56 = vmul.f32 1.442695, %v331_v53  ;;  %v415_v57 = vadd.f32 %v414_v54, %v413_v51 }
  0xf3   :  { %v332_v59 = vmin.f32 %v320_v55, 0.0  ;;  %459 = vpow2.f32 %v336_v56  ;;  %v274_v60 = vadd.f32 %v415_v57, %v81_v58  ;;  %vm328_vm3 = vcmp.gt.f32.partialorder %v320_v55, 0.0 }
  0xf5   :  { %v338_v61 = vmul.f32 1.442695, %v332_v59  ;;  %v323_v62 = vadd.f32 %v427_v36, %v274_v60 }
  0xf7   :  { %461 = vpow2.f32 %v338_v61  ;;  %v333_v63 = vmin.f32 %v323_v62, 0.0  ;;  %vm329_vm4 = vcmp.gt.f32.partialorder %v323_v62, 0.0 }
  0xf9   :  { %v340_v0 = vmul.f32 1.442695, %v333_v63 }
  0xfb   :  { %463 = vpow2.f32 %v340_v0 }
  0xfc   :  { %v458_v1 = vpop.eup %457 }
  0xfd   :  { %v384_v2 = vadd.f32 -1.0, %v458_v1 }
  0xff   :  { %v346_v3 = vsel %vm326_vm1, %v312_v41, %v384_v2 }
 0x100   :  { %v460_v4 = vpop.eup %459  ;;  %350 = vst [vmem:[%s587_s3] sm:$0xff] %v346_v3 }
 0x101   :  { %v385_v5 = vadd.f32 -1.0, %v460_v4 }
 0x103   :  { %v347_v6 = vsel %vm327_vm2, %v315_v50, %v385_v5 }
 0x104   :  { %v462_v7 = vpop.eup %461  ;;  %351 = vst [vmem:[%s587_s3 + $0x8] sm:$0xff] %v347_v6 }
 0x105   :  { %v386_v8 = vadd.f32 -1.0, %v462_v7 }
 0x107   :  { %v348_v9 = vsel %vm328_vm3, %v320_v55, %v386_v8 }
 0x108   :  { %v464_v10 = vpop.eup %463  ;;  %352 = vst [vmem:[%s587_s3 + $0x10] sm:$0xff] %v348_v9 }
 0x109   :  { %v387_v11 = vadd.f32 -1.0, %v464_v10 }
 0x10b   :  { %v349_v12 = vsel %vm329_vm4, %v323_v62, %v387_v11 }
 0x10c   :  { %353 = vst [vmem:[%s587_s3 + $0x18] sm:$0xff] %v349_v12 }

// kernel: stft_discriminator_forward.24
= control target key start
LH: loop header
LB: loop body
LE: loop exit
PB: predicated region body
PF: predicated region fallthrough
CT: control target
= control target key end

     0   :  { %v685_v1 = vmov 0   ;;  %vm110_vm0 = vcmask 261120   ;;  %s859_s4 = inlined_call_operand.vmem [shape: bf16[32,128], index: 4, kind: input, shape index: {}]   ;;  %s860_s1 = inlined_call_operand.vmem [shape: bf16[384,128], index: 1, kind: input, shape index: {}]   ;;  %s861_s3 = inlined_call_operand.vmem [shape: bf16[32,32], index: 3, kind: input, shape index: {}]   ;;  %s862_s0 = inlined_call_operand.vmem [shape: bf16[32,384], index: 0, kind: input, shape index: {}]   ;;  %s863_s2 = inlined_call_operand.vmem [shape: f32[32,1], index: 2, kind: input, shape index: {}]   ;;  %s864_s5 = inlined_call_operand.vmem [shape: f32[32,1], index: 5, kind: input, shape index: {}]   ;;  %s865_s6 = inlined_call_operand.vmem [shape: f32[32,128], index: 6, kind: output, shape index: {}]  }
   0x1   :  { %v641_v0 = vld [vmem:[%s859_s4 + $0x8] sm:$0xff]   ;;  %640 = vset.pattern.permute.xlu1 %v685_v1  ;;  %639 = vset.pattern.permute.xlu0 %v685_v1  ;;  %v642_v2 = vld [vmem:[%s860_s1 + $0x78] sm:$0xff]   ;;  %v644_v4 = vld [vmem:[%s859_s4] sm:$0xff]  }
   0x2   :  { %610 = vmatprep.subr.bf16.mxu0 %v641_v0  ;;  %v643_v3 = vld [vmem:[%s860_s1 + $0x38] sm:$0xff]   ;;  %572 = vmatprep.subr.bf16.mxu1 %v642_v2  ;;  %v645_v5 = vld [vmem:[%s860_s1 + $0x70] sm:$0xff]   ;;  %v647_v7 = vld [vmem:[%s861_s3] sm:$0xff]  }
   0x3   :  { %611 = vmatpush3.bf16.msra.mxu0 %v641_v0  ;;  %573 = vmatpush3.bf16.msra.mxu1 %v643_v3  ;;  %v646_v6 = vld [vmem:[%s860_s1 + $0x30] sm:$0xff]   ;;  %v648_v8 = vld [vmem:[%s861_s3 + $0x8] sm:$0xff]   ;;  %v650_v10 = vld [vmem:[%s860_s1 + $0xb8] sm:$0xff]  }
   0x4   :  { %612 = vmatprep.subr.bf16.mxu0 %v644_v4  ;;  %574 = vmatprep.subr.bf16.mxu1 %v645_v5  ;;  %v649_v9 = vld [vmem:[%s860_s1 + $0x68] sm:$0xff]   ;;  %v652_v12 = vld [vmem:[%s860_s1 + $0x60] sm:$0xff]   ;;  %v653_v13 = vld [vmem:[%s860_s1 + $0xb0] sm:$0xff]  }
   0x5   :  { %614 = vmatprep.mubr.msk.bf16.mxu0 %vm110_vm0, %v647_v7  ;;  %v651_v11 = vld [vmem:[%s860_s1 + $0x28] sm:$0xff]   ;;  %v654_v14 = vld [vmem:[%s860_s1 + $0x20] sm:$0xff]   ;;  %v655_v15 = vld [vmem:[%s860_s1 + $0x58] sm:$0xff]  }
   0x6   :  { %v656_v16 = vld [vmem:[%s860_s1 + $0xa8] sm:$0xff]   ;;  %v657_v17 = vld [vmem:[%s860_s1 + $0x18] sm:$0xff]   ;;  %v658_v18 = vld [vmem:[%s860_s1 + $0x50] sm:$0xff]  }
   0x7   :  { %613 = vmatpush3.bf16.msra.mxu0 %v644_v4  ;;  %575 = vmatpush3.bf16.msra.mxu1 %v646_v6  ;;  %v659_v19 = vld [vmem:[%s860_s1 + $0xa0] sm:$0xff]   ;;  %v660_v20 = vld [vmem:[%s860_s1 + $0x10] sm:$0xff]   ;;  %v661_v21 = vld [vmem:[%s860_s1 + $0x48] sm:$0xff]  }
   0x8   :  { %576 = vmatprep.subr.bf16.mxu1 %v649_v9  ;;  %618 = vmatprep.subr.bf16.mxu0 %v650_v10  ;;  %v662_v22 = vld [vmem:[%s860_s1 + $0x98] sm:$0xff]   ;;  %v663_v23 = vld [vmem:[%s860_s1 + $0x8] sm:$0xff]   ;;  %v664_v24 = vld [vmem:[%s860_s1 + $0x40] sm:$0xff]  }
   0x9   :  { %v665_v25 = vld [vmem:[%s860_s1 + $0x90] sm:$0xff]   ;;  %v666_v27 = vld [vmem:[%s860_s1] sm:$0xff]   ;;  %v670_v28 = vld [vmem:[%s860_s1 + $0x88] sm:$0xff]  }
   0xa   :  { %615 = vmatmul.mubr.msk.bf16.vlgmr.msra.gmra.mxu0 %vm110_vm0, %v648_v8  ;;  %v669_v26 = vld [vmem:[%s862_s0 + $0x4] ss:$12 sps:$4 sm:$0xff]   ;;  %v667_v29 = vld [vmem:[%s862_s0] ss:$12 sps:$4 sm:$0xff]   ;;  %v674_v30 = vld [vmem:[%s862_s0 + $0x8] ss:$12 sps:$4 sm:$0xff]  }
   0xb   :  { %577 = vmatpush3.bf16.msra.mxu1 %v651_v11  ;;  %619 = vmatpush3.bf16.msra.mxu0 %v650_v10  ;;  %v672_v31 = vld [vmem:[%s862_s0 + $0x1c] ss:$12 sps:$4 sm:$0xff]   ;;  %v442_v32 = vld [vmem:[%s863_s2 + $0x10] sm:$0xff]  ;;  %v671_v33 = vld [vmem:[%s860_s1 + $0x80] sm:$0xff]  }
   0xc   :  { %578 = vmatprep.subr.bf16.mxu1 %v652_v12  ;;  %620 = vmatprep.subr.bf16.mxu0 %v653_v13  ;;  %v440_v34 = vld [vmem:[%s863_s2] sm:$0xff]  ;;  %v443_v35 = vld [vmem:[%s863_s2 + $0x18] sm:$0xff]  ;;  %v441_v36 = vld [vmem:[%s863_s2 + $0x8] sm:$0xff] }
   0xd   :  { %374 = vmatprep.mubr.bf16.mxu1 %v669_v26  ;;  %634 = vmatprep.mubr.bf16.mxu0 %v674_v30  ;;  %v675_v37 = vld [vmem:[%s862_s0 + $0x18] ss:$12 sps:$4 sm:$0xff]   ;;  %v676_v38 = vld [vmem:[%s862_s0 + $0x20] ss:$12 sps:$4 sm:$0xff]   ;;  %v470_v42 = vld [vmem:[%s864_s5 + $0x10] sm:$0xff] }
   0xe   :  { %456 = vperm.xlu1 %640, %v442_v32   ;;  %446 = vperm.xlu0 %639, %v440_v34   ;;  %v469_v39 = vld [vmem:[%s864_s5 + $0x8] sm:$0xff]  ;;  %v468_v40 = vld [vmem:[%s864_s5] sm:$0xff]  ;;  %v471_v41 = vld [vmem:[%s864_s5 + $0x18] sm:$0xff] }
   0xf   :  { %579 = vmatpush3.bf16.msra.mxu1 %v654_v14  ;;  %621 = vmatpush3.bf16.msra.mxu0 %v653_v13 }
  0x10   :  { %580 = vmatprep.subr.bf16.mxu1 %v655_v15  ;;  %622 = vmatprep.subr.bf16.mxu0 %v656_v16 }
  0x12   :  { %461 = vperm.xlu1 %640, %v443_v35   ;;  %451 = vperm.xlu0 %639, %v441_v36  }
  0x13   :  { %581 = vmatpush3.bf16.msra.mxu1 %v657_v17  ;;  %623 = vmatpush3.bf16.msra.mxu0 %v656_v16 }
  0x14   :  { %582 = vmatprep.subr.bf16.mxu1 %v658_v18  ;;  %624 = vmatprep.subr.bf16.mxu0 %v659_v19 }
  0x16   :  { %479 = vperm.xlu1 %640, %v469_v39   ;;  %474 = vperm.xlu0 %639, %v468_v40  }
  0x17   :  { %583 = vmatpush3.bf16.msra.mxu1 %v660_v20  ;;  %625 = vmatpush3.bf16.msra.mxu0 %v659_v19 }
  0x18   :  { %584 = vmatprep.subr.bf16.mxu1 %v661_v21  ;;  %626 = vmatprep.subr.bf16.mxu0 %v662_v22 }
  0x1a   :  { %489 = vperm.xlu1 %640, %v471_v41   ;;  %484 = vperm.xlu0 %639, %v470_v42  }
  0x1b   :  { %585 = vmatpush3.bf16.msra.mxu1 %v663_v23  ;;  %627 = vmatpush3.bf16.msra.mxu0 %v662_v22 }
  0x1c   :  { %586 = vmatprep.subr.bf16.mxu1 %v664_v24  ;;  %628 = vmatprep.subr.bf16.mxu0 %v665_v25 }
  0x1f   :  { %587 = vmatpush3.bf16.msra.mxu1 %v666_v27  ;;  %629 = vmatpush3.bf16.msra.mxu0 %v665_v25 }
  0x20   :  { %630 = vmatprep.subr.bf16.mxu0 %v670_v28 }
  0x22   :  { %375 = vmatmul.mubr.bf16.vlgmr.msra.gmra.mxu1 %v667_v29 }
  0x23   :  { %631 = vmatpush3.bf16.msra.mxu0 %v670_v28  ;;  %382 = vmatprep.mubr.bf16.mxu1 %v672_v31 }
  0x24   :  { %632 = vmatprep.subr.bf16.mxu0 %v671_v33 }
  0x27   :  { %633 = vmatpush3.bf16.msra.mxu0 %v671_v33 }
  0x2a   :  { %383 = vmatmul.mubr.bf16.gmra.mxu1 %v675_v37  ;;  %635 = vmatmul.mubr.bf16.vlgmr.msra.gmra.mxu0 %v676_v38 }
  0x89   :  { %v447_v45 = vpop.permute.xlu0 %446  ;;  %v457_v49 = vpop.permute.xlu1 %456 }
  0x8d   :  { %v452_v51 = vpop.permute.xlu0 %451  ;;  %v462_v57 = vpop.permute.xlu1 %461 }
  0x91   :  { %v475_v62 = vpop.permute.xlu0 %474  ;;  %v480_v12 = vpop.permute.xlu1 %479 }
  0x95   :  { %v485_v16 = vpop.permute.xlu0 %484  ;;  %v490_v24 = vpop.permute.xlu1 %489 }
  0xca   :  { %v616_v43 = vpop.f32.mrf.mxu0 }
  0xcc   :  { %v151_v44 = vpop.f32.mrf.mxu0 }
  0xce   :  { %v617_v47 = vpop.f32.mrf.mxu0 }
  0xd0   :  { %v154_v53 = vpop.f32.mrf.mxu0 }
  0xe2   :  { %v588_v46 = vpop.f32.mrf.mxu1 }
  0xe4   :  { %v589_v48 = vpop.f32.mrf.mxu1 }
  0xe5   :  { %v590_v52 = vadd.f32 %v589_v48, %v588_v46 }
  0xe6   :  { %v591_v50 = vpop.f32.mrf.mxu1 }
  0xe7   :  { %v377_v59 = vadd.f32 %v590_v52, %v151_v44 }
  0xe8   :  { %v592_v54 = vpop.f32.mrf.mxu1 }
  0xe9   :  { %v593_v58 = vadd.f32 %v592_v54, %v591_v50 }
  0xea   :  { %v594_v55 = vpop.f32.mrf.mxu1  ;;  %v636_v56 = vpop.f32.mrf.mxu0 }
  0xeb   :  { %v380_v5 = vadd.f32 %v593_v58, %v154_v53 }
  0xec   :  { %v595_v60 = vpop.f32.mrf.mxu1  ;;  %v425_v61 = vpop.f32.mrf.mxu0 }
  0xed   :  { %v596_v63 = vadd.f32 %v595_v60, %v594_v55  ;;  %v426_v0 = vadd.f32 %v425_v61, %v377_v59 }
  0xee   :  { %v597_v1 = vpop.f32.mrf.mxu1  ;;  %v637_v2 = vpop.f32.mrf.mxu0 }
  0xef   :  { %v385_v3 = vadd.f32 %v616_v43, %v596_v63  ;;  %v464_v4 = vadd.f32 %v447_v45, %v426_v0 }
  0xf0   :  { %v598_v6 = vpop.f32.mrf.mxu1  ;;  %v428_v7 = vpop.f32.mrf.mxu0 }
  0xf1   :  { %v434_v8 = vadd.f32 %v636_v56, %v385_v3  ;;  %v492_v9 = vadd.f32 %v475_v62, %v464_v4  ;;  %v599_v10 = vadd.f32 %v598_v6, %v597_v1  ;;  %v429_v11 = vadd.f32 %v428_v7, %v380_v5 }
  0xf3   :  { %v466_v13 = vadd.f32 %v457_v49, %v434_v8  ;;  %v500_v14 = vmin.f32 %v492_v9, 0.0  ;;  %v388_v15 = vadd.f32 %v617_v47, %v599_v10  ;;  %v465_v17 = vadd.f32 %v452_v51, %v429_v11 }
  0xf4   :  { %vm496_vm1 = vcmp.gt.f32.partialorder %v492_v9, 0.0 }
  0xf5   :  { %v494_v18 = vadd.f32 %v485_v16, %v466_v13  ;;  %v504_v19 = vmul.f32 1.442695, %v500_v14  ;;  %v437_v20 = vadd.f32 %v637_v2, %v388_v15  ;;  %v493_v21 = vadd.f32 %v480_v12, %v465_v17 }
  0xf7   :  { %v502_v22 = vmin.f32 %v494_v18, 0.0  ;;  %677 = vpow2.f32 %v504_v19  ;;  %v467_v23 = vadd.f32 %v462_v57, %v437_v20  ;;  %v501_v25 = vmin.f32 %v493_v21, 0.0 }
  0xf8   :  { %vm498_vm2 = vcmp.gt.f32.partialorder %v494_v18, 0.0  ;;  %vm497_vm3 = vcmp.gt.f32.partialorder %v493_v21, 0.0 }
  0xf9   :  { %v508_v26 = vmul.f32 1.442695, %v502_v22  ;;  %v495_v27 = vadd.f32 %v490_v24, %v467_v23  ;;  %v506_v28 = vmul.f32 1.442695, %v501_v25 }
  0xfb   :  { %679 = vpow2.f32 %v508_v26  ;;  %v503_v29 = vmin.f32 %v495_v27, 0.0  ;;  %vm499_vm4 = vcmp.gt.f32.partialorder %v495_v27, 0.0 }
  0xfc   :  { %681 = vpow2.f32 %v506_v28 }
  0xfd   :  { %v510_v30 = vmul.f32 1.442695, %v503_v29 }
  0xff   :  { %683 = vpow2.f32 %v510_v30 }
 0x104   :  { %v678_v31 = vpop.eup %677 }
 0x105   :  { %v564_v32 = vadd.f32 -1.0, %v678_v31 }
 0x107   :  { %v516_v33 = vsel %vm496_vm1, %v492_v9, %v564_v32 }
 0x108   :  { %v680_v34 = vpop.eup %679  ;;  %520 = vst [vmem:[%s865_s6] sm:$0xff] %v516_v33 }
 0x109   :  { %v682_v35 = vpop.eup %681  ;;  %v566_v36 = vadd.f32 -1.0, %v680_v34 }
 0x10a   :  { %v565_v37 = vadd.f32 -1.0, %v682_v35 }
 0x10b   :  { %v518_v38 = vsel %vm498_vm2, %v494_v18, %v566_v36 }
 0x10c   :  { %v684_v39 = vpop.eup %683  ;;  %522 = vst [vmem:[%s865_s6 + $0x10] sm:$0xff] %v518_v38  ;;  %v517_v40 = vsel %vm497_vm3, %v493_v21, %v565_v37 }
 0x10d   :  { %v567_v41 = vadd.f32 -1.0, %v684_v39  ;;  %521 = vst [vmem:[%s865_s6 + $0x8] sm:$0xff] %v517_v40 }
 0x10f   :  { %v519_v42 = vsel %vm499_vm4, %v495_v27, %v567_v41 }
 0x110   :  { %523 = vst [vmem:[%s865_s6 + $0x18] sm:$0xff] %v519_v42 }

// kernel: stft_discriminator_forward.26
= control target key start
LH: loop header
LB: loop body
LE: loop exit
PB: predicated region body
PF: predicated region fallthrough
CT: control target
= control target key end

     0   :  { %v1045_v1 = vmov 0   ;;  %vm148_vm0 = vcmask 261120   ;;  %s1366_s4 = inlined_call_operand.vmem [shape: bf16[32,128], index: 4, kind: input, shape index: {}]   ;;  %s1367_s1 = inlined_call_operand.vmem [shape: bf16[512,128], index: 1, kind: input, shape index: {}]   ;;  %s1368_s3 = inlined_call_operand.vmem [shape: bf16[64,32], index: 3, kind: input, shape index: {}]   ;;  %s1369_s0 = inlined_call_operand.vmem [shape: bf16[64,512], index: 0, kind: input, shape index: {}]   ;;  %s1370_s2 = inlined_call_operand.vmem [shape: f32[64,1], index: 2, kind: input, shape index: {}]   ;;  %s1371_s5 = inlined_call_operand.vmem [shape: f32[64,1], index: 5, kind: input, shape index: {}]   ;;  %s1372_s6 = inlined_call_operand.vmem [shape: f32[64,128], index: 6, kind: output, shape index: {}]  }
   0x1   :  { %v967_v0 = vld [vmem:[%s1366_s4 + $0x8] sm:$0xff]   ;;  %966 = vset.pattern.permute.xlu1 %v1045_v1  ;;  %965 = vset.pattern.permute.xlu0 %v1045_v1  ;;  %v968_v2 = vld [vmem:[%s1367_s1 + $0x78] sm:$0xff]   ;;  %v970_v4 = vld [vmem:[%s1366_s4] sm:$0xff]  }
   0x2   :  { %952 = vmatprep.subr.bf16.mxu0 %v967_v0  ;;  %v969_v3 = vld [vmem:[%s1367_s1 + $0x38] sm:$0xff]   ;;  %872 = vmatprep.subr.bf16.mxu1 %v968_v2  ;;  %v971_v5 = vld [vmem:[%s1367_s1 + $0x70] sm:$0xff]   ;;  %v973_v7 = vld [vmem:[%s1368_s3] sm:$0xff]  }
   0x3   :  { %953 = vmatpush3.bf16.msra.mxu0 %v967_v0  ;;  %873 = vmatpush3.bf16.msra.mxu1 %v969_v3  ;;  %v972_v6 = vld [vmem:[%s1367_s1 + $0x30] sm:$0xff]   ;;  %v974_v8 = vld [vmem:[%s1368_s3 + $0x8] sm:$0xff]   ;;  %v976_v10 = vld [vmem:[%s1367_s1 + $0xf8] sm:$0xff]  }
   0x4   :  { %954 = vmatprep.subr.bf16.mxu0 %v970_v4  ;;  %874 = vmatprep.subr.bf16.mxu1 %v971_v5  ;;  %v975_v9 = vld [vmem:[%s1367_s1 + $0x68] sm:$0xff]   ;;  %v978_v12 = vld [vmem:[%s1367_s1 + $0xb8] sm:$0xff]   ;;  %v979_v13 = vld [vmem:[%s1367_s1 + $0x60] sm:$0xff]  }
   0x5   :  { %956 = vmatprep.mubr.msk.bf16.mxu0 %vm148_vm0, %v973_v7  ;;  %v977_v11 = vld [vmem:[%s1367_s1 + $0x28] sm:$0xff]   ;;  %v980_v14 = vld [vmem:[%s1367_s1 + $0xf0] sm:$0xff]   ;;  %v981_v15 = vld [vmem:[%s1367_s1 + $0x20] sm:$0xff]  }
   0x6   :  { %v982_v16 = vld [vmem:[%s1367_s1 + $0xb0] sm:$0xff]   ;;  %v983_v17 = vld [vmem:[%s1367_s1 + $0x58] sm:$0xff]   ;;  %v984_v18 = vld [vmem:[%s1367_s1 + $0xe8] sm:$0xff]  }
   0x7   :  { %955 = vmatpush3.bf16.msra.mxu0 %v970_v4  ;;  %875 = vmatpush3.bf16.msra.mxu1 %v972_v6  ;;  %v985_v19 = vld [vmem:[%s1367_s1 + $0x18] sm:$0xff]   ;;  %v986_v20 = vld [vmem:[%s1367_s1 + $0xa8] sm:$0xff]   ;;  %v987_v21 = vld [vmem:[%s1367_s1 + $0x50] sm:$0xff]  }
   0x8   :  { %876 = vmatprep.subr.bf16.mxu1 %v975_v9  ;;  %912 = vmatprep.subr.bf16.mxu0 %v976_v10  ;;  %v988_v22 = vld [vmem:[%s1367_s1 + $0xe0] sm:$0xff]   ;;  %v989_v23 = vld [vmem:[%s1367_s1 + $0x10] sm:$0xff]   ;;  %v991_v25 = vld [vmem:[%s1367_s1 + $0x48] sm:$0xff]  }
   0x9   :  { %v990_v24 = vld [vmem:[%s1367_s1 + $0xa0] sm:$0xff]   ;;  %v992_v26 = vld [vmem:[%s1367_s1 + $0xd8] sm:$0xff]   ;;  %v993_v27 = vld [vmem:[%s1368_s3 + $0x10] sm:$0xff]  }
   0xa   :  { %957 = vmatmul.mubr.msk.bf16.vlgmr.msra.gmra.mxu0 %vm148_vm0, %v974_v8  ;;  %v994_v28 = vld [vmem:[%s1367_s1 + $0x8] sm:$0xff]   ;;  %v995_v29 = vld [vmem:[%s1367_s1 + $0x98] sm:$0xff]   ;;  %v997_v31 = vld [vmem:[%s1367_s1 + $0x40] sm:$0xff]  }
   0xb   :  { %877 = vmatpush3.bf16.msra.mxu1 %v977_v11  ;;  %913 = vmatpush3.bf16.msra.mxu0 %v978_v12  ;;  %v996_v30 = vld [vmem:[%s1368_s3 + $0x18] sm:$0xff]   ;;  %v998_v32 = vld [vmem:[%s1367_s1 + $0xd0] sm:$0xff]   ;;  %v999_v33 = vld [vmem:[%s1367_s1] sm:$0xff]  }
   0xc   :  { %878 = vmatprep.subr.bf16.mxu1 %v979_v13  ;;  %914 = vmatprep.subr.bf16.mxu0 %v980_v14  ;;  %v1000_v34 = vld [vmem:[%s1367_s1 + $0x90] sm:$0xff]   ;;  %v1004_v37 = vld [vmem:[%s1367_s1 + $0xc8] sm:$0xff]   ;;  %v1006_v39 = vld [vmem:[%s1367_s1 + $0xc0] sm:$0xff]  }
   0xd   :  { %960 = vmatprep.mubr.msk.bf16.mxu0 %vm148_vm0, %v993_v27  ;;  %v1001_v35 = vld [vmem:[%s1369_s0] ss:$16 sps:$4 sm:$0xff]   ;;  %v1003_v36 = vld [vmem:[%s1369_s0 + $0x4] ss:$16 sps:$4 sm:$0xff]   ;;  %v1005_v38 = vld [vmem:[%s1367_s1 + $0x88] sm:$0xff]  }
   0xe   :  { %530 = vmatprep.mubr.bf16.mxu1 %v1003_v36  ;;  %v1007_v40 = vld [vmem:[%s1367_s1 + $0x80] sm:$0xff]   ;;  %v1010_v42 = vld [vmem:[%s1369_s0 + $0x8] ss:$16 sps:$4 sm:$0xff]   ;;  %v1012_v43 = vld [vmem:[%s1369_s0 + $0xc] ss:$16 sps:$4 sm:$0xff]  }
   0xf   :  { %879 = vmatpush3.bf16.msra.mxu1 %v981_v15  ;;  %915 = vmatpush3.bf16.msra.mxu0 %v982_v16  ;;  %v1008_v41 = vld [vmem:[%s1369_s0 + $0x24] ss:$16 sps:$4 sm:$0xff]   ;;  %v1013_v44 = vld [vmem:[%s1369_s0 + $0x20] ss:$16 sps:$4 sm:$0xff]   ;;  %v1016_v46 = vld [vmem:[%s1369_s0 + $0x2c] ss:$16 sps:$4 sm:$0xff]  }
  0x10   :  { %880 = vmatprep.subr.bf16.mxu1 %v983_v17  ;;  %916 = vmatprep.subr.bf16.mxu0 %v984_v18  ;;  %v1014_v45 = vld [vmem:[%s1369_s0 + $0x44] ss:$16 sps:$4 sm:$0xff]   ;;  %v1018_v49 = vld [vmem:[%s1369_s0 + $0x40] ss:$16 sps:$4 sm:$0xff]   ;;  %v1019_v50 = vld [vmem:[%s1369_s0 + $0x28] ss:$16 sps:$4 sm:$0xff]  }
  0x11   :  { %v630_v47 = vld [vmem:[%s1370_s2 + $0x10] sm:$0xff]  ;;  %v628_v48 = vld [vmem:[%s1370_s2] sm:$0xff]  ;;  %v631_v51 = vld [vmem:[%s1370_s2 + $0x18] sm:$0xff] }
  0x12   :  { %961 = vmatmul.mubr.msk.bf16.gmra.mxu0 %vm148_vm0, %v996_v30  ;;  %648 = vperm.xlu1 %966, %v630_v47   ;;  %v1020_v52 = vld [vmem:[%s1369_s0 + $0x64] ss:$16 sps:$4 sm:$0xff]   ;;  %v1022_v53 = vld [vmem:[%s1369_s0 + $0x4c] ss:$16 sps:$4 sm:$0xff]   ;;  %v1024_v57 = vld [vmem:[%s1369_s0 + $0x60] ss:$16 sps:$4 sm:$0xff]  }
  0x13   :  { %881 = vmatpush3.bf16.msra.mxu1 %v985_v19  ;;  %917 = vmatpush3.bf16.msra.mxu0 %v986_v20  ;;  %v629_v54 = vld [vmem:[%s1370_s2 + $0x8] sm:$0xff]  ;;  %v632_v56 = vld [vmem:[%s1370_s2 + $0x20] sm:$0xff]  ;;  %v635_v59 = vld [vmem:[%s1370_s2 + $0x38] sm:$0xff] }
  0x14   :  { %882 = vmatprep.subr.bf16.mxu1 %v987_v21  ;;  %918 = vmatprep.subr.bf16.mxu0 %v988_v22  ;;  %v633_v55 = vld [vmem:[%s1370_s2 + $0x28] sm:$0xff]  ;;  %v634_v61 = vld [vmem:[%s1370_s2 + $0x30] sm:$0xff]  ;;  %v684_v63 = vld [vmem:[%s1371_s5] sm:$0xff] }
  0x15   :  { %595 = vmatprep.mubr.bf16.mxu0 %v1012_v43  ;;  %638 = vperm.xlu0 %965, %v628_v48   ;;  %v1025_v58 = vld [vmem:[%s1369_s0 + $0x48] ss:$16 sps:$4 sm:$0xff]   ;;  %v1026_v60 = vld [vmem:[%s1369_s0 + $0x6c] ss:$16 sps:$4 sm:$0xff]   ;;  %v686_v2 = vld [vmem:[%s1371_s5 + $0x10] sm:$0xff] }
  0x16   :  { %653 = vperm.xlu1 %966, %v631_v51   ;;  %v685_v62 = vld [vmem:[%s1371_s5 + $0x8] sm:$0xff]  ;;  %v687_v1 = vld [vmem:[%s1371_s5 + $0x18] sm:$0xff]  ;;  %v688_v4 = vld [vmem:[%s1371_s5 + $0x20] sm:$0xff] }
  0x17   :  { %883 = vmatpush3.bf16.msra.mxu1 %v989_v23  ;;  %919 = vmatpush3.bf16.msra.mxu0 %v990_v24  ;;  %v1028_v0 = vld [vmem:[%s1369_s0 + $0x68] ss:$16 sps:$4 sm:$0xff]   ;;  %v690_v6 = vld [vmem:[%s1371_s5 + $0x30] sm:$0xff] }
  0x18   :  { %884 = vmatprep.subr.bf16.mxu1 %v991_v25  ;;  %920 = vmatprep.subr.bf16.mxu0 %v992_v26  ;;  %v689_v3 = vld [vmem:[%s1371_s5 + $0x28] sm:$0xff]  ;;  %v691_v5 = vld [vmem:[%s1371_s5 + $0x38] sm:$0xff] }
  0x19   :  { %643 = vperm.xlu0 %965, %v629_v54  }
  0x1a   :  { %663 = vperm.xlu1 %966, %v633_v55  }
  0x1b   :  { %885 = vmatpush3.bf16.msra.mxu1 %v994_v28  ;;  %921 = vmatpush3.bf16.msra.mxu0 %v995_v29 }
  0x1c   :  { %886 = vmatprep.subr.bf16.mxu1 %v997_v31  ;;  %922 = vmatprep.subr.bf16.mxu0 %v998_v32 }
  0x1d   :  { %658 = vperm.xlu0 %965, %v632_v56  }
  0x1e   :  { %673 = vperm.xlu1 %966, %v635_v59  }
  0x1f   :  { %887 = vmatpush3.bf16.msra.mxu1 %v999_v33  ;;  %923 = vmatpush3.bf16.msra.mxu0 %v1000_v34 }
  0x20   :  { %924 = vmatprep.subr.bf16.mxu0 %v1004_v37 }
  0x21   :  { %668 = vperm.xlu0 %965, %v634_v61  }
  0x22   :  { %531 = vmatmul.mubr.bf16.vlgmr.msra.gmra.mxu1 %v1001_v35  ;;  %699 = vperm.xlu1 %966, %v685_v62  }
  0x23   :  { %925 = vmatpush3.bf16.msra.mxu0 %v1005_v38  ;;  %538 = vmatprep.mubr.bf16.mxu1 %v1008_v41 }
  0x24   :  { %926 = vmatprep.subr.bf16.mxu0 %v1006_v39 }
  0x25   :  { %694 = vperm.xlu0 %965, %v684_v63  }
  0x26   :  { %709 = vperm.xlu1 %966, %v687_v1  }
  0x27   :  { %927 = vmatpush3.bf16.msra.mxu0 %v1007_v40 }
  0x29   :  { %704 = vperm.xlu0 %965, %v686_v2  }
  0x2a   :  { %539 = vmatmul.mubr.bf16.gmra.mxu1 %v1013_v44  ;;  %596 = vmatmul.mubr.bf16.vlgmr.msra.gmra.mxu0 %v1010_v42 }
  0x2b   :  { %546 = vmatprep.mubr.bf16.mxu1 %v1014_v45  ;;  %603 = vmatprep.mubr.bf16.mxu0 %v1016_v46 }
  0x2c   :  { %719 = vperm.xlu1 %966, %v689_v3  }
  0x2d   :  { %714 = vperm.xlu0 %965, %v688_v4  }
  0x30   :  { %729 = vperm.xlu1 %966, %v691_v5  }
  0x31   :  { %724 = vperm.xlu0 %965, %v690_v6  }
  0x32   :  { %547 = vmatmul.mubr.bf16.gmra.mxu1 %v1018_v49  ;;  %604 = vmatmul.mubr.bf16.gmra.mxu0 %v1019_v50 }
  0x33   :  { %554 = vmatprep.mubr.bf16.mxu1 %v1020_v52  ;;  %611 = vmatprep.mubr.bf16.mxu0 %v1022_v53 }
  0x3a   :  { %555 = vmatmul.mubr.bf16.gmra.mxu1 %v1024_v57  ;;  %612 = vmatmul.mubr.bf16.gmra.mxu0 %v1025_v58 }
  0x3b   :  { %619 = vmatprep.mubr.bf16.mxu0 %v1026_v60 }
  0x42   :  { %620 = vmatmul.mubr.bf16.gmra.mxu0 %v1028_v0 }
  0x8d   :  { %v649_v13 = vpop.permute.xlu1 %648 }
  0x90   :  { %v639_v10 = vpop.permute.xlu0 %638 }
  0x91   :  { %v1299_v17 = vpop.permute.xlu1 %653 }
  0x94   :  { %v644_v14 = vpop.permute.xlu0 %643 }
  0x95   :  { %v1307_v24 = vpop.permute.xlu1 %663 }
  0x98   :  { %v1303_v20 = vpop.permute.xlu0 %658 }
  0x99   :  { %v1311_v36 = vpop.permute.xlu1 %673 }
  0x9c   :  { %v1309_v28 = vpop.permute.xlu0 %668 }
  0x9d   :  { %v700_v51 = vpop.permute.xlu1 %699 }
  0xa0   :  { %v695_v40 = vpop.permute.xlu0 %694 }
  0xca   :  { %v958_v7 = vpop.f32.mrf.mxu0 }
  0xcc   :  { %v195_v8 = vpop.f32.mrf.mxu0 }
  0xce   :  { %v959_v9 = vpop.f32.mrf.mxu0 }
  0xd0   :  { %v198_v11 = vpop.f32.mrf.mxu0 }
  0xd2   :  { %v1295_v12 = vpop.f32.mrf.mxu0 }
  0xd4   :  { %v1297_v15 = vpop.f32.mrf.mxu0 }
  0xd6   :  { %v1301_v18 = vpop.f32.mrf.mxu0 }
  0xd8   :  { %v1305_v22 = vpop.f32.mrf.mxu0 }
  0xe2   :  { %v888_v16 = vpop.f32.mrf.mxu1 }
  0xe4   :  { %v889_v19 = vpop.f32.mrf.mxu1 }
  0xe5   :  { %v890_v25 = vadd.f32 %v889_v19, %v888_v16 }
  0xe6   :  { %v891_v21 = vpop.f32.mrf.mxu1 }
  0xe7   :  { %v533_v31 = vadd.f32 %v890_v25, %v195_v8 }
  0xe8   :  { %v892_v23 = vpop.f32.mrf.mxu1 }
  0xe9   :  { %v893_v32 = vadd.f32 %v892_v23, %v891_v21 }
  0xea   :  { %v894_v26 = vpop.f32.mrf.mxu1  ;;  %v928_v27 = vpop.f32.mrf.mxu0 }
  0xeb   :  { %v536_v41 = vadd.f32 %v893_v32, %v198_v11 }
  0xec   :  { %v895_v29 = vpop.f32.mrf.mxu1  ;;  %v929_v30 = vpop.f32.mrf.mxu0 }
  0xed   :  { %v930_v33 = vadd.f32 %v929_v30, %v928_v27  ;;  %v896_v44 = vadd.f32 %v895_v29, %v894_v26  ;;  %v710_v26 = vpop.permute.xlu1 %709 }
  0xee   :  { %v897_v34 = vpop.f32.mrf.mxu1  ;;  %v931_v35 = vpop.f32.mrf.mxu0 }
  0xef   :  { %v598_v37 = vadd.f32 %v930_v33, %v533_v31  ;;  %v541_v54 = vadd.f32 %v958_v7, %v896_v44  ;;  %v705_v7 = vpop.permute.xlu0 %704 }
  0xf0   :  { %v898_v38 = vpop.f32.mrf.mxu1  ;;  %v932_v39 = vpop.f32.mrf.mxu0 }
  0xf1   :  { %v676_v42 = vadd.f32 %v639_v10, %v598_v37  ;;  %v933_v43 = vadd.f32 %v932_v39, %v931_v35  ;;  %v899_v55 = vadd.f32 %v898_v38, %v897_v34 }
  0xf2   :  { %v900_v45 = vpop.f32.mrf.mxu1  ;;  %v934_v46 = vpop.f32.mrf.mxu0 }
  0xf3   :  { %v1313_v47 = vadd.f32 %v695_v40, %v676_v42  ;;  %v601_v48 = vadd.f32 %v933_v43, %v536_v41  ;;  %v544_v2 = vadd.f32 %v959_v9, %v899_v55  ;;  %v715_v37 = vpop.permute.xlu0 %714 }
  0xf4   :  { %v901_v49 = vpop.f32.mrf.mxu1  ;;  %v935_v50 = vpop.f32.mrf.mxu0 }
  0xf5   :  { %v748_v52 = vmin.f32 %v1313_v47, 0.0  ;;  %v677_v53 = vadd.f32 %v644_v14, %v601_v48  ;;  %v936_v56 = vadd.f32 %v935_v50, %v934_v46  ;;  %v902_v1 = vadd.f32 %v901_v49, %v900_v45  ;;  %v720_v49 = vpop.permute.xlu1 %719 }
  0xf6   :  { %v903_v57 = vpop.f32.mrf.mxu1  ;;  %v937_v58 = vpop.f32.mrf.mxu0  ;;  %vm740_vm1 = vcmp.gt.f32.partialorder %v1313_v47, 0.0 }
  0xf7   :  { %v756_v59 = vmul.f32 1.442695, %v748_v52  ;;  %v1316_v60 = vadd.f32 %v700_v51, %v677_v53  ;;  %v606_v61 = vadd.f32 %v936_v56, %v541_v54  ;;  %v549_v19 = vadd.f32 %v902_v1, %v1297_v15 }
  0xf8   :  { %v904_v62 = vpop.f32.mrf.mxu1  ;;  %v938_v63 = vpop.f32.mrf.mxu0 }
  0xf9   :  { %1029 = vpow2.f32 %v756_v59  ;;  %v749_v0 = vmin.f32 %v1316_v60, 0.0  ;;  %v678_v3 = vadd.f32 %v649_v13, %v606_v61  ;;  %v939_v4 = vadd.f32 %v938_v63, %v937_v58 }
  0xfa   :  { %v906_v5 = vpop.f32.mrf.mxu1  ;;  %v940_v6 = vpop.f32.mrf.mxu0  ;;  %v905_v21 = vadd.f32 %v904_v62, %v903_v57  ;;  %vm741_vm2 = vcmp.gt.f32.partialorder %v1316_v60, 0.0 }
  0xfb   :  { %v758_v8 = vmul.f32 1.442695, %v749_v0  ;;  %v1319_v10 = vadd.f32 %v705_v7, %v678_v3  ;;  %v609_v11 = vadd.f32 %v939_v4, %v544_v2  ;;  %v725_v62 = vpop.permute.xlu0 %724 }
  0xfc   :  { %v907_v14 = vpop.f32.mrf.mxu1  ;;  %v941_v16 = vpop.f32.mrf.mxu0  ;;  %v552_v33 = vadd.f32 %v905_v21, %v1305_v22 }
  0xfd   :  { %1031 = vpow2.f32 %v758_v8  ;;  %v942_v23 = vadd.f32 %v941_v16, %v940_v6  ;;  %v750_v25 = vmin.f32 %v1319_v10, 0.0  ;;  %v679_v9 = vadd.f32 %v1299_v17, %v609_v11 }
  0xfe   :  { %v943_v13 = vpop.f32.mrf.mxu0  ;;  %v909_v29 = vpop.f32.mrf.mxu1  ;;  %v908_v34 = vadd.f32 %v907_v14, %v906_v5  ;;  %vm742_vm3 = vcmp.gt.f32.partialorder %v1319_v10, 0.0 }
  0xff   :  { %v614_v27 = vadd.f32 %v942_v23, %v549_v19  ;;  %v760_v30 = vmul.f32 1.442695, %v750_v25  ;;  %v1324_v31 = vadd.f32 %v710_v26, %v679_v9 }
 0x100   :  { %v944_v32 = vpop.f32.mrf.mxu0  ;;  %v910_v40 = vpop.f32.mrf.mxu1  ;;  %v557_v44 = vadd.f32 %v1295_v12, %v908_v34 }
 0x101   :  { %v680_v35 = vadd.f32 %v1303_v20, %v614_v27  ;;  %v945_v15 = vadd.f32 %v944_v32, %v943_v13  ;;  %1033 = vpow2.f32 %v760_v30  ;;  %v751_v38 = vmin.f32 %v1324_v31, 0.0 }
 0x102   :  { %v946_v39 = vpop.f32.mrf.mxu0  ;;  %v911_v20 = vadd.f32 %v910_v40, %v909_v29  ;;  %vm743_vm4 = vcmp.gt.f32.partialorder %v1324_v31, 0.0 }
 0x103   :  { %v736_v17 = vadd.f32 %v715_v37, %v680_v35  ;;  %v617_v41 = vadd.f32 %v945_v15, %v552_v33  ;;  %v762_v42 = vmul.f32 1.442695, %v751_v38 }
 0x104   :  { %v947_v43 = vpop.f32.mrf.mxu0 }
 0x105   :  { %v752_v45 = vmin.f32 %v736_v17, 0.0  ;;  %v681_v46 = vadd.f32 %v1307_v24, %v617_v41  ;;  %v948_v22 = vadd.f32 %v947_v43, %v946_v39  ;;  %1035 = vpow2.f32 %v762_v42 }
 0x106   :  { %v1030_v48 = vpop.eup %1029  ;;  %v949_v50 = vpop.f32.mrf.mxu0  ;;  %v560_v24 = vadd.f32 %v1301_v18, %v911_v20  ;;  %vm744_vm5 = vcmp.gt.f32.partialorder %v736_v17, 0.0 }
 0x107   :  { %v858_v51 = vadd.f32 -1.0, %v1030_v48  ;;  %v764_v52 = vmul.f32 1.442695, %v752_v45  ;;  %v737_v53 = vadd.f32 %v720_v49, %v681_v46  ;;  %v622_v54 = vadd.f32 %v948_v22, %v557_v44 }
 0x108   :  { %v950_v55 = vpop.f32.mrf.mxu0 }
 0x109   :  { %v780_v56 = vsel %vm740_vm1, %v1313_v47, %v858_v51  ;;  %1037 = vpow2.f32 %v764_v52  ;;  %v753_v12 = vmin.f32 %v737_v53, 0.0  ;;  %v682_v58 = vadd.f32 %v1309_v28, %v622_v54  ;;  %v730_v28 = vpop.permute.xlu1 %729 }
 0x10a   :  { %v1032_v57 = vpop.eup %1031  ;;  %788 = vst [vmem:[%s1372_s6] sm:$0xff] %v780_v56  ;;  %v951_v59 = vadd.f32 %v950_v55, %v949_v50  ;;  %vm745_vm6 = vcmp.gt.f32.partialorder %v737_v53, 0.0 }
 0x10b   :  { %v859_v61 = vadd.f32 -1.0, %v1032_v57  ;;  %v766_v63 = vmul.f32 1.442695, %v753_v12  ;;  %v738_v0 = vadd.f32 %v725_v62, %v682_v58 }
 0x10c   :  { %v625_v1 = vadd.f32 %v951_v59, %v560_v24 }
 0x10d   :  { %v781_v47 = vsel %vm741_vm2, %v1316_v60, %v859_v61  ;;  %1039 = vpow2.f32 %v766_v63  ;;  %v754_v2 = vmin.f32 %v738_v0, 0.0  ;;  %vm746_vm7 = vcmp.gt.f32.partialorder %v738_v0, 0.0 }
 0x10e   :  { %789 = vst [vmem:[%s1372_s6 + $0x8] sm:$0xff] %v781_v47  ;;  %v683_v18 = vadd.f32 %v1311_v36, %v625_v1  ;;  %v1034_v3 = vpop.eup %1033 }
 0x10f   :  { %v860_v4 = vadd.f32 -1.0, %v1034_v3  ;;  %v768_v5 = vmul.f32 1.442695, %v754_v2 }
 0x110   :  { %v739_v6 = vadd.f32 %v730_v28, %v683_v18 }
 0x111   :  { %v782_v7 = vsel %vm742_vm3, %v1319_v10, %v860_v4  ;;  %1041 = vpow2.f32 %v768_v5 }
 0x112   :  { %v755_v8 = vmin.f32 %v739_v6, 0.0  ;;  %v1036_v60 = vpop.eup %1035  ;;  %790 = vst [vmem:[%s1372_s6 + $0x10] sm:$0xff] %v782_v7  ;;  %vm747_vm8 = vcmp.gt.f32.partialorder %v739_v6, 0.0 }
 0x113   :  { %v861_v11 = vadd.f32 -1.0, %v1036_v60 }
 0x114   :  { %v770_v14 = vmul.f32 1.442695, %v755_v8 }
 0x115   :  { %v783_v16 = vsel %vm743_vm4, %v1324_v31, %v861_v11 }
 0x116   :  { %v1038_v36 = vpop.eup %1037  ;;  %1043 = vpow2.f32 %v770_v14  ;;  %791 = vst [vmem:[%s1372_s6 + $0x18] sm:$0xff] %v783_v16 }
 0x117   :  { %v862_v10 = vadd.f32 -1.0, %v1038_v36 }
 0x119   :  { %v784_v19 = vsel %vm744_vm5, %v736_v17, %v862_v10 }
 0x11a   :  { %v1040_v21 = vpop.eup %1039  ;;  %792 = vst [vmem:[%s1372_s6 + $0x20] sm:$0xff] %v784_v19 }
 0x11b   :  { %v863_v23 = vadd.f32 -1.0, %v1040_v21 }
 0x11d   :  { %v785_v25 = vsel %vm745_vm6, %v737_v53, %v863_v23 }
 0x11e   :  { %793 = vst [vmem:[%s1372_s6 + $0x28] sm:$0xff] %v785_v25  ;;  %v1042_v9 = vpop.eup %1041 }
 0x11f   :  { %v864_v13 = vadd.f32 -1.0, %v1042_v9 }
 0x121   :  { %v786_v26 = vsel %vm746_vm7, %v738_v0, %v864_v13 }
 0x122   :  { %794 = vst [vmem:[%s1372_s6 + $0x30] sm:$0xff] %v786_v26 }
 0x123   :  { %v1044_v27 = vpop.eup %1043 }
 0x124   :  { %v865_v29 = vadd.f32 -1.0, %v1044_v27 }
 0x126   :  { %v787_v30 = vsel %vm747_vm8, %v739_v6, %v865_v29 }
 0x127   :  { %795 = vst [vmem:[%s1372_s6 + $0x38] sm:$0xff] %v787_v30 }

// kernel: stft_discriminator_forward.27
= control target key start
LH: loop header
LB: loop body
LE: loop exit
PB: predicated region body
PF: predicated region fallthrough
CT: control target
= control target key end

     0   :  { %v186_v0 = vmov 0.0   ;;  %vm187_vm0 = vmmov 0   ;;  %v188_v3 = vmov 0   ;;  %v40_v13 = vlaneseq  ;;  %s242_s1 = inlined_call_operand.vmem [shape: bf16[128,128], index: 1, kind: input, shape index: {}]   ;;  %s243_s2 = inlined_call_operand.<no memory space> [shape: f32[1,1], index: 2, kind: input, shape index: {}]   ;;  %s244_s0 = inlined_call_operand.vmem [shape: bf16[1,128], index: 0, kind: input, shape index: {}]   ;;  %s245_s3 = inlined_call_operand.vmem [shape: f32[1,128], index: 3, kind: output, shape index: {}]  }
   0x1   :  { %154 = vmatprep.subr.bf16.mxu0 %v186_v0  ;;  %v178_v1 = vld [vmem:[%s242_s1 + $0x38] sm:$0xff]   ;;  %170 = vmatprep.mubr.msk.bf16.mxu0 %vm187_vm0, %v186_v0  ;;  %v8_v2 = vstv %s243_s2  ;;  %v179_v4 = vld [vmem:[%s242_s1 + $0x30] sm:$0xff]   ;;  %v180_v5 = vld [vmem:[%s242_s1 + $0x28] sm:$0xff]  }
   0x2   :  { %177 = vset.pattern.permute.xlu0 %v188_v3  ;;  %9 = vst [vmem:[#allocation2] sm:$0x1] %v8_v2  ;;  %155 = vmatpush3.bf16.msra.mxu0 %v178_v1  ;;  %v181_v7 = vld [vmem:[%s242_s1 + $0x20] sm:$0xff]   ;;  %v182_v8 = vld [vmem:[%s242_s1 + $0x18] sm:$0xff]   ;;  %v183_v9 = vld [vmem:[%s242_s1 + $0x10] sm:$0xff]   ;;  %v41_v14 = vshrl.u32 %v40_v13, 7 }
   0x3   :  { %156 = vmatprep.subr.bf16.mxu0 %v186_v0  ;;  %v184_v10 = vld [vmem:[%s242_s1 + $0x8] sm:$0xff]   ;;  %v185_v11 = vld [vmem:[%s242_s1] sm:$0xff]  }
   0x4   :  { %v17_v12 = vld [vmem:[%s244_s0] sm:$0x1]  ;;  %v42_v15 = vsub.s32 0, %v41_v14 }
   0x6   :  { %157 = vmatpush3.bf16.msra.mxu0 %v179_v4 }
   0x7   :  { %158 = vmatprep.subr.bf16.mxu0 %v186_v0 }
   0x9   :  { %v34_v6 = vld [vmem:[#allocation2] sm:$0x1] }
   0xa   :  { %37 = vperm.xlu0 %177, %v34_v6   ;;  %159 = vmatpush3.bf16.msra.mxu0 %v180_v5 }
   0xb   :  { %160 = vmatprep.subr.bf16.mxu0 %v186_v0 }
   0xe   :  { %161 = vmatpush3.bf16.msra.mxu0 %v181_v7 }
   0xf   :  { %162 = vmatprep.subr.bf16.mxu0 %v186_v0 }
  0x12   :  { %163 = vmatpush3.bf16.msra.mxu0 %v182_v8 }
  0x13   :  { %164 = vmatprep.subr.bf16.mxu0 %v186_v0 }
  0x16   :  { %165 = vmatpush3.bf16.msra.mxu0 %v183_v9 }
  0x17   :  { %166 = vmatprep.subr.bf16.mxu0 %v186_v0 }
  0x1a   :  { %167 = vmatpush3.bf16.msra.mxu0 %v184_v10 }
  0x1b   :  { %168 = vmatprep.subr.bf16.mxu0 %v186_v0 }
  0x1e   :  { %169 = vmatpush3.bf16.msra.mxu0 %v185_v11 }
  0x21   :  { %171 = vmatmul.mubr.bf16.vlgmr.msra.gmra.mxu0 %v17_v12 }
  0x85   :  { %v38_v16 = vpop.permute.xlu0 %37 }
  0x86   :  { %v43_v17 = vrot.slane %v38_v16, %v42_v15 }
  0xe1   :  { %v126_v18 = vpop.f32.mrf.mxu0 }
  0xe2   :  { %v127_v19 = vadd.f32 %v126_v18, %v43_v17 }
  0xe3   :  { %v172_v20 = vpop.f32.mrf.mxu0 }
  0xe4   :  { %132 = vst [vmem:[%s245_s3] sm:$0x1] %v127_v19 }
  0xe5   :  { %v129_v21 = vpop.f32.mrf.mxu0 }
  0xe7   :  { %v173_v22 = vpop.f32.mrf.mxu0 }

</bundles_post_ra>
